<compile_context>
chip_gen: v5e
topology: v5e:2x2
jax: 0.10.0
libtpu: 0.0.40
codegen_flags: <defaults>
</compile_context>

<pallas_src>
import math

import jax
import jax.numpy as jnp
from jax.experimental import pallas as pl
from jax.experimental.pallas import tpu as pltpu

P = 128                       # padded lane width for every feature dim
CS = 120                      # coordinate lanes start inside the 128-lane state tile
_NEG = -1e30                  # finite sentinel for masked max / softmax
_VMEM_LIMIT = 64 * 1024 * 1024
_WHOLE = pl.BlockSpec(memory_space=pltpu.MemorySpace.VMEM)
# (has_up, has_low) per rank for K == 3 (rank0: up only, rank1: both, rank2: low only)
_BRANCH_FLAGS = ((True, False), (True, True), (False, True))


# ---------------------------------------------------------------------------
# host-side padding helpers (one-time plain-JAX preprocessing)
# ---------------------------------------------------------------------------
def _pad16(n):
    return -(-n // 16) * 16


def _pad2(a, rows, cols):
    a = jnp.asarray(a, jnp.float32)
    out = jnp.zeros((rows, cols), jnp.float32)
    return out.at[: a.shape[0], : a.shape[1]].set(a)


def _pack_hx(h, x, n_pad):
    """Pack raw features (lanes [0,F)) and raw coords (lanes [CS,CS+3)) into one tile."""
    out = jnp.zeros((n_pad, P), jnp.float32)
    out = out.at[: h.shape[0], : h.shape[1]].set(jnp.asarray(h, jnp.float32))
    out = out.at[: x.shape[0], CS:CS + x.shape[1]].set(jnp.asarray(x, jnp.float32))
    return out


# ---------------------------------------------------------------------------
# Kernel 1: normalize |boundary| matrices (mean-aggregation weights), once per fwd
# ---------------------------------------------------------------------------
def _adj_norm_kernel(b1_ref, b1t_ref, b2_ref, b2t_ref,
                     o1_ref, o1t_ref, o2_ref, o2t_ref):
    def norm(b_ref, o_ref):
        a = jnp.abs(b_ref[...])
        deg = jnp.maximum(jnp.sum(a, axis=-1, keepdims=True), 1.0)
        o_ref[...] = a / deg

    norm(b1_ref, o1_ref)
    norm(b1t_ref, o1t_ref)
    norm(b2_ref, o2_ref)
    norm(b2t_ref, o2t_ref)


# ---------------------------------------------------------------------------
# Kernel 2: fused init + all depth MPL layers, grid=(depth,)
#   - state (h|x packed) for all three ranks lives in VMEM scratch across grid steps
#   - per-depth weights streamed via two stacked refs indexed by pl.program_id(0)
# ---------------------------------------------------------------------------
def _make_main_kernel(residual, cdim):
    def kernel(hx1_in, hx2_in, hx3_in, bn1, bc1, bn2, bc2,
               wi_ref, bi_ref, wsq_ref, wrow_ref,
               o1, o2, o3, s1, s2, s3):
        d = pl.program_id(0)
        lane = jax.lax.broadcasted_iota(jnp.int32, (1, P), 1)
        cmask_b = jnp.logical_and(lane >= CS, lane < CS + cdim)   # coord-lane mask
        cmask_f = cmask_b.astype(jnp.float32)

        ins = (hx1_in, hx2_in, hx3_in)
        states = (s1, s2, s3)
        outs = (o1, o2, o3)

        # step 0: init linears; coords stay in their packed lanes (init weights are
        # zero-padded, so the linear's coord lanes are exactly zero).
        @pl.when(d == 0)
        def _init():
            for j in range(3):
                raw = ins[j][...]
                h0 = (jnp.dot(raw, wi_ref[j], preferred_element_type=jnp.float32)
                      + bi_ref[j])
                states[j][...] = h0 + raw * cmask_f

        hx = [states[j][...] for j in range(3)]
        up_adj = (bn1, bn2, None)
        low_adj = (None, bc1, bc2)

        wk = [0]
        rk = [0]

        def W():                      # next square (128,128) weight of this layer
            k = wk[0]; wk[0] += 1
            return wsq_ref[0, k]

        def R():                      # next (1,128) bias / row of this layer
            k = rk[0]; rk[0] += 1
            return wrow_ref[0, k]

        new = []
        for j in range(3):
            has_up, has_low = _BRANCH_FLAGS[j]
            h = hx[j]
            nbrs = []
            if has_up:
                nbrs.append((hx[j + 1], up_adj[j]))
            if has_low:
                nbrs.append((hx[j - 1], low_adj[j]))
            n_adj = len(nbrs)

            t_node = None
            x_delta = None
            for hx_nbr, adj_ref in nbrs:
                w1h, w1a, w2, nwb = W(), W(), W(), W()
                w1d, b1, b2, crow = R(), R(), R(), R()
                # one matmul aggregates [h_nbr | x_nbr] through the normalized adjacency
                agg = jnp.dot(adj_ref[...], hx_nbr, preferred_element_type=jnp.float32)
                diff = (h - agg) * cmask_f                       # coord lanes only
                d2 = jnp.sum(diff * diff, axis=-1, keepdims=True)
                # edge MLP, concat-free (W1 split into h-rows / agg-rows / d2-row)
                t = (jnp.dot(h, w1h, preferred_element_type=jnp.float32)
                     + jnp.dot(agg, w1a, preferred_element_type=jnp.float32)
                     + d2 * w1d + b1)
                t = jnp.maximum(t, 0.0)
                m = jnp.maximum(
                    jnp.dot(t, w2, preferred_element_type=jnp.float32) + b2, 0.0)
                # coord scalar: (I,1) linear as a lane reduce; its bias sits at lane 127
                s = jnp.sum(m * crow, axis=-1, keepdims=True) + crow[0:1, P - 1:P]
                contrib = jnp.dot(m, nwb, preferred_element_type=jnp.float32)
                t_node = contrib if t_node is None else t_node + contrib
                dx = diff * s
                x_delta = dx if x_delta is None else x_delta + dx

            nw1h, nw2 = W(), W()
            nb1, nb2 = R(), R()
            t_node = jnp.maximum(
                t_node + jnp.dot(h, nw1h, preferred_element_type=jnp.float32) + nb1, 0.0)
            h_delta = jnp.dot(t_node, nw2, preferred_element_type=jnp.float32) + nb2
            h_new = (h + h_delta) if residual else h_delta
            x_new = h + x_delta * (1.0 / float(n_adj))   # coords_agg='mean' over adj types
            new.append(jnp.where(cmask_b, x_new, h_new))

        for j in range(3):
            states[j][...] = new[j]
            outs[j][...] = new[j]

    return kernel


# ---------------------------------------------------------------------------
# Kernel 3: fused readout — segment pooling (all ranks) + head MLP + log_softmax
# ---------------------------------------------------------------------------
def _make_readout_kernel(modes, n_mid, output_dim, num_graphs):
    def kernel(h1_ref, h2_ref, h3_ref, a1_ref, a2_ref, a3_ref, wh_ref, rh_ref, o_ref):
        hs = (h1_ref[...], h2_ref[...], h3_ref[...])
        aids = (a1_ref, a2_ref, a3_ref)

        pooled = []
        for idx, mode in enumerate(modes):
            h = hs[idx]
            if mode == "mean":
                m = aids[idx][...]                                 # (G, n)
                cnt = jnp.maximum(jnp.sum(m, axis=-1, keepdims=True), 1.0)
                pooled.append(jnp.dot(m, h, preferred_element_type=jnp.float32) / cnt)
            else:
                # max: per-graph 2-D masked max (no (G, n, 128) broadcast materialized)
                bcol = aids[idx][...]                              # (n, 128) graph ids
                rows = []
                for g in range(num_graphs):
                    sel = bcol == g
                    mx = jnp.max(jnp.where(sel, h, _NEG), axis=0, keepdims=True)
                    has = jnp.max(jnp.where(sel, 1.0, 0.0), axis=0, keepdims=True)
                    rows.append(jnp.where(has > 0.0, mx, 0.0))
                pooled.append(rows[0] if num_graphs == 1
                              else jnp.concatenate(rows, axis=0))
        p1, p2, p3 = pooled

        # head linear #1 over concat([p1,p2,p3]) done concat-free via row blocks; no
        # activation after the first head Linear (matches the reference Sequential).
        z = (jnp.dot(p1, wh_ref[0], preferred_element_type=jnp.float32)
             + jnp.dot(p2, wh_ref[1], preferred_element_type=jnp.float32)
             + jnp.dot(p3, wh_ref[2], preferred_element_type=jnp.float32)
             + rh_ref[0])
        for i in range(n_mid):
            z = jnp.maximum(
                jnp.dot(z, wh_ref[3 + i], preferred_element_type=jnp.float32)
                + rh_ref[1 + i], 0.0)
        logits = (jnp.dot(z, wh_ref[3 + n_mid], preferred_element_type=jnp.float32)
                  + rh_ref[1 + n_mid])

        # log_softmax over the real output columns only (padded lanes masked out)
        col = jax.lax.broadcasted_iota(jnp.int32, logits.shape, 1)
        valid = col < output_dim
        mmax = jnp.max(jnp.where(valid, logits, _NEG), axis=-1, keepdims=True)
        zc = logits - mmax
        sumexp = jnp.sum(jnp.where(valid, jnp.exp(zc), 0.0), axis=-1, keepdims=True)
        o_ref[...] = zc - jnp.log(sumexp)

    return kernel


# ---------------------------------------------------------------------------
# Parameter construction (torch.nn.Linear-style uniform init, packed & padded)
# ---------------------------------------------------------------------------
def make_params(key, input_nfs, hidden_nfs, output_dim,
                mpl_intermed, depth, mlp_hidden, mlp_dims):
    assert len(input_nfs) == 3 and len(hidden_nfs) == 3
    assert max(max(input_nfs), max(hidden_nfs)) <= CS
    assert mpl_intermed < P - 1 and max(mlp_dims) <= P and output_dim <= P

    keys = iter(jax.random.split(key, 4096))

    def unif(shape, bound):
        return jax.random.uniform(next(keys), shape, jnp.float32, -bound, bound)

    def sq(w):                                  # -> (128,128) f32 weight block
        return _pad2(w, P, P)

    def row(b):                                 # -> (1,128) f32 bias / row
        return _pad2(jnp.reshape(b, (1, -1)), 1, P)

    K, I = 3, mpl_intermed

    # --- init linears, stacked: (3,128,128) weights + (3,1,128) biases ---
    iw, ib = [], []
    for j in range(K):
        bound = 1.0 / math.sqrt(input_nfs[j])
        iw.append(sq(unif((input_nfs[j], hidden_nfs[j]), bound)))
        ib.append(row(unif((hidden_nfs[j],), bound)))
    init_w = jnp.stack(iw)
    init_b = jnp.stack(ib)

    # --- MPL layers, stacked per depth: (depth,NW,128,128) + (depth,NR,1,128) ---
    wsq_layers, wrow_layers = [], []
    for _ in range(depth):
        sqs, rows = [], []
        for j in range(K):
            F = hidden_nfs[j]
            nbs = []
            if j < K - 1:
                nbs.append(hidden_nfs[j + 1])       # up neighbor
            if j > 0:
                nbs.append(hidden_nfs[j - 1])       # low neighbor
            n_adj = len(nbs)
            bound_n = 1.0 / math.sqrt(F + I * n_adj)
            bound_i = 1.0 / math.sqrt(I)
            for nb in nbs:
                bound_e = 1.0 / math.sqrt(F + nb + 1)
                sqs += [sq(unif((F, I), bound_e)),      # edge w1 (h rows)
                        sq(unif((nb, I), bound_e)),     # edge w1 (agg rows)
                        sq(unif((I, I), bound_i)),      # edge w2
                        sq(unif((I, I), bound_n))]      # node w1 (message rows)
                crow = row(unif((1, I), bound_i))        # coord weight (I,1) as a row
                crow = crow.at[0, P - 1].set(unif((), bound_i))   # coord bias at lane 127
                rows += [row(unif((1, I), bound_e)),     # edge w1 (d2 row)
                         row(unif((I,), bound_e)),       # edge b1
                         row(unif((I,), bound_i)),       # edge b2
                         crow]
            sqs += [sq(unif((F, I), bound_n)),           # node w1 (h rows)
                    sq(unif((I, F), bound_i))]           # node w2
            rows += [row(unif((I,), bound_n)),           # node b1
                     row(unif((F,), bound_i))]           # node b2
        wsq_layers.append(jnp.stack(sqs))
        wrow_layers.append(jnp.stack(rows))
    mpl_w = jnp.stack(wsq_layers)
    mpl_r = jnp.stack(wrow_layers)

    # --- head: Linear(sum(hidden), d0), [Linear, ReLU]*(mlp_hidden-1), Linear(., out) ---
    bound = 1.0 / math.sqrt(sum(hidden_nfs))
    hsq = [sq(unif((hidden_nfs[j], mlp_dims[0]), bound)) for j in range(K)]
    hrows = [row(unif((mlp_dims[0],), bound))]
    for i in range(1, mlp_hidden):
        bound = 1.0 / math.sqrt(mlp_dims[i - 1])
        hsq.append(sq(unif((mlp_dims[i - 1], mlp_dims[i]), bound)))
        hrows.append(row(unif((mlp_dims[i],), bound)))
    bound = 1.0 / math.sqrt(mlp_dims[-1])
    hsq.append(sq(unif((mlp_dims[-1], output_dim), bound)))
    hrows.append(row(unif((output_dim,), bound)))
    head_w = jnp.stack(hsq)
    head_r = jnp.stack(hrows)

    return dict(init_w=init_w, init_b=init_b, mpl_w=mpl_w, mpl_r=mpl_r,
                head_w=head_w, head_r=head_r)


# ---------------------------------------------------------------------------
# Forward pass
# ---------------------------------------------------------------------------
def equivariant_hon_forward(params, h_1, h_2, h_3, x_1, x_2, x_3, b_1, b_2,
                            batch1, batch2, batch3, num_graphs, output_dim,
                            residual=False, pooling="max"):
    n1, n2, n3 = h_1.shape[0], h_2.shape[0], h_3.shape[0]
    n1p, n2p, n3p = _pad16(n1), _pad16(n2), _pad16(n3)
    cdim = x_1.shape[1]
    assert cdim <= P - CS

    # ---- one-time setup (plain JAX, hoisted out of the depth loop) ----
    hx1 = _pack_hx(h_1, x_1, n1p)
    hx2 = _pack_hx(h_2, x_2, n2p)
    hx3 = _pack_hx(h_3, x_3, n3p)
    b1p = _pad2(b_1, n1p, n2p)
    b2p = _pad2(b_2, n2p, n3p)
    b1t = jnp.transpose(b1p)
    b2t = jnp.transpose(b2p)

    # ---- kernel 1: adjacency normalization ----
    bn1, bc1, bn2, bc2 = pl.pallas_call(
        _adj_norm_kernel,
        out_shape=(jax.ShapeDtypeStruct((n1p, n2p), jnp.float32),
                   jax.ShapeDtypeStruct((n2p, n1p), jnp.float32),
                   jax.ShapeDtypeStruct((n2p, n3p), jnp.float32),
                   jax.ShapeDtypeStruct((n3p, n2p), jnp.float32)),
        in_specs=[_WHOLE] * 4,
        out_specs=(_WHOLE,) * 4,
        compiler_params=pltpu.CompilerParams(vmem_limit_bytes=_VMEM_LIMIT),
    )(b1p, b1t, b2p, b2t)

    # ---- kernel 2: fused init + depth MPL layers, grid=(depth,) ----
    mpl_w, mpl_r = params["mpl_w"], params["mpl_r"]
    depth, nw = mpl_w.shape[0], mpl_w.shape[1]
    nr = mpl_r.shape[1]
    h1o, h2o, h3o = pl.pallas_call(
        _make_main_kernel(residual, cdim),
        grid=(depth,),
        out_shape=(jax.ShapeDtypeStruct((n1p, P), jnp.float32),
                   jax.ShapeDtypeStruct((n2p, P), jnp.float32),
                   jax.ShapeDtypeStruct((n3p, P), jnp.float32)),
        in_specs=[
            pl.BlockSpec((n1p, P), lambda d: (0, 0)),
            pl.BlockSpec((n2p, P), lambda d: (0, 0)),
            pl.BlockSpec((n3p, P), lambda d: (0, 0)),
            pl.BlockSpec((n1p, n2p), lambda d: (0, 0)),          # bn1 (resident)
            pl.BlockSpec((n2p, n1p), lambda d: (0, 0)),          # bc1 (resident)
            pl.BlockSpec((n2p, n3p), lambda d: (0, 0)),          # bn2 (resident)
            pl.BlockSpec((n3p, n2p), lambda d: (0, 0)),          # bc2 (resident)
            pl.BlockSpec((3, P, P), lambda d: (0, 0, 0)),        # init weights
            pl.BlockSpec((3, 1, P), lambda d: (0, 0, 0)),        # init biases
            pl.BlockSpec((1, nw, P, P), lambda d: (d, 0, 0, 0)),  # per-layer weights
            pl.BlockSpec((1, nr, 1, P), lambda d: (d, 0, 0, 0)),  # per-layer rows
        ],
        out_specs=(pl.BlockSpec((n1p, P), lambda d: (0, 0)),
                   pl.BlockSpec((n2p, P), lambda d: (0, 0)),
                   pl.BlockSpec((n3p, P), lambda d: (0, 0))),
        scratch_shapes=[pltpu.VMEM((n1p, P), jnp.float32),
                        pltpu.VMEM((n2p, P), jnp.float32),
                        pltpu.VMEM((n3p, P), jnp.float32)],
        compiler_params=pltpu.CompilerParams(
            dimension_semantics=("arbitrary",),
            vmem_limit_bytes=_VMEM_LIMIT),
    )(hx1, hx2, hx3, bn1, bc1, bn2, bc2,
      params["init_w"], params["init_b"], mpl_w, mpl_r)

    # ---- kernel 3: fused readout ----
    # NOTE: reference 'max' branch intentionally uses mean pooling for rank-3 cells.
    modes = ("mean", "mean", "mean") if pooling == "mean" else ("max", "max", "mean")
    gids = jnp.arange(num_graphs, dtype=jnp.int32)
    aids = []
    for mode, batch, n, n_pad in zip(modes, (batch1, batch2, batch3),
                                     (n1, n2, n3), (n1p, n2p, n3p)):
        bpad = jnp.full((n_pad,), -1, jnp.int32).at[:n].set(batch.astype(jnp.int32))
        if mode == "mean":
            aids.append((bpad[None, :] == gids[:, None]).astype(jnp.float32))   # (G, n)
        else:
            aids.append(jnp.broadcast_to(bpad[:, None], (n_pad, P)))            # (n, 128)

    n_mid = params["head_w"].shape[0] - 4
    out = pl.pallas_call(
        _make_readout_kernel(modes, n_mid, output_dim, num_graphs),
        out_shape=jax.ShapeDtypeStruct((num_graphs, P), jnp.float32),
        in_specs=[_WHOLE] * 8,
        out_specs=_WHOLE,
        compiler_params=pltpu.CompilerParams(vmem_limit_bytes=_VMEM_LIMIT),
    )(h1o, h2o, h3o, aids[0], aids[1], aids[2], params["head_w"], params["head_r"])
    return out[:, :output_dim]


# ---------------------------------------------------------------------------
# Main
# ---------------------------------------------------------------------------
if __name__ == "__main__":
    input_nfs = [4, 6, 8]
    hidden_nfs = [16, 24, 32]
    output_dim = 5
    mpl_intermed = 32
    depth = 2
    mlp_hidden = 2
    mlp_dims = [32, 64]

    n1, n2, n3 = 24, 20, 12   # number of 0-, 1-, 2-cells
    G = 2                     # graphs in the batch

    key = jax.random.PRNGKey(0)
    ks = jax.random.split(key, 12)
    h_1 = jax.random.normal(ks[0], (n1, input_nfs[0]), jnp.float32)
    h_2 = jax.random.normal(ks[1], (n2, input_nfs[1]), jnp.float32)
    h_3 = jax.random.normal(ks[2], (n3, input_nfs[2]), jnp.float32)
    x_1 = jax.random.normal(ks[3], (n1, 3), jnp.float32)
    x_2 = jax.random.normal(ks[4], (n2, 3), jnp.float32)
    x_3 = jax.random.normal(ks[5], (n3, 3), jnp.float32)
    # signed sparse-ish incidence (boundary) matrices with entries in {-1, 0, +1}
    b_1 = (jnp.sign(jax.random.normal(ks[6], (n1, n2)))
           * (jax.random.uniform(ks[7], (n1, n2)) < 0.3).astype(jnp.float32))
    b_2 = (jnp.sign(jax.random.normal(ks[8], (n2, n3)))
           * (jax.random.uniform(ks[9], (n2, n3)) < 0.3).astype(jnp.float32))
    batch1 = (jnp.arange(n1) >= n1 // 2).astype(jnp.int32)
    batch2 = (jnp.arange(n2) >= n2 // 2).astype(jnp.int32)
    batch3 = (jnp.arange(n3) >= n3 // 2).astype(jnp.int32)

    params = make_params(jax.random.PRNGKey(42), input_nfs, hidden_nfs, output_dim,
                         mpl_intermed, depth, mlp_hidden, mlp_dims)

    fwd = jax.jit(equivariant_hon_forward,
                  static_argnames=("num_graphs", "output_dim", "residual", "pooling"))
    out = fwd(params, h_1, h_2, h_3, x_1, x_2, x_3, b_1, b_2,
              batch1, batch2, batch3, num_graphs=G, output_dim=output_dim,
              residual=False, pooling="max")
    jax.block_until_ready(out)
    assert out.shape == (G, output_dim)
    assert bool(jnp.all(jnp.isfinite(out)))
    print("KERNEL_OK")
</pallas_src>

<mosaic_0001>
module attributes {stable_mosaic.version = 11 : i64} {
  func.func @_adj_norm_kernel(%arg0: memref<32x32xf32, #tpu.memory_space<vmem>>, %arg1: memref<32x32xf32, #tpu.memory_space<vmem>>, %arg2: memref<32x16xf32, #tpu.memory_space<vmem>>, %arg3: memref<16x32xf32, #tpu.memory_space<vmem>>, %arg4: memref<32x32xf32, #tpu.memory_space<vmem>>, %arg5: memref<32x32xf32, #tpu.memory_space<vmem>>, %arg6: memref<32x16xf32, #tpu.memory_space<vmem>>, %arg7: memref<16x32xf32, #tpu.memory_space<vmem>>) attributes {dimension_semantics = [], scalar_prefetch = 0 : i64, scratch_operands = 0 : i64, tpu.core_type = #tpu.core_type<tc>} {
    %c0 = arith.constant 0 : index
    %c0_0 = arith.constant 0 : index
    %0 = vector.load %arg0[%c0, %c0_0] : memref<32x32xf32, #tpu.memory_space<vmem>>, vector<32x32xf32>
    %1 = math.absf %0 : vector<32x32xf32>
    %cst = arith.constant dense<0.000000e+00> : vector<32xf32>
    %2 = vector.multi_reduction <add>, %1, %cst [1] : vector<32x32xf32> to vector<32xf32>
    %3 = vector.shape_cast %2 : vector<32xf32> to vector<32x1xf32>
    %cst_1 = arith.constant 1.000000e+00 : f32
    %4 = vector.broadcast %cst_1 : f32 to vector<32x1xf32>
    %5 = arith.maximumf %3, %4 : vector<32x1xf32>
    %6 = vector.broadcast %5 : vector<32x1xf32> to vector<32x32xf32>
    %7 = arith.divf %1, %6 : vector<32x32xf32>
    %c0_2 = arith.constant 0 : index
    %c0_3 = arith.constant 0 : index
    %8 = vector.load %arg4[%c0_2, %c0_3] : memref<32x32xf32, #tpu.memory_space<vmem>>, vector<32x32xf32>
    tpu.vector_store %arg4[%c0_2, %c0_3], %7 {strides = array<i32>} : memref<32x32xf32, #tpu.memory_space<vmem>>, vector<32x32xf32>,
    %c0_4 = arith.constant 0 : index
    %c0_5 = arith.constant 0 : index
    %9 = vector.load %arg1[%c0_4, %c0_5] : memref<32x32xf32, #tpu.memory_space<vmem>>, vector<32x32xf32>
    %10 = math.absf %9 : vector<32x32xf32>
    %cst_6 = arith.constant dense<0.000000e+00> : vector<32xf32>
    %11 = vector.multi_reduction <add>, %10, %cst_6 [1] : vector<32x32xf32> to vector<32xf32>
    %12 = vector.shape_cast %11 : vector<32xf32> to vector<32x1xf32>
    %cst_7 = arith.constant 1.000000e+00 : f32
    %13 = vector.broadcast %cst_7 : f32 to vector<32x1xf32>
    %14 = arith.maximumf %12, %13 : vector<32x1xf32>
    %15 = vector.broadcast %14 : vector<32x1xf32> to vector<32x32xf32>
    %16 = arith.divf %10, %15 : vector<32x32xf32>
    %c0_8 = arith.constant 0 : index
    %c0_9 = arith.constant 0 : index
    %17 = vector.load %arg5[%c0_8, %c0_9] : memref<32x32xf32, #tpu.memory_space<vmem>>, vector<32x32xf32>
    tpu.vector_store %arg5[%c0_8, %c0_9], %16 {strides = array<i32>} : memref<32x32xf32, #tpu.memory_space<vmem>>, vector<32x32xf32>,
    %c0_10 = arith.constant 0 : index
    %c0_11 = arith.constant 0 : index
    %18 = vector.load %arg2[%c0_10, %c0_11] : memref<32x16xf32, #tpu.memory_space<vmem>>, vector<32x16xf32>
    %19 = math.absf %18 : vector<32x16xf32>
    %cst_12 = arith.constant dense<0.000000e+00> : vector<32xf32>
    %20 = vector.multi_reduction <add>, %19, %cst_12 [1] : vector<32x16xf32> to vector<32xf32>
    %21 = vector.shape_cast %20 : vector<32xf32> to vector<32x1xf32>
    %cst_13 = arith.constant 1.000000e+00 : f32
    %22 = vector.broadcast %cst_13 : f32 to vector<32x1xf32>
    %23 = arith.maximumf %21, %22 : vector<32x1xf32>
    %24 = vector.broadcast %23 : vector<32x1xf32> to vector<32x16xf32>
    %25 = arith.divf %19, %24 : vector<32x16xf32>
    %c0_14 = arith.constant 0 : index
    %c0_15 = arith.constant 0 : index
    %26 = vector.load %arg6[%c0_14, %c0_15] : memref<32x16xf32, #tpu.memory_space<vmem>>, vector<32x16xf32>
    tpu.vector_store %arg6[%c0_14, %c0_15], %25 {strides = array<i32>} : memref<32x16xf32, #tpu.memory_space<vmem>>, vector<32x16xf32>,
    %c0_16 = arith.constant 0 : index
    %c0_17 = arith.constant 0 : index
    %27 = vector.load %arg3[%c0_16, %c0_17] : memref<16x32xf32, #tpu.memory_space<vmem>>, vector<16x32xf32>
    %28 = math.absf %27 : vector<16x32xf32>
    %cst_18 = arith.constant dense<0.000000e+00> : vector<16xf32>
    %29 = vector.multi_reduction <add>, %28, %cst_18 [1] : vector<16x32xf32> to vector<16xf32>
    %30 = vector.shape_cast %29 : vector<16xf32> to vector<16x1xf32>
    %cst_19 = arith.constant 1.000000e+00 : f32
    %31 = vector.broadcast %cst_19 : f32 to vector<16x1xf32>
    %32 = arith.maximumf %30, %31 : vector<16x1xf32>
    %33 = vector.broadcast %32 : vector<16x1xf32> to vector<16x32xf32>
    %34 = arith.divf %28, %33 : vector<16x32xf32>
    %c0_20 = arith.constant 0 : index
    %c0_21 = arith.constant 0 : index
    %35 = vector.load %arg7[%c0_20, %c0_21] : memref<16x32xf32, #tpu.memory_space<vmem>>, vector<16x32xf32>
    tpu.vector_store %arg7[%c0_20, %c0_21], %34 {strides = array<i32>} : memref<16x32xf32, #tpu.memory_space<vmem>>, vector<16x32xf32>,
    return
  }
}

module attributes {stable_mosaic.version = 11 : i64} {
  func.func @kernel(%arg0: i32, %arg1: memref<32x128xf32, #tpu.memory_space<vmem>>, %arg2: memref<32x128xf32, #tpu.memory_space<vmem>>, %arg3: memref<16x128xf32, #tpu.memory_space<vmem>>, %arg4: memref<32x32xf32, #tpu.memory_space<vmem>>, %arg5: memref<32x32xf32, #tpu.memory_space<vmem>>, %arg6: memref<32x16xf32, #tpu.memory_space<vmem>>, %arg7: memref<16x32xf32, #tpu.memory_space<vmem>>, %arg8: memref<3x128x128xf32, #tpu.memory_space<vmem>>, %arg9: memref<3x1x128xf32, #tpu.memory_space<vmem>>, %arg10: memref<1x22x128x128xf32, #tpu.memory_space<vmem>>, %arg11: memref<1x22x1x128xf32, #tpu.memory_space<vmem>>, %arg12: memref<32x128xf32, #tpu.memory_space<vmem>>, %arg13: memref<32x128xf32, #tpu.memory_space<vmem>>, %arg14: memref<16x128xf32, #tpu.memory_space<vmem>>, %arg15: memref<32x128xf32, #tpu.memory_space<vmem>>, %arg16: memref<32x128xf32, #tpu.memory_space<vmem>>, %arg17: memref<16x128xf32, #tpu.memory_space<vmem>>) attributes {dimension_semantics = [#tpu.dimension_semantics<arbitrary>], iteration_bounds = array<i64: 2>, scalar_prefetch = 0 : i64, scratch_operands = 3 : i64, tpu.core_type = #tpu.core_type<tc>, window_params = [{pipeline_mode = #tpu.pipeline_mode<synchronous>, transform_indices = @transform_0, window_bounds = array<i64: 32, 128>}, {pipeline_mode = #tpu.pipeline_mode<synchronous>, transform_indices = @transform_1, window_bounds = array<i64: 32, 128>}, {pipeline_mode = #tpu.pipeline_mode<synchronous>, transform_indices = @transform_2, window_bounds = array<i64: 16, 128>}, {pipeline_mode = #tpu.pipeline_mode<synchronous>, transform_indices = @transform_3, window_bounds = array<i64: 32, 32>}, {pipeline_mode = #tpu.pipeline_mode<synchronous>, transform_indices = @transform_4, window_bounds = array<i64: 32, 32>}, {pipeline_mode = #tpu.pipeline_mode<synchronous>, transform_indices = @transform_5, window_bounds = array<i64: 32, 16>}, {pipeline_mode = #tpu.pipeline_mode<synchronous>, transform_indices = @transform_6, window_bounds = array<i64: 16, 32>}, {pipeline_mode = #tpu.pipeline_mode<synchronous>, transform_indices = @transform_7, window_bounds = array<i64: 3, 128, 128>}, {pipeline_mode = #tpu.pipeline_mode<synchronous>, transform_indices = @transform_8, window_bounds = array<i64: 3, 1, 128>}, {transform_indices = @transform_9, window_bounds = array<i64: 1, 22, 128, 128>}, {transform_indices = @transform_10, window_bounds = array<i64: 1, 22, 1, 128>}, {pipeline_mode = #tpu.pipeline_mode<synchronous>, transform_indices = @transform_11, window_bounds = array<i64: 32, 128>}, {pipeline_mode = #tpu.pipeline_mode<synchronous>, transform_indices = @transform_12, window_bounds = array<i64: 32, 128>}, {pipeline_mode = #tpu.pipeline_mode<synchronous>, transform_indices = @transform_13, window_bounds = array<i64: 16, 128>}]} {
    %0 = tpu.iota {dimensions = array<i32: 1>} : vector<1x128xi32>
    %c120_i32 = arith.constant 120 : i32
    %1 = vector.broadcast %c120_i32 : i32 to vector<1x128xi32>
    %2 = arith.cmpi sge, %0, %1 : vector<1x128xi32>
    %c123_i32 = arith.constant 123 : i32
    %3 = vector.broadcast %c123_i32 : i32 to vector<1x128xi32>
    %4 = arith.cmpi slt, %0, %3 : vector<1x128xi32>
    %5 = arith.andi %2, %4 : vector<1x128xi1>
    %6 = arith.extui %5 : vector<1x128xi1> to vector<1x128xi32>
    %7 = arith.sitofp %6 : vector<1x128xi32> to vector<1x128xf32>
    %c0_i32 = arith.constant 0 : i32
    %8 = arith.cmpi eq, %arg0, %c0_i32 : i32
    %9 = arith.extui %8 : i1 to i32
    %c0_i32_0 = arith.constant 0 : i32
    %10 = arith.cmpi ne, %9, %c0_i32_0 : i32
    scf.if %10 {
      %c0_228 = arith.constant 0 : index
      %c0_229 = arith.constant 0 : index
      %291 = vector.load %arg1[%c0_228, %c0_229] : memref<32x128xf32, #tpu.memory_space<vmem>>, vector<32x128xf32>
      %c0_230 = arith.constant 0 : index
      %c0_231 = arith.constant 0 : index
      %c0_232 = arith.constant 0 : index
      %292 = vector.load %arg8[%c0_230, %c0_231, %c0_232] : memref<3x128x128xf32, #tpu.memory_space<vmem>>, vector<1x128x128xf32>
      %293 = vector.shape_cast %292 : vector<1x128x128xf32> to vector<128x128xf32>
      %cst_233 = arith.constant dense<0.000000e+00> : vector<32x128xf32>
      %294 = tpu.matmul %291, %293, %cst_233 {dimension_numbers = #tpu.dot_dimension_numbers<[1], [0], [0], [1], [0, 0, 1, 1], [], []>} : vector<32x128xf32>, vector<128x128xf32>, vector<32x128xf32> -> vector<32x128xf32>
      %c0_234 = arith.constant 0 : index
      %c0_235 = arith.constant 0 : index
      %c0_236 = arith.constant 0 : index
      %295 = vector.load %arg9[%c0_234, %c0_235, %c0_236] : memref<3x1x128xf32, #tpu.memory_space<vmem>>, vector<1x1x128xf32>
      %296 = vector.shape_cast %295 : vector<1x1x128xf32> to vector<1x128xf32>
      %297 = vector.broadcast %296 : vector<1x128xf32> to vector<32x128xf32>
      %298 = arith.addf %294, %297 : vector<32x128xf32>
      %299 = vector.broadcast %7 : vector<1x128xf32> to vector<32x128xf32>
      %300 = arith.mulf %291, %299 : vector<32x128xf32>
      %301 = arith.addf %298, %300 : vector<32x128xf32>
      %c0_237 = arith.constant 0 : index
      %c0_238 = arith.constant 0 : index
      %302 = vector.load %arg15[%c0_237, %c0_238] : memref<32x128xf32, #tpu.memory_space<vmem>>, vector<32x128xf32>
      tpu.vector_store %arg15[%c0_237, %c0_238], %301 {strides = array<i32>} : memref<32x128xf32, #tpu.memory_space<vmem>>, vector<32x128xf32>,
      %c0_239 = arith.constant 0 : index
      %c0_240 = arith.constant 0 : index
      %303 = vector.load %arg2[%c0_239, %c0_240] : memref<32x128xf32, #tpu.memory_space<vmem>>, vector<32x128xf32>
      %c1_241 = arith.constant 1 : index
      %c0_242 = arith.constant 0 : index
      %c0_243 = arith.constant 0 : index
      %304 = vector.load %arg8[%c1_241, %c0_242, %c0_243] : memref<3x128x128xf32, #tpu.memory_space<vmem>>, vector<1x128x128xf32>
      %305 = vector.shape_cast %304 : vector<1x128x128xf32> to vector<128x128xf32>
      %cst_244 = arith.constant dense<0.000000e+00> : vector<32x128xf32>
      %306 = tpu.matmul %303, %305, %cst_244 {dimension_numbers = #tpu.dot_dimension_numbers<[1], [0], [0], [1], [0, 0, 1, 1], [], []>} : vector<32x128xf32>, vector<128x128xf32>, vector<32x128xf32> -> vector<32x128xf32>
      %c1_245 = arith.constant 1 : index
      %c0_246 = arith.constant 0 : index
      %c0_247 = arith.constant 0 : index
      %307 = vector.load %arg9[%c1_245, %c0_246, %c0_247] : memref<3x1x128xf32, #tpu.memory_space<vmem>>, vector<1x1x128xf32>
      %308 = vector.shape_cast %307 : vector<1x1x128xf32> to vector<1x128xf32>
      %309 = vector.broadcast %308 : vector<1x128xf32> to vector<32x128xf32>
      %310 = arith.addf %306, %309 : vector<32x128xf32>
      %311 = vector.broadcast %7 : vector<1x128xf32> to vector<32x128xf32>
      %312 = arith.mulf %303, %311 : vector<32x128xf32>
      %313 = arith.addf %310, %312 : vector<32x128xf32>
      %c0_248 = arith.constant 0 : index
      %c0_249 = arith.constant 0 : index
      %314 = vector.load %arg16[%c0_248, %c0_249] : memref<32x128xf32, #tpu.memory_space<vmem>>, vector<32x128xf32>
      tpu.vector_store %arg16[%c0_248, %c0_249], %313 {strides = array<i32>} : memref<32x128xf32, #tpu.memory_space<vmem>>, vector<32x128xf32>,
      %c0_250 = arith.constant 0 : index
      %c0_251 = arith.constant 0 : index
      %315 = vector.load %arg3[%c0_250, %c0_251] : memref<16x128xf32, #tpu.memory_space<vmem>>, vector<16x128xf32>
      %c2_252 = arith.constant 2 : index
      %c0_253 = arith.constant 0 : index
      %c0_254 = arith.constant 0 : index
      %316 = vector.load %arg8[%c2_252, %c0_253, %c0_254] : memref<3x128x128xf32, #tpu.memory_space<vmem>>, vector<1x128x128xf32>
      %317 = vector.shape_cast %316 : vector<1x128x128xf32> to vector<128x128xf32>
      %cst_255 = arith.constant dense<0.000000e+00> : vector<16x128xf32>
      %318 = tpu.matmul %315, %317, %cst_255 {dimension_numbers = #tpu.dot_dimension_numbers<[1], [0], [0], [1], [0, 0, 1, 1], [], []>} : vector<16x128xf32>, vector<128x128xf32>, vector<16x128xf32> -> vector<16x128xf32>
      %c2_256 = arith.constant 2 : index
      %c0_257 = arith.constant 0 : index
      %c0_258 = arith.constant 0 : index
      %319 = vector.load %arg9[%c2_256, %c0_257, %c0_258] : memref<3x1x128xf32, #tpu.memory_space<vmem>>, vector<1x1x128xf32>
      %320 = vector.shape_cast %319 : vector<1x1x128xf32> to vector<1x128xf32>
      %321 = vector.broadcast %320 : vector<1x128xf32> to vector<16x128xf32>
      %322 = arith.addf %318, %321 : vector<16x128xf32>
      %323 = vector.broadcast %7 : vector<1x128xf32> to vector<16x128xf32>
      %324 = arith.mulf %315, %323 : vector<16x128xf32>
      %325 = arith.addf %322, %324 : vector<16x128xf32>
      %c0_259 = arith.constant 0 : index
      %c0_260 = arith.constant 0 : index
      %326 = vector.load %arg17[%c0_259, %c0_260] : memref<16x128xf32, #tpu.memory_space<vmem>>, vector<16x128xf32>
      tpu.vector_store %arg17[%c0_259, %c0_260], %325 {strides = array<i32>} : memref<16x128xf32, #tpu.memory_space<vmem>>, vector<16x128xf32>,
    } else {
    }
    %c0 = arith.constant 0 : index
    %c0_1 = arith.constant 0 : index
    %11 = vector.load %arg15[%c0, %c0_1] : memref<32x128xf32, #tpu.memory_space<vmem>>, vector<32x128xf32>
    %c0_2 = arith.constant 0 : index
    %c0_3 = arith.constant 0 : index
    %12 = vector.load %arg16[%c0_2, %c0_3] : memref<32x128xf32, #tpu.memory_space<vmem>>, vector<32x128xf32>
    %c0_4 = arith.constant 0 : index
    %c0_5 = arith.constant 0 : index
    %13 = vector.load %arg17[%c0_4, %c0_5] : memref<16x128xf32, #tpu.memory_space<vmem>>, vector<16x128xf32>
    %c0_6 = arith.constant 0 : index
    %c0_7 = arith.constant 0 : index
    %c0_8 = arith.constant 0 : index
    %c0_9 = arith.constant 0 : index
    %14 = vector.load %arg10[%c0_6, %c0_7, %c0_8, %c0_9] : memref<1x22x128x128xf32, #tpu.memory_space<vmem>>, vector<1x1x128x128xf32>
    %15 = vector.shape_cast %14 : vector<1x1x128x128xf32> to vector<128x128xf32>
    %c0_10 = arith.constant 0 : index
    %c1 = arith.constant 1 : index
    %c0_11 = arith.constant 0 : index
    %c0_12 = arith.constant 0 : index
    %16 = vector.load %arg10[%c0_10, %c1, %c0_11, %c0_12] : memref<1x22x128x128xf32, #tpu.memory_space<vmem>>, vector<1x1x128x128xf32>
    %17 = vector.shape_cast %16 : vector<1x1x128x128xf32> to vector<128x128xf32>
    %c0_13 = arith.constant 0 : index
    %c2 = arith.constant 2 : index
    %c0_14 = arith.constant 0 : index
    %c0_15 = arith.constant 0 : index
    %18 = vector.load %arg10[%c0_13, %c2, %c0_14, %c0_15] : memref<1x22x128x128xf32, #tpu.memory_space<vmem>>, vector<1x1x128x128xf32>
    %19 = vector.shape_cast %18 : vector<1x1x128x128xf32> to vector<128x128xf32>
    %c0_16 = arith.constant 0 : index
    %c3 = arith.constant 3 : index
    %c0_17 = arith.constant 0 : index
    %c0_18 = arith.constant 0 : index
    %20 = vector.load %arg10[%c0_16, %c3, %c0_17, %c0_18] : memref<1x22x128x128xf32, #tpu.memory_space<vmem>>, vector<1x1x128x128xf32>
    %21 = vector.shape_cast %20 : vector<1x1x128x128xf32> to vector<128x128xf32>
    %c0_19 = arith.constant 0 : index
    %c0_20 = arith.constant 0 : index
    %c0_21 = arith.constant 0 : index
    %c0_22 = arith.constant 0 : index
    %22 = vector.load %arg11[%c0_19, %c0_20, %c0_21, %c0_22] : memref<1x22x1x128xf32, #tpu.memory_space<vmem>>, vector<1x1x1x128xf32>
    %23 = vector.shape_cast %22 : vector<1x1x1x128xf32> to vector<1x128xf32>
    %c0_23 = arith.constant 0 : index
    %c1_24 = arith.constant 1 : index
    %c0_25 = arith.constant 0 : index
    %c0_26 = arith.constant 0 : index
    %24 = vector.load %arg11[%c0_23, %c1_24, %c0_25, %c0_26] : memref<1x22x1x128xf32, #tpu.memory_space<vmem>>, vector<1x1x1x128xf32>
    %25 = vector.shape_cast %24 : vector<1x1x1x128xf32> to vector<1x128xf32>
    %c0_27 = arith.constant 0 : index
    %c2_28 = arith.constant 2 : index
    %c0_29 = arith.constant 0 : index
    %c0_30 = arith.constant 0 : index
    %26 = vector.load %arg11[%c0_27, %c2_28, %c0_29, %c0_30] : memref<1x22x1x128xf32, #tpu.memory_space<vmem>>, vector<1x1x1x128xf32>
    %27 = vector.shape_cast %26 : vector<1x1x1x128xf32> to vector<1x128xf32>
    %c0_31 = arith.constant 0 : index
    %c3_32 = arith.constant 3 : index
    %c0_33 = arith.constant 0 : index
    %c0_34 = arith.constant 0 : index
    %28 = vector.load %arg11[%c0_31, %c3_32, %c0_33, %c0_34] : memref<1x22x1x128xf32, #tpu.memory_space<vmem>>, vector<1x1x1x128xf32>
    %29 = vector.shape_cast %28 : vector<1x1x1x128xf32> to vector<1x128xf32>
    %c0_35 = arith.constant 0 : index
    %c0_36 = arith.constant 0 : index
    %30 = vector.load %arg4[%c0_35, %c0_36] : memref<32x32xf32, #tpu.memory_space<vmem>>, vector<32x32xf32>
    %cst = arith.constant dense<0.000000e+00> : vector<32x128xf32>
    %31 = tpu.matmul %30, %12, %cst {dimension_numbers = #tpu.dot_dimension_numbers<[1], [0], [0], [1], [0, 0, 1, 1], [], []>} : vector<32x32xf32>, vector<32x128xf32>, vector<32x128xf32> -> vector<32x128xf32>
    %32 = arith.subf %11, %31 : vector<32x128xf32>
    %33 = vector.broadcast %7 : vector<1x128xf32> to vector<32x128xf32>
    %34 = arith.mulf %32, %33 : vector<32x128xf32>
    %35 = arith.mulf %34, %34 : vector<32x128xf32>
    %cst_37 = arith.constant dense<0.000000e+00> : vector<32xf32>
    %36 = vector.multi_reduction <add>, %35, %cst_37 [1] : vector<32x128xf32> to vector<32xf32>
    %37 = vector.shape_cast %36 : vector<32xf32> to vector<32x1xf32>
    %cst_38 = arith.constant dense<0.000000e+00> : vector<32x128xf32>
    %38 = tpu.matmul %11, %15, %cst_38 {dimension_numbers = #tpu.dot_dimension_numbers<[1], [0], [0], [1], [0, 0, 1, 1], [], []>} : vector<32x128xf32>, vector<128x128xf32>, vector<32x128xf32> -> vector<32x128xf32>
    %cst_39 = arith.constant dense<0.000000e+00> : vector<32x128xf32>
    %39 = tpu.matmul %31, %17, %cst_39 {dimension_numbers = #tpu.dot_dimension_numbers<[1], [0], [0], [1], [0, 0, 1, 1], [], []>} : vector<32x128xf32>, vector<128x128xf32>, vector<32x128xf32> -> vector<32x128xf32>
    %40 = arith.addf %38, %39 : vector<32x128xf32>
    %41 = vector.broadcast %37 : vector<32x1xf32> to vector<32x128xf32>
    %42 = vector.broadcast %23 : vector<1x128xf32> to vector<32x128xf32>
    %43 = arith.mulf %41, %42 : vector<32x128xf32>
    %44 = arith.addf %40, %43 : vector<32x128xf32>
    %45 = vector.broadcast %25 : vector<1x128xf32> to vector<32x128xf32>
    %46 = arith.addf %44, %45 : vector<32x128xf32>
    %cst_40 = arith.constant 0.000000e+00 : f32
    %47 = vector.broadcast %cst_40 : f32 to vector<32x128xf32>
    %48 = arith.maximumf %46, %47 : vector<32x128xf32>
    %cst_41 = arith.constant dense<0.000000e+00> : vector<32x128xf32>
    %49 = tpu.matmul %48, %19, %cst_41 {dimension_numbers = #tpu.dot_dimension_numbers<[1], [0], [0], [1], [0, 0, 1, 1], [], []>} : vector<32x128xf32>, vector<128x128xf32>, vector<32x128xf32> -> vector<32x128xf32>
    %50 = vector.broadcast %27 : vector<1x128xf32> to vector<32x128xf32>
    %51 = arith.addf %49, %50 : vector<32x128xf32>
    %cst_42 = arith.constant 0.000000e+00 : f32
    %52 = vector.broadcast %cst_42 : f32 to vector<32x128xf32>
    %53 = arith.maximumf %51, %52 : vector<32x128xf32>
    %54 = vector.broadcast %29 : vector<1x128xf32> to vector<32x128xf32>
    %55 = arith.mulf %53, %54 : vector<32x128xf32>
    %cst_43 = arith.constant dense<0.000000e+00> : vector<32xf32>
    %56 = vector.multi_reduction <add>, %55, %cst_43 [1] : vector<32x128xf32> to vector<32xf32>
    %57 = vector.shape_cast %56 : vector<32xf32> to vector<32x1xf32>
    %58 = vector.extract_strided_slice %29 {offsets = [0, 127], sizes = [1, 1], strides = [1, 1]} : vector<1x128xf32> to vector<1x1xf32>
    %59 = vector.broadcast %58 : vector<1x1xf32> to vector<32x1xf32>
    %60 = arith.addf %57, %59 : vector<32x1xf32>
    %cst_44 = arith.constant dense<0.000000e+00> : vector<32x128xf32>
    %61 = tpu.matmul %53, %21, %cst_44 {dimension_numbers = #tpu.dot_dimension_numbers<[1], [0], [0], [1], [0, 0, 1, 1], [], []>} : vector<32x128xf32>, vector<128x128xf32>, vector<32x128xf32> -> vector<32x128xf32>
    %62 = vector.broadcast %60 : vector<32x1xf32> to vector<32x128xf32>
    %63 = arith.mulf %34, %62 : vector<32x128xf32>
    %c0_45 = arith.constant 0 : index
    %c4 = arith.constant 4 : index
    %c0_46 = arith.constant 0 : index
    %c0_47 = arith.constant 0 : index
    %64 = vector.load %arg10[%c0_45, %c4, %c0_46, %c0_47] : memref<1x22x128x128xf32, #tpu.memory_space<vmem>>, vector<1x1x128x128xf32>
    %65 = vector.shape_cast %64 : vector<1x1x128x128xf32> to vector<128x128xf32>
    %c0_48 = arith.constant 0 : index
    %c5 = arith.constant 5 : index
    %c0_49 = arith.constant 0 : index
    %c0_50 = arith.constant 0 : index
    %66 = vector.load %arg10[%c0_48, %c5, %c0_49, %c0_50] : memref<1x22x128x128xf32, #tpu.memory_space<vmem>>, vector<1x1x128x128xf32>
    %67 = vector.shape_cast %66 : vector<1x1x128x128xf32> to vector<128x128xf32>
    %c0_51 = arith.constant 0 : index
    %c4_52 = arith.constant 4 : index
    %c0_53 = arith.constant 0 : index
    %c0_54 = arith.constant 0 : index
    %68 = vector.load %arg11[%c0_51, %c4_52, %c0_53, %c0_54] : memref<1x22x1x128xf32, #tpu.memory_space<vmem>>, vector<1x1x1x128xf32>
    %69 = vector.shape_cast %68 : vector<1x1x1x128xf32> to vector<1x128xf32>
    %c0_55 = arith.constant 0 : index
    %c5_56 = arith.constant 5 : index
    %c0_57 = arith.constant 0 : index
    %c0_58 = arith.constant 0 : index
    %70 = vector.load %arg11[%c0_55, %c5_56, %c0_57, %c0_58] : memref<1x22x1x128xf32, #tpu.memory_space<vmem>>, vector<1x1x1x128xf32>
    %71 = vector.shape_cast %70 : vector<1x1x1x128xf32> to vector<1x128xf32>
    %cst_59 = arith.constant dense<0.000000e+00> : vector<32x128xf32>
    %72 = tpu.matmul %11, %65, %cst_59 {dimension_numbers = #tpu.dot_dimension_numbers<[1], [0], [0], [1], [0, 0, 1, 1], [], []>} : vector<32x128xf32>, vector<128x128xf32>, vector<32x128xf32> -> vector<32x128xf32>
    %73 = arith.addf %61, %72 : vector<32x128xf32>
    %74 = vector.broadcast %69 : vector<1x128xf32> to vector<32x128xf32>
    %75 = arith.addf %73, %74 : vector<32x128xf32>
    %cst_60 = arith.constant 0.000000e+00 : f32
    %76 = vector.broadcast %cst_60 : f32 to vector<32x128xf32>
    %77 = arith.maximumf %75, %76 : vector<32x128xf32>
    %cst_61 = arith.constant dense<0.000000e+00> : vector<32x128xf32>
    %78 = tpu.matmul %77, %67, %cst_61 {dimension_numbers = #tpu.dot_dimension_numbers<[1], [0], [0], [1], [0, 0, 1, 1], [], []>} : vector<32x128xf32>, vector<128x128xf32>, vector<32x128xf32> -> vector<32x128xf32>
    %79 = vector.broadcast %71 : vector<1x128xf32> to vector<32x128xf32>
    %80 = arith.addf %78, %79 : vector<32x128xf32>
    %cst_62 = arith.constant 1.000000e+00 : f32
    %81 = vector.broadcast %cst_62 : f32 to vector<32x128xf32>
    %82 = arith.mulf %63, %81 : vector<32x128xf32>
    %83 = arith.addf %11, %82 : vector<32x128xf32>
    %84 = vector.shape_cast %5 : vector<1x128xi1> to vector<1x128xi1>
    %85 = vector.broadcast %84 : vector<1x128xi1> to vector<32x128xi1>
    %86 = arith.select %85, %83, %80 : vector<32x128xi1>, vector<32x128xf32>
    %c0_63 = arith.constant 0 : index
    %c6 = arith.constant 6 : index
    %c0_64 = arith.constant 0 : index
    %c0_65 = arith.constant 0 : index
    %87 = vector.load %arg10[%c0_63, %c6, %c0_64, %c0_65] : memref<1x22x128x128xf32, #tpu.memory_space<vmem>>, vector<1x1x128x128xf32>
    %88 = vector.shape_cast %87 : vector<1x1x128x128xf32> to vector<128x128xf32>
    %c0_66 = arith.constant 0 : index
    %c7 = arith.constant 7 : index
    %c0_67 = arith.constant 0 : index
    %c0_68 = arith.constant 0 : index
    %89 = vector.load %arg10[%c0_66, %c7, %c0_67, %c0_68] : memref<1x22x128x128xf32, #tpu.memory_space<vmem>>, vector<1x1x128x128xf32>
    %90 = vector.shape_cast %89 : vector<1x1x128x128xf32> to vector<128x128xf32>
    %c0_69 = arith.constant 0 : index
    %c8 = arith.constant 8 : index
    %c0_70 = arith.constant 0 : index
    %c0_71 = arith.constant 0 : index
    %91 = vector.load %arg10[%c0_69, %c8, %c0_70, %c0_71] : memref<1x22x128x128xf32, #tpu.memory_space<vmem>>, vector<1x1x128x128xf32>
    %92 = vector.shape_cast %91 : vector<1x1x128x128xf32> to vector<128x128xf32>
    %c0_72 = arith.constant 0 : index
    %c9 = arith.constant 9 : index
    %c0_73 = arith.constant 0 : index
    %c0_74 = arith.constant 0 : index
    %93 = vector.load %arg10[%c0_72, %c9, %c0_73, %c0_74] : memref<1x22x128x128xf32, #tpu.memory_space<vmem>>, vector<1x1x128x128xf32>
    %94 = vector.shape_cast %93 : vector<1x1x128x128xf32> to vector<128x128xf32>
    %c0_75 = arith.constant 0 : index
    %c6_76 = arith.constant 6 : index
    %c0_77 = arith.constant 0 : index
    %c0_78 = arith.constant 0 : index
    %95 = vector.load %arg11[%c0_75, %c6_76, %c0_77, %c0_78] : memref<1x22x1x128xf32, #tpu.memory_space<vmem>>, vector<1x1x1x128xf32>
    %96 = vector.shape_cast %95 : vector<1x1x1x128xf32> to vector<1x128xf32>
    %c0_79 = arith.constant 0 : index
    %c7_80 = arith.constant 7 : index
    %c0_81 = arith.constant 0 : index
    %c0_82 = arith.constant 0 : index
    %97 = vector.load %arg11[%c0_79, %c7_80, %c0_81, %c0_82] : memref<1x22x1x128xf32, #tpu.memory_space<vmem>>, vector<1x1x1x128xf32>
    %98 = vector.shape_cast %97 : vector<1x1x1x128xf32> to vector<1x128xf32>
    %c0_83 = arith.constant 0 : index
    %c8_84 = arith.constant 8 : index
    %c0_85 = arith.constant 0 : index
    %c0_86 = arith.constant 0 : index
    %99 = vector.load %arg11[%c0_83, %c8_84, %c0_85, %c0_86] : memref<1x22x1x128xf32, #tpu.memory_space<vmem>>, vector<1x1x1x128xf32>
    %100 = vector.shape_cast %99 : vector<1x1x1x128xf32> to vector<1x128xf32>
    %c0_87 = arith.constant 0 : index
    %c9_88 = arith.constant 9 : index
    %c0_89 = arith.constant 0 : index
    %c0_90 = arith.constant 0 : index
    %101 = vector.load %arg11[%c0_87, %c9_88, %c0_89, %c0_90] : memref<1x22x1x128xf32, #tpu.memory_space<vmem>>, vector<1x1x1x128xf32>
    %102 = vector.shape_cast %101 : vector<1x1x1x128xf32> to vector<1x128xf32>
    %c0_91 = arith.constant 0 : index
    %c0_92 = arith.constant 0 : index
    %103 = vector.load %arg6[%c0_91, %c0_92] : memref<32x16xf32, #tpu.memory_space<vmem>>, vector<32x16xf32>
    %cst_93 = arith.constant dense<0.000000e+00> : vector<32x128xf32>
    %104 = tpu.matmul %103, %13, %cst_93 {dimension_numbers = #tpu.dot_dimension_numbers<[1], [0], [0], [1], [0, 0, 1, 1], [], []>} : vector<32x16xf32>, vector<16x128xf32>, vector<32x128xf32> -> vector<32x128xf32>
    %105 = arith.subf %12, %104 : vector<32x128xf32>
    %106 = vector.broadcast %7 : vector<1x128xf32> to vector<32x128xf32>
    %107 = arith.mulf %105, %106 : vector<32x128xf32>
    %108 = arith.mulf %107, %107 : vector<32x128xf32>
    %cst_94 = arith.constant dense<0.000000e+00> : vector<32xf32>
    %109 = vector.multi_reduction <add>, %108, %cst_94 [1] : vector<32x128xf32> to vector<32xf32>
    %110 = vector.shape_cast %109 : vector<32xf32> to vector<32x1xf32>
    %cst_95 = arith.constant dense<0.000000e+00> : vector<32x128xf32>
    %111 = tpu.matmul %12, %88, %cst_95 {dimension_numbers = #tpu.dot_dimension_numbers<[1], [0], [0], [1], [0, 0, 1, 1], [], []>} : vector<32x128xf32>, vector<128x128xf32>, vector<32x128xf32> -> vector<32x128xf32>
    %cst_96 = arith.constant dense<0.000000e+00> : vector<32x128xf32>
    %112 = tpu.matmul %104, %90, %cst_96 {dimension_numbers = #tpu.dot_dimension_numbers<[1], [0], [0], [1], [0, 0, 1, 1], [], []>} : vector<32x128xf32>, vector<128x128xf32>, vector<32x128xf32> -> vector<32x128xf32>
    %113 = arith.addf %111, %112 : vector<32x128xf32>
    %114 = vector.broadcast %110 : vector<32x1xf32> to vector<32x128xf32>
    %115 = vector.broadcast %96 : vector<1x128xf32> to vector<32x128xf32>
    %116 = arith.mulf %114, %115 : vector<32x128xf32>
    %117 = arith.addf %113, %116 : vector<32x128xf32>
    %118 = vector.broadcast %98 : vector<1x128xf32> to vector<32x128xf32>
    %119 = arith.addf %117, %118 : vector<32x128xf32>
    %cst_97 = arith.constant 0.000000e+00 : f32
    %120 = vector.broadcast %cst_97 : f32 to vector<32x128xf32>
    %121 = arith.maximumf %119, %120 : vector<32x128xf32>
    %cst_98 = arith.constant dense<0.000000e+00> : vector<32x128xf32>
    %122 = tpu.matmul %121, %92, %cst_98 {dimension_numbers = #tpu.dot_dimension_numbers<[1], [0], [0], [1], [0, 0, 1, 1], [], []>} : vector<32x128xf32>, vector<128x128xf32>, vector<32x128xf32> -> vector<32x128xf32>
    %123 = vector.broadcast %100 : vector<1x128xf32> to vector<32x128xf32>
    %124 = arith.addf %122, %123 : vector<32x128xf32>
    %cst_99 = arith.constant 0.000000e+00 : f32
    %125 = vector.broadcast %cst_99 : f32 to vector<32x128xf32>
    %126 = arith.maximumf %124, %125 : vector<32x128xf32>
    %127 = vector.broadcast %102 : vector<1x128xf32> to vector<32x128xf32>
    %128 = arith.mulf %126, %127 : vector<32x128xf32>
    %cst_100 = arith.constant dense<0.000000e+00> : vector<32xf32>
    %129 = vector.multi_reduction <add>, %128, %cst_100 [1] : vector<32x128xf32> to vector<32xf32>
    %130 = vector.shape_cast %129 : vector<32xf32> to vector<32x1xf32>
    %131 = vector.extract_strided_slice %102 {offsets = [0, 127], sizes = [1, 1], strides = [1, 1]} : vector<1x128xf32> to vector<1x1xf32>
    %132 = vector.broadcast %131 : vector<1x1xf32> to vector<32x1xf32>
    %133 = arith.addf %130, %132 : vector<32x1xf32>
    %cst_101 = arith.constant dense<0.000000e+00> : vector<32x128xf32>
    %134 = tpu.matmul %126, %94, %cst_101 {dimension_numbers = #tpu.dot_dimension_numbers<[1], [0], [0], [1], [0, 0, 1, 1], [], []>} : vector<32x128xf32>, vector<128x128xf32>, vector<32x128xf32> -> vector<32x128xf32>
    %135 = vector.broadcast %133 : vector<32x1xf32> to vector<32x128xf32>
    %136 = arith.mulf %107, %135 : vector<32x128xf32>
    %c0_102 = arith.constant 0 : index
    %c10 = arith.constant 10 : index
    %c0_103 = arith.constant 0 : index
    %c0_104 = arith.constant 0 : index
    %137 = vector.load %arg10[%c0_102, %c10, %c0_103, %c0_104] : memref<1x22x128x128xf32, #tpu.memory_space<vmem>>, vector<1x1x128x128xf32>
    %138 = vector.shape_cast %137 : vector<1x1x128x128xf32> to vector<128x128xf32>
    %c0_105 = arith.constant 0 : index
    %c11 = arith.constant 11 : index
    %c0_106 = arith.constant 0 : index
    %c0_107 = arith.constant 0 : index
    %139 = vector.load %arg10[%c0_105, %c11, %c0_106, %c0_107] : memref<1x22x128x128xf32, #tpu.memory_space<vmem>>, vector<1x1x128x128xf32>
    %140 = vector.shape_cast %139 : vector<1x1x128x128xf32> to vector<128x128xf32>
    %c0_108 = arith.constant 0 : index
    %c12 = arith.constant 12 : index
    %c0_109 = arith.constant 0 : index
    %c0_110 = arith.constant 0 : index
    %141 = vector.load %arg10[%c0_108, %c12, %c0_109, %c0_110] : memref<1x22x128x128xf32, #tpu.memory_space<vmem>>, vector<1x1x128x128xf32>
    %142 = vector.shape_cast %141 : vector<1x1x128x128xf32> to vector<128x128xf32>
    %c0_111 = arith.constant 0 : index
    %c13 = arith.constant 13 : index
    %c0_112 = arith.constant 0 : index
    %c0_113 = arith.constant 0 : index
    %143 = vector.load %arg10[%c0_111, %c13, %c0_112, %c0_113] : memref<1x22x128x128xf32, #tpu.memory_space<vmem>>, vector<1x1x128x128xf32>
    %144 = vector.shape_cast %143 : vector<1x1x128x128xf32> to vector<128x128xf32>
    %c0_114 = arith.constant 0 : index
    %c10_115 = arith.constant 10 : index
    %c0_116 = arith.constant 0 : index
    %c0_117 = arith.constant 0 : index
    %145 = vector.load %arg11[%c0_114, %c10_115, %c0_116, %c0_117] : memref<1x22x1x128xf32, #tpu.memory_space<vmem>>, vector<1x1x1x128xf32>
    %146 = vector.shape_cast %145 : vector<1x1x1x128xf32> to vector<1x128xf32>
    %c0_118 = arith.constant 0 : index
    %c11_119 = arith.constant 11 : index
    %c0_120 = arith.constant 0 : index
    %c0_121 = arith.constant 0 : index
    %147 = vector.load %arg11[%c0_118, %c11_119, %c0_120, %c0_121] : memref<1x22x1x128xf32, #tpu.memory_space<vmem>>, vector<1x1x1x128xf32>
    %148 = vector.shape_cast %147 : vector<1x1x1x128xf32> to vector<1x128xf32>
    %c0_122 = arith.constant 0 : index
    %c12_123 = arith.constant 12 : index
    %c0_124 = arith.constant 0 : index
    %c0_125 = arith.constant 0 : index
    %149 = vector.load %arg11[%c0_122, %c12_123, %c0_124, %c0_125] : memref<1x22x1x128xf32, #tpu.memory_space<vmem>>, vector<1x1x1x128xf32>
    %150 = vector.shape_cast %149 : vector<1x1x1x128xf32> to vector<1x128xf32>
    %c0_126 = arith.constant 0 : index
    %c13_127 = arith.constant 13 : index
    %c0_128 = arith.constant 0 : index
    %c0_129 = arith.constant 0 : index
    %151 = vector.load %arg11[%c0_126, %c13_127, %c0_128, %c0_129] : memref<1x22x1x128xf32, #tpu.memory_space<vmem>>, vector<1x1x1x128xf32>
    %152 = vector.shape_cast %151 : vector<1x1x1x128xf32> to vector<1x128xf32>
    %c0_130 = arith.constant 0 : index
    %c0_131 = arith.constant 0 : index
    %153 = vector.load %arg5[%c0_130, %c0_131] : memref<32x32xf32, #tpu.memory_space<vmem>>, vector<32x32xf32>
    %cst_132 = arith.constant dense<0.000000e+00> : vector<32x128xf32>
    %154 = tpu.matmul %153, %11, %cst_132 {dimension_numbers = #tpu.dot_dimension_numbers<[1], [0], [0], [1], [0, 0, 1, 1], [], []>} : vector<32x32xf32>, vector<32x128xf32>, vector<32x128xf32> -> vector<32x128xf32>
    %155 = arith.subf %12, %154 : vector<32x128xf32>
    %156 = vector.broadcast %7 : vector<1x128xf32> to vector<32x128xf32>
    %157 = arith.mulf %155, %156 : vector<32x128xf32>
    %158 = arith.mulf %157, %157 : vector<32x128xf32>
    %cst_133 = arith.constant dense<0.000000e+00> : vector<32xf32>
    %159 = vector.multi_reduction <add>, %158, %cst_133 [1] : vector<32x128xf32> to vector<32xf32>
    %160 = vector.shape_cast %159 : vector<32xf32> to vector<32x1xf32>
    %cst_134 = arith.constant dense<0.000000e+00> : vector<32x128xf32>
    %161 = tpu.matmul %12, %138, %cst_134 {dimension_numbers = #tpu.dot_dimension_numbers<[1], [0], [0], [1], [0, 0, 1, 1], [], []>} : vector<32x128xf32>, vector<128x128xf32>, vector<32x128xf32> -> vector<32x128xf32>
    %cst_135 = arith.constant dense<0.000000e+00> : vector<32x128xf32>
    %162 = tpu.matmul %154, %140, %cst_135 {dimension_numbers = #tpu.dot_dimension_numbers<[1], [0], [0], [1], [0, 0, 1, 1], [], []>} : vector<32x128xf32>, vector<128x128xf32>, vector<32x128xf32> -> vector<32x128xf32>
    %163 = arith.addf %161, %162 : vector<32x128xf32>
    %164 = vector.broadcast %160 : vector<32x1xf32> to vector<32x128xf32>
    %165 = vector.broadcast %146 : vector<1x128xf32> to vector<32x128xf32>
    %166 = arith.mulf %164, %165 : vector<32x128xf32>
    %167 = arith.addf %163, %166 : vector<32x128xf32>
    %168 = vector.broadcast %148 : vector<1x128xf32> to vector<32x128xf32>
    %169 = arith.addf %167, %168 : vector<32x128xf32>
    %cst_136 = arith.constant 0.000000e+00 : f32
    %170 = vector.broadcast %cst_136 : f32 to vector<32x128xf32>
    %171 = arith.maximumf %169, %170 : vector<32x128xf32>
    %cst_137 = arith.constant dense<0.000000e+00> : vector<32x128xf32>
    %172 = tpu.matmul %171, %142, %cst_137 {dimension_numbers = #tpu.dot_dimension_numbers<[1], [0], [0], [1], [0, 0, 1, 1], [], []>} : vector<32x128xf32>, vector<128x128xf32>, vector<32x128xf32> -> vector<32x128xf32>
    %173 = vector.broadcast %150 : vector<1x128xf32> to vector<32x128xf32>
    %174 = arith.addf %172, %173 : vector<32x128xf32>
    %cst_138 = arith.constant 0.000000e+00 : f32
    %175 = vector.broadcast %cst_138 : f32 to vector<32x128xf32>
    %176 = arith.maximumf %174, %175 : vector<32x128xf32>
    %177 = vector.broadcast %152 : vector<1x128xf32> to vector<32x128xf32>
    %178 = arith.mulf %176, %177 : vector<32x128xf32>
    %cst_139 = arith.constant dense<0.000000e+00> : vector<32xf32>
    %179 = vector.multi_reduction <add>, %178, %cst_139 [1] : vector<32x128xf32> to vector<32xf32>
    %180 = vector.shape_cast %179 : vector<32xf32> to vector<32x1xf32>
    %181 = vector.extract_strided_slice %152 {offsets = [0, 127], sizes = [1, 1], strides = [1, 1]} : vector<1x128xf32> to vector<1x1xf32>
    %182 = vector.broadcast %181 : vector<1x1xf32> to vector<32x1xf32>
    %183 = arith.addf %180, %182 : vector<32x1xf32>
    %cst_140 = arith.constant dense<0.000000e+00> : vector<32x128xf32>
    %184 = tpu.matmul %176, %144, %cst_140 {dimension_numbers = #tpu.dot_dimension_numbers<[1], [0], [0], [1], [0, 0, 1, 1], [], []>} : vector<32x128xf32>, vector<128x128xf32>, vector<32x128xf32> -> vector<32x128xf32>
    %185 = arith.addf %134, %184 : vector<32x128xf32>
    %186 = vector.broadcast %183 : vector<32x1xf32> to vector<32x128xf32>
    %187 = arith.mulf %157, %186 : vector<32x128xf32>
    %188 = arith.addf %136, %187 : vector<32x128xf32>
    %c0_141 = arith.constant 0 : index
    %c14 = arith.constant 14 : index
    %c0_142 = arith.constant 0 : index
    %c0_143 = arith.constant 0 : index
    %189 = vector.load %arg10[%c0_141, %c14, %c0_142, %c0_143] : memref<1x22x128x128xf32, #tpu.memory_space<vmem>>, vector<1x1x128x128xf32>
    %190 = vector.shape_cast %189 : vector<1x1x128x128xf32> to vector<128x128xf32>
    %c0_144 = arith.constant 0 : index
    %c15 = arith.constant 15 : index
    %c0_145 = arith.constant 0 : index
    %c0_146 = arith.constant 0 : index
    %191 = vector.load %arg10[%c0_144, %c15, %c0_145, %c0_146] : memref<1x22x128x128xf32, #tpu.memory_space<vmem>>, vector<1x1x128x128xf32>
    %192 = vector.shape_cast %191 : vector<1x1x128x128xf32> to vector<128x128xf32>
    %c0_147 = arith.constant 0 : index
    %c14_148 = arith.constant 14 : index
    %c0_149 = arith.constant 0 : index
    %c0_150 = arith.constant 0 : index
    %193 = vector.load %arg11[%c0_147, %c14_148, %c0_149, %c0_150] : memref<1x22x1x128xf32, #tpu.memory_space<vmem>>, vector<1x1x1x128xf32>
    %194 = vector.shape_cast %193 : vector<1x1x1x128xf32> to vector<1x128xf32>
    %c0_151 = arith.constant 0 : index
    %c15_152 = arith.constant 15 : index
    %c0_153 = arith.constant 0 : index
    %c0_154 = arith.constant 0 : index
    %195 = vector.load %arg11[%c0_151, %c15_152, %c0_153, %c0_154] : memref<1x22x1x128xf32, #tpu.memory_space<vmem>>, vector<1x1x1x128xf32>
    %196 = vector.shape_cast %195 : vector<1x1x1x128xf32> to vector<1x128xf32>
    %cst_155 = arith.constant dense<0.000000e+00> : vector<32x128xf32>
    %197 = tpu.matmul %12, %190, %cst_155 {dimension_numbers = #tpu.dot_dimension_numbers<[1], [0], [0], [1], [0, 0, 1, 1], [], []>} : vector<32x128xf32>, vector<128x128xf32>, vector<32x128xf32> -> vector<32x128xf32>
    %198 = arith.addf %185, %197 : vector<32x128xf32>
    %199 = vector.broadcast %194 : vector<1x128xf32> to vector<32x128xf32>
    %200 = arith.addf %198, %199 : vector<32x128xf32>
    %cst_156 = arith.constant 0.000000e+00 : f32
    %201 = vector.broadcast %cst_156 : f32 to vector<32x128xf32>
    %202 = arith.maximumf %200, %201 : vector<32x128xf32>
    %cst_157 = arith.constant dense<0.000000e+00> : vector<32x128xf32>
    %203 = tpu.matmul %202, %192, %cst_157 {dimension_numbers = #tpu.dot_dimension_numbers<[1], [0], [0], [1], [0, 0, 1, 1], [], []>} : vector<32x128xf32>, vector<128x128xf32>, vector<32x128xf32> -> vector<32x128xf32>
    %204 = vector.broadcast %196 : vector<1x128xf32> to vector<32x128xf32>
    %205 = arith.addf %203, %204 : vector<32x128xf32>
    %cst_158 = arith.constant 5.000000e-01 : f32
    %206 = vector.broadcast %cst_158 : f32 to vector<32x128xf32>
    %207 = arith.mulf %188, %206 : vector<32x128xf32>
    %208 = arith.addf %12, %207 : vector<32x128xf32>
    %209 = vector.shape_cast %5 : vector<1x128xi1> to vector<1x128xi1>
    %210 = vector.broadcast %209 : vector<1x128xi1> to vector<32x128xi1>
    %211 = arith.select %210, %208, %205 : vector<32x128xi1>, vector<32x128xf32>
    %c0_159 = arith.constant 0 : index
    %c16 = arith.constant 16 : index
    %c0_160 = arith.constant 0 : index
    %c0_161 = arith.constant 0 : index
    %212 = vector.load %arg10[%c0_159, %c16, %c0_160, %c0_161] : memref<1x22x128x128xf32, #tpu.memory_space<vmem>>, vector<1x1x128x128xf32>
    %213 = vector.shape_cast %212 : vector<1x1x128x128xf32> to vector<128x128xf32>
    %c0_162 = arith.constant 0 : index
    %c17 = arith.constant 17 : index
    %c0_163 = arith.constant 0 : index
    %c0_164 = arith.constant 0 : index
    %214 = vector.load %arg10[%c0_162, %c17, %c0_163, %c0_164] : memref<1x22x128x128xf32, #tpu.memory_space<vmem>>, vector<1x1x128x128xf32>
    %215 = vector.shape_cast %214 : vector<1x1x128x128xf32> to vector<128x128xf32>
    %c0_165 = arith.constant 0 : index
    %c18 = arith.constant 18 : index
    %c0_166 = arith.constant 0 : index
    %c0_167 = arith.constant 0 : index
    %216 = vector.load %arg10[%c0_165, %c18, %c0_166, %c0_167] : memref<1x22x128x128xf32, #tpu.memory_space<vmem>>, vector<1x1x128x128xf32>
    %217 = vector.shape_cast %216 : vector<1x1x128x128xf32> to vector<128x128xf32>
    %c0_168 = arith.constant 0 : index
    %c19 = arith.constant 19 : index
    %c0_169 = arith.constant 0 : index
    %c0_170 = arith.constant 0 : index
    %218 = vector.load %arg10[%c0_168, %c19, %c0_169, %c0_170] : memref<1x22x128x128xf32, #tpu.memory_space<vmem>>, vector<1x1x128x128xf32>
    %219 = vector.shape_cast %218 : vector<1x1x128x128xf32> to vector<128x128xf32>
    %c0_171 = arith.constant 0 : index
    %c16_172 = arith.constant 16 : index
    %c0_173 = arith.constant 0 : index
    %c0_174 = arith.constant 0 : index
    %220 = vector.load %arg11[%c0_171, %c16_172, %c0_173, %c0_174] : memref<1x22x1x128xf32, #tpu.memory_space<vmem>>, vector<1x1x1x128xf32>
    %221 = vector.shape_cast %220 : vector<1x1x1x128xf32> to vector<1x128xf32>
    %c0_175 = arith.constant 0 : index
    %c17_176 = arith.constant 17 : index
    %c0_177 = arith.constant 0 : index
    %c0_178 = arith.constant 0 : index
    %222 = vector.load %arg11[%c0_175, %c17_176, %c0_177, %c0_178] : memref<1x22x1x128xf32, #tpu.memory_space<vmem>>, vector<1x1x1x128xf32>
    %223 = vector.shape_cast %222 : vector<1x1x1x128xf32> to vector<1x128xf32>
    %c0_179 = arith.constant 0 : index
    %c18_180 = arith.constant 18 : index
    %c0_181 = arith.constant 0 : index
    %c0_182 = arith.constant 0 : index
    %224 = vector.load %arg11[%c0_179, %c18_180, %c0_181, %c0_182] : memref<1x22x1x128xf32, #tpu.memory_space<vmem>>, vector<1x1x1x128xf32>
    %225 = vector.shape_cast %224 : vector<1x1x1x128xf32> to vector<1x128xf32>
    %c0_183 = arith.constant 0 : index
    %c19_184 = arith.constant 19 : index
    %c0_185 = arith.constant 0 : index
    %c0_186 = arith.constant 0 : index
    %226 = vector.load %arg11[%c0_183, %c19_184, %c0_185, %c0_186] : memref<1x22x1x128xf32, #tpu.memory_space<vmem>>, vector<1x1x1x128xf32>
    %227 = vector.shape_cast %226 : vector<1x1x1x128xf32> to vector<1x128xf32>
    %c0_187 = arith.constant 0 : index
    %c0_188 = arith.constant 0 : index
    %228 = vector.load %arg7[%c0_187, %c0_188] : memref<16x32xf32, #tpu.memory_space<vmem>>, vector<16x32xf32>
    %cst_189 = arith.constant dense<0.000000e+00> : vector<16x128xf32>
    %229 = tpu.matmul %228, %12, %cst_189 {dimension_numbers = #tpu.dot_dimension_numbers<[1], [0], [0], [1], [0, 0, 1, 1], [], []>} : vector<16x32xf32>, vector<32x128xf32>, vector<16x128xf32> -> vector<16x128xf32>
    %230 = arith.subf %13, %229 : vector<16x128xf32>
    %231 = vector.broadcast %7 : vector<1x128xf32> to vector<16x128xf32>
    %232 = arith.mulf %230, %231 : vector<16x128xf32>
    %233 = arith.mulf %232, %232 : vector<16x128xf32>
    %cst_190 = arith.constant dense<0.000000e+00> : vector<16xf32>
    %234 = vector.multi_reduction <add>, %233, %cst_190 [1] : vector<16x128xf32> to vector<16xf32>
    %235 = vector.shape_cast %234 : vector<16xf32> to vector<16x1xf32>
    %cst_191 = arith.constant dense<0.000000e+00> : vector<16x128xf32>
    %236 = tpu.matmul %13, %213, %cst_191 {dimension_numbers = #tpu.dot_dimension_numbers<[1], [0], [0], [1], [0, 0, 1, 1], [], []>} : vector<16x128xf32>, vector<128x128xf32>, vector<16x128xf32> -> vector<16x128xf32>
    %cst_192 = arith.constant dense<0.000000e+00> : vector<16x128xf32>
    %237 = tpu.matmul %229, %215, %cst_192 {dimension_numbers = #tpu.dot_dimension_numbers<[1], [0], [0], [1], [0, 0, 1, 1], [], []>} : vector<16x128xf32>, vector<128x128xf32>, vector<16x128xf32> -> vector<16x128xf32>
    %238 = arith.addf %236, %237 : vector<16x128xf32>
    %239 = vector.broadcast %235 : vector<16x1xf32> to vector<16x128xf32>
    %240 = vector.broadcast %221 : vector<1x128xf32> to vector<16x128xf32>
    %241 = arith.mulf %239, %240 : vector<16x128xf32>
    %242 = arith.addf %238, %241 : vector<16x128xf32>
    %243 = vector.broadcast %223 : vector<1x128xf32> to vector<16x128xf32>
    %244 = arith.addf %242, %243 : vector<16x128xf32>
    %cst_193 = arith.constant 0.000000e+00 : f32
    %245 = vector.broadcast %cst_193 : f32 to vector<16x128xf32>
    %246 = arith.maximumf %244, %245 : vector<16x128xf32>
    %cst_194 = arith.constant dense<0.000000e+00> : vector<16x128xf32>
    %247 = tpu.matmul %246, %217, %cst_194 {dimension_numbers = #tpu.dot_dimension_numbers<[1], [0], [0], [1], [0, 0, 1, 1], [], []>} : vector<16x128xf32>, vector<128x128xf32>, vector<16x128xf32> -> vector<16x128xf32>
    %248 = vector.broadcast %225 : vector<1x128xf32> to vector<16x128xf32>
    %249 = arith.addf %247, %248 : vector<16x128xf32>
    %cst_195 = arith.constant 0.000000e+00 : f32
    %250 = vector.broadcast %cst_195 : f32 to vector<16x128xf32>
    %251 = arith.maximumf %249, %250 : vector<16x128xf32>
    %252 = vector.broadcast %227 : vector<1x128xf32> to vector<16x128xf32>
    %253 = arith.mulf %251, %252 : vector<16x128xf32>
    %cst_196 = arith.constant dense<0.000000e+00> : vector<16xf32>
    %254 = vector.multi_reduction <add>, %253, %cst_196 [1] : vector<16x128xf32> to vector<16xf32>
    %255 = vector.shape_cast %254 : vector<16xf32> to vector<16x1xf32>
    %256 = vector.extract_strided_slice %227 {offsets = [0, 127], sizes = [1, 1], strides = [1, 1]} : vector<1x128xf32> to vector<1x1xf32>
    %257 = vector.broadcast %256 : vector<1x1xf32> to vector<16x1xf32>
    %258 = arith.addf %255, %257 : vector<16x1xf32>
    %cst_197 = arith.constant dense<0.000000e+00> : vector<16x128xf32>
    %259 = tpu.matmul %251, %219, %cst_197 {dimension_numbers = #tpu.dot_dimension_numbers<[1], [0], [0], [1], [0, 0, 1, 1], [], []>} : vector<16x128xf32>, vector<128x128xf32>, vector<16x128xf32> -> vector<16x128xf32>
    %260 = vector.broadcast %258 : vector<16x1xf32> to vector<16x128xf32>
    %261 = arith.mulf %232, %260 : vector<16x128xf32>
    %c0_198 = arith.constant 0 : index
    %c20 = arith.constant 20 : index
    %c0_199 = arith.constant 0 : index
    %c0_200 = arith.constant 0 : index
    %262 = vector.load %arg10[%c0_198, %c20, %c0_199, %c0_200] : memref<1x22x128x128xf32, #tpu.memory_space<vmem>>, vector<1x1x128x128xf32>
    %263 = vector.shape_cast %262 : vector<1x1x128x128xf32> to vector<128x128xf32>
    %c0_201 = arith.constant 0 : index
    %c21 = arith.constant 21 : index
    %c0_202 = arith.constant 0 : index
    %c0_203 = arith.constant 0 : index
    %264 = vector.load %arg10[%c0_201, %c21, %c0_202, %c0_203] : memref<1x22x128x128xf32, #tpu.memory_space<vmem>>, vector<1x1x128x128xf32>
    %265 = vector.shape_cast %264 : vector<1x1x128x128xf32> to vector<128x128xf32>
    %c0_204 = arith.constant 0 : index
    %c20_205 = arith.constant 20 : index
    %c0_206 = arith.constant 0 : index
    %c0_207 = arith.constant 0 : index
    %266 = vector.load %arg11[%c0_204, %c20_205, %c0_206, %c0_207] : memref<1x22x1x128xf32, #tpu.memory_space<vmem>>, vector<1x1x1x128xf32>
    %267 = vector.shape_cast %266 : vector<1x1x1x128xf32> to vector<1x128xf32>
    %c0_208 = arith.constant 0 : index
    %c21_209 = arith.constant 21 : index
    %c0_210 = arith.constant 0 : index
    %c0_211 = arith.constant 0 : index
    %268 = vector.load %arg11[%c0_208, %c21_209, %c0_210, %c0_211] : memref<1x22x1x128xf32, #tpu.memory_space<vmem>>, vector<1x1x1x128xf32>
    %269 = vector.shape_cast %268 : vector<1x1x1x128xf32> to vector<1x128xf32>
    %cst_212 = arith.constant dense<0.000000e+00> : vector<16x128xf32>
    %270 = tpu.matmul %13, %263, %cst_212 {dimension_numbers = #tpu.dot_dimension_numbers<[1], [0], [0], [1], [0, 0, 1, 1], [], []>} : vector<16x128xf32>, vector<128x128xf32>, vector<16x128xf32> -> vector<16x128xf32>
    %271 = arith.addf %259, %270 : vector<16x128xf32>
    %272 = vector.broadcast %267 : vector<1x128xf32> to vector<16x128xf32>
    %273 = arith.addf %271, %272 : vector<16x128xf32>
    %cst_213 = arith.constant 0.000000e+00 : f32
    %274 = vector.broadcast %cst_213 : f32 to vector<16x128xf32>
    %275 = arith.maximumf %273, %274 : vector<16x128xf32>
    %cst_214 = arith.constant dense<0.000000e+00> : vector<16x128xf32>
    %276 = tpu.matmul %275, %265, %cst_214 {dimension_numbers = #tpu.dot_dimension_numbers<[1], [0], [0], [1], [0, 0, 1, 1], [], []>} : vector<16x128xf32>, vector<128x128xf32>, vector<16x128xf32> -> vector<16x128xf32>
    %277 = vector.broadcast %269 : vector<1x128xf32> to vector<16x128xf32>
    %278 = arith.addf %276, %277 : vector<16x128xf32>
    %cst_215 = arith.constant 1.000000e+00 : f32
    %279 = vector.broadcast %cst_215 : f32 to vector<16x128xf32>
    %280 = arith.mulf %261, %279 : vector<16x128xf32>
    %281 = arith.addf %13, %280 : vector<16x128xf32>
    %282 = vector.shape_cast %5 : vector<1x128xi1> to vector<1x128xi1>
    %283 = vector.broadcast %282 : vector<1x128xi1> to vector<16x128xi1>
    %284 = arith.select %283, %281, %278 : vector<16x128xi1>, vector<16x128xf32>
    %c0_216 = arith.constant 0 : index
    %c0_217 = arith.constant 0 : index
    %285 = vector.load %arg15[%c0_216, %c0_217] : memref<32x128xf32, #tpu.memory_space<vmem>>, vector<32x128xf32>
    tpu.vector_store %arg15[%c0_216, %c0_217], %86 {strides = array<i32>} : memref<32x128xf32, #tpu.memory_space<vmem>>, vector<32x128xf32>,
    %c0_218 = arith.constant 0 : index
    %c0_219 = arith.constant 0 : index
    %286 = vector.load %arg12[%c0_218, %c0_219] : memref<32x128xf32, #tpu.memory_space<vmem>>, vector<32x128xf32>
    tpu.vector_store %arg12[%c0_218, %c0_219], %86 {strides = array<i32>} : memref<32x128xf32, #tpu.memory_space<vmem>>, vector<32x128xf32>,
    %c0_220 = arith.constant 0 : index
    %c0_221 = arith.constant 0 : index
    %287 = vector.load %arg16[%c0_220, %c0_221] : memref<32x128xf32, #tpu.memory_space<vmem>>, vector<32x128xf32>
    tpu.vector_store %arg16[%c0_220, %c0_221], %211 {strides = array<i32>} : memref<32x128xf32, #tpu.memory_space<vmem>>, vector<32x128xf32>,
    %c0_222 = arith.constant 0 : index
    %c0_223 = arith.constant 0 : index
    %288 = vector.load %arg13[%c0_222, %c0_223] : memref<32x128xf32, #tpu.memory_space<vmem>>, vector<32x128xf32>
    tpu.vector_store %arg13[%c0_222, %c0_223], %211 {strides = array<i32>} : memref<32x128xf32, #tpu.memory_space<vmem>>, vector<32x128xf32>,
    %c0_224 = arith.constant 0 : index
    %c0_225 = arith.constant 0 : index
    %289 = vector.load %arg17[%c0_224, %c0_225] : memref<16x128xf32, #tpu.memory_space<vmem>>, vector<16x128xf32>
    tpu.vector_store %arg17[%c0_224, %c0_225], %284 {strides = array<i32>} : memref<16x128xf32, #tpu.memory_space<vmem>>, vector<16x128xf32>,
    %c0_226 = arith.constant 0 : index
    %c0_227 = arith.constant 0 : index
    %290 = vector.load %arg14[%c0_226, %c0_227] : memref<16x128xf32, #tpu.memory_space<vmem>>, vector<16x128xf32>
    tpu.vector_store %arg14[%c0_226, %c0_227], %284 {strides = array<i32>} : memref<16x128xf32, #tpu.memory_space<vmem>>, vector<16x128xf32>,
    return
  }
  func.func @transform_0(%arg0: i32) -> (i32, i32) {
    %c0_i32 = arith.constant 0 : i32
    %c0_i32_0 = arith.constant 0 : i32
    %c0_i32_1 = arith.constant 0 : i32
    return %c0_i32, %c0_i32_0 : i32, i32
  }
  func.func @transform_1(%arg0: i32) -> (i32, i32) {
    %c0_i32 = arith.constant 0 : i32
    %c0_i32_0 = arith.constant 0 : i32
    %c0_i32_1 = arith.constant 0 : i32
    return %c0_i32, %c0_i32_0 : i32, i32
  }
  func.func @transform_2(%arg0: i32) -> (i32, i32) {
    %c0_i32 = arith.constant 0 : i32
    %c0_i32_0 = arith.constant 0 : i32
    %c0_i32_1 = arith.constant 0 : i32
    return %c0_i32, %c0_i32_0 : i32, i32
  }
  func.func @transform_3(%arg0: i32) -> (i32, i32) {
    %c0_i32 = arith.constant 0 : i32
    %c0_i32_0 = arith.constant 0 : i32
    %c0_i32_1 = arith.constant 0 : i32
    return %c0_i32, %c0_i32_0 : i32, i32
  }
  func.func @transform_4(%arg0: i32) -> (i32, i32) {
    %c0_i32 = arith.constant 0 : i32
    %c0_i32_0 = arith.constant 0 : i32
    %c0_i32_1 = arith.constant 0 : i32
    return %c0_i32, %c0_i32_0 : i32, i32
  }
  func.func @transform_5(%arg0: i32) -> (i32, i32) {
    %c0_i32 = arith.constant 0 : i32
    %c0_i32_0 = arith.constant 0 : i32
    %c0_i32_1 = arith.constant 0 : i32
    return %c0_i32, %c0_i32_0 : i32, i32
  }
  func.func @transform_6(%arg0: i32) -> (i32, i32) {
    %c0_i32 = arith.constant 0 : i32
    %c0_i32_0 = arith.constant 0 : i32
    %c0_i32_1 = arith.constant 0 : i32
    return %c0_i32, %c0_i32_0 : i32, i32
  }
  func.func @transform_7(%arg0: i32) -> (i32, i32, i32) {
    %c0_i32 = arith.constant 0 : i32
    %c0_i32_0 = arith.constant 0 : i32
    %c0_i32_1 = arith.constant 0 : i32
    %c0_i32_2 = arith.constant 0 : i32
    return %c0_i32, %c0_i32_0, %c0_i32_1 : i32, i32, i32
  }
  func.func @transform_8(%arg0: i32) -> (i32, i32, i32) {
    %c0_i32 = arith.constant 0 : i32
    %c0_i32_0 = arith.constant 0 : i32
    %c0_i32_1 = arith.constant 0 : i32
    %c0_i32_2 = arith.constant 0 : i32
    return %c0_i32, %c0_i32_0, %c0_i32_1 : i32, i32, i32
  }
  func.func @transform_9(%arg0: i32) -> (i32, i32, i32, i32) {
    %c0_i32 = arith.constant 0 : i32
    %c0_i32_0 = arith.constant 0 : i32
    %c0_i32_1 = arith.constant 0 : i32
    %c0_i32_2 = arith.constant 0 : i32
    return %arg0, %c0_i32, %c0_i32_0, %c0_i32_1 : i32, i32, i32, i32
  }
  func.func @transform_10(%arg0: i32) -> (i32, i32, i32, i32) {
    %c0_i32 = arith.constant 0 : i32
    %c0_i32_0 = arith.constant 0 : i32
    %c0_i32_1 = arith.constant 0 : i32
    %c0_i32_2 = arith.constant 0 : i32
    return %arg0, %c0_i32, %c0_i32_0, %c0_i32_1 : i32, i32, i32, i32
  }
  func.func @transform_11(%arg0: i32) -> (i32, i32) {
    %c0_i32 = arith.constant 0 : i32
    %c0_i32_0 = arith.constant 0 : i32
    %c0_i32_1 = arith.constant 0 : i32
    return %c0_i32, %c0_i32_0 : i32, i32
  }
  func.func @transform_12(%arg0: i32) -> (i32, i32) {
    %c0_i32 = arith.constant 0 : i32
    %c0_i32_0 = arith.constant 0 : i32
    %c0_i32_1 = arith.constant 0 : i32
    return %c0_i32, %c0_i32_0 : i32, i32
  }
  func.func @transform_13(%arg0: i32) -> (i32, i32) {
    %c0_i32 = arith.constant 0 : i32
    %c0_i32_0 = arith.constant 0 : i32
    %c0_i32_1 = arith.constant 0 : i32
    return %c0_i32, %c0_i32_0 : i32, i32
  }
}

module attributes {stable_mosaic.version = 11 : i64} {
  func.func @kernel(%arg0: memref<32x128xf32, #tpu.memory_space<vmem>>, %arg1: memref<32x128xf32, #tpu.memory_space<vmem>>, %arg2: memref<16x128xf32, #tpu.memory_space<vmem>>, %arg3: memref<32x128xi32, #tpu.memory_space<vmem>>, %arg4: memref<32x128xi32, #tpu.memory_space<vmem>>, %arg5: memref<2x16xf32, #tpu.memory_space<vmem>>, %arg6: memref<5x128x128xf32, #tpu.memory_space<vmem>>, %arg7: memref<3x1x128xf32, #tpu.memory_space<vmem>>, %arg8: memref<2x128xf32, #tpu.memory_space<vmem>>) attributes {dimension_semantics = [], scalar_prefetch = 0 : i64, scratch_operands = 0 : i64, tpu.core_type = #tpu.core_type<tc>} {
    %c0 = arith.constant 0 : index
    %c0_0 = arith.constant 0 : index
    %0 = vector.load %arg0[%c0, %c0_0] : memref<32x128xf32, #tpu.memory_space<vmem>>, vector<32x128xf32>
    %c0_1 = arith.constant 0 : index
    %c0_2 = arith.constant 0 : index
    %1 = vector.load %arg1[%c0_1, %c0_2] : memref<32x128xf32, #tpu.memory_space<vmem>>, vector<32x128xf32>
    %c0_3 = arith.constant 0 : index
    %c0_4 = arith.constant 0 : index
    %2 = vector.load %arg2[%c0_3, %c0_4] : memref<16x128xf32, #tpu.memory_space<vmem>>, vector<16x128xf32>
    %c0_5 = arith.constant 0 : index
    %c0_6 = arith.constant 0 : index
    %3 = vector.load %arg3[%c0_5, %c0_6] : memref<32x128xi32, #tpu.memory_space<vmem>>, vector<32x128xi32>
    %c0_i32 = arith.constant 0 : i32
    %4 = vector.broadcast %c0_i32 : i32 to vector<32x128xi32>
    %5 = arith.cmpi eq, %3, %4 : vector<32x128xi32>
    %cst = arith.constant -1.000000e+30 : f32
    %6 = vector.broadcast %cst : f32 to vector<32x128xf32>
    %7 = arith.select %5, %0, %6 : vector<32x128xi1>, vector<32x128xf32>
    %cst_7 = arith.constant dense<0xFF800000> : vector<128xf32>
    %8 = vector.multi_reduction <maximumf>, %7, %cst_7 [0] : vector<32x128xf32> to vector<128xf32>
    %9 = vector.shape_cast %8 : vector<128xf32> to vector<1x128xf32>
    %cst_8 = arith.constant 1.000000e+00 : f32
    %cst_9 = arith.constant 0.000000e+00 : f32
    %10 = vector.broadcast %cst_8 : f32 to vector<32x128xf32>
    %11 = vector.broadcast %cst_9 : f32 to vector<32x128xf32>
    %12 = arith.select %5, %10, %11 : vector<32x128xi1>, vector<32x128xf32>
    %cst_10 = arith.constant dense<0xFF800000> : vector<128xf32>
    %13 = vector.multi_reduction <maximumf>, %12, %cst_10 [0] : vector<32x128xf32> to vector<128xf32>
    %14 = vector.shape_cast %13 : vector<128xf32> to vector<1x128xf32>
    %cst_11 = arith.constant 0.000000e+00 : f32
    %15 = vector.broadcast %cst_11 : f32 to vector<1x128xf32>
    %16 = arith.cmpf ogt, %14, %15 : vector<1x128xf32>
    %cst_12 = arith.constant 0.000000e+00 : f32
    %17 = vector.broadcast %cst_12 : f32 to vector<1x128xf32>
    %18 = arith.select %16, %9, %17 : vector<1x128xi1>, vector<1x128xf32>
    %c1_i32 = arith.constant 1 : i32
    %19 = vector.broadcast %c1_i32 : i32 to vector<32x128xi32>
    %20 = arith.cmpi eq, %3, %19 : vector<32x128xi32>
    %cst_13 = arith.constant -1.000000e+30 : f32
    %21 = vector.broadcast %cst_13 : f32 to vector<32x128xf32>
    %22 = arith.select %20, %0, %21 : vector<32x128xi1>, vector<32x128xf32>
    %cst_14 = arith.constant dense<0xFF800000> : vector<128xf32>
    %23 = vector.multi_reduction <maximumf>, %22, %cst_14 [0] : vector<32x128xf32> to vector<128xf32>
    %24 = vector.shape_cast %23 : vector<128xf32> to vector<1x128xf32>
    %cst_15 = arith.constant 1.000000e+00 : f32
    %cst_16 = arith.constant 0.000000e+00 : f32
    %25 = vector.broadcast %cst_15 : f32 to vector<32x128xf32>
    %26 = vector.broadcast %cst_16 : f32 to vector<32x128xf32>
    %27 = arith.select %20, %25, %26 : vector<32x128xi1>, vector<32x128xf32>
    %cst_17 = arith.constant dense<0xFF800000> : vector<128xf32>
    %28 = vector.multi_reduction <maximumf>, %27, %cst_17 [0] : vector<32x128xf32> to vector<128xf32>
    %29 = vector.shape_cast %28 : vector<128xf32> to vector<1x128xf32>
    %cst_18 = arith.constant 0.000000e+00 : f32
    %30 = vector.broadcast %cst_18 : f32 to vector<1x128xf32>
    %31 = arith.cmpf ogt, %29, %30 : vector<1x128xf32>
    %cst_19 = arith.constant 0.000000e+00 : f32
    %32 = vector.broadcast %cst_19 : f32 to vector<1x128xf32>
    %33 = arith.select %31, %24, %32 : vector<1x128xi1>, vector<1x128xf32>
    %34 = tpu.concatenate %18, %33 in 0 : vector<1x128xf32>, vector<1x128xf32> -> vector<2x128xf32>
    %c0_20 = arith.constant 0 : index
    %c0_21 = arith.constant 0 : index
    %35 = vector.load %arg4[%c0_20, %c0_21] : memref<32x128xi32, #tpu.memory_space<vmem>>, vector<32x128xi32>
    %c0_i32_22 = arith.constant 0 : i32
    %36 = vector.broadcast %c0_i32_22 : i32 to vector<32x128xi32>
    %37 = arith.cmpi eq, %35, %36 : vector<32x128xi32>
    %cst_23 = arith.constant -1.000000e+30 : f32
    %38 = vector.broadcast %cst_23 : f32 to vector<32x128xf32>
    %39 = arith.select %37, %1, %38 : vector<32x128xi1>, vector<32x128xf32>
    %cst_24 = arith.constant dense<0xFF800000> : vector<128xf32>
    %40 = vector.multi_reduction <maximumf>, %39, %cst_24 [0] : vector<32x128xf32> to vector<128xf32>
    %41 = vector.shape_cast %40 : vector<128xf32> to vector<1x128xf32>
    %cst_25 = arith.constant 1.000000e+00 : f32
    %cst_26 = arith.constant 0.000000e+00 : f32
    %42 = vector.broadcast %cst_25 : f32 to vector<32x128xf32>
    %43 = vector.broadcast %cst_26 : f32 to vector<32x128xf32>
    %44 = arith.select %37, %42, %43 : vector<32x128xi1>, vector<32x128xf32>
    %cst_27 = arith.constant dense<0xFF800000> : vector<128xf32>
    %45 = vector.multi_reduction <maximumf>, %44, %cst_27 [0] : vector<32x128xf32> to vector<128xf32>
    %46 = vector.shape_cast %45 : vector<128xf32> to vector<1x128xf32>
    %cst_28 = arith.constant 0.000000e+00 : f32
    %47 = vector.broadcast %cst_28 : f32 to vector<1x128xf32>
    %48 = arith.cmpf ogt, %46, %47 : vector<1x128xf32>
    %cst_29 = arith.constant 0.000000e+00 : f32
    %49 = vector.broadcast %cst_29 : f32 to vector<1x128xf32>
    %50 = arith.select %48, %41, %49 : vector<1x128xi1>, vector<1x128xf32>
    %c1_i32_30 = arith.constant 1 : i32
    %51 = vector.broadcast %c1_i32_30 : i32 to vector<32x128xi32>
    %52 = arith.cmpi eq, %35, %51 : vector<32x128xi32>
    %cst_31 = arith.constant -1.000000e+30 : f32
    %53 = vector.broadcast %cst_31 : f32 to vector<32x128xf32>
    %54 = arith.select %52, %1, %53 : vector<32x128xi1>, vector<32x128xf32>
    %cst_32 = arith.constant dense<0xFF800000> : vector<128xf32>
    %55 = vector.multi_reduction <maximumf>, %54, %cst_32 [0] : vector<32x128xf32> to vector<128xf32>
    %56 = vector.shape_cast %55 : vector<128xf32> to vector<1x128xf32>
    %cst_33 = arith.constant 1.000000e+00 : f32
    %cst_34 = arith.constant 0.000000e+00 : f32
    %57 = vector.broadcast %cst_33 : f32 to vector<32x128xf32>
    %58 = vector.broadcast %cst_34 : f32 to vector<32x128xf32>
    %59 = arith.select %52, %57, %58 : vector<32x128xi1>, vector<32x128xf32>
    %cst_35 = arith.constant dense<0xFF800000> : vector<128xf32>
    %60 = vector.multi_reduction <maximumf>, %59, %cst_35 [0] : vector<32x128xf32> to vector<128xf32>
    %61 = vector.shape_cast %60 : vector<128xf32> to vector<1x128xf32>
    %cst_36 = arith.constant 0.000000e+00 : f32
    %62 = vector.broadcast %cst_36 : f32 to vector<1x128xf32>
    %63 = arith.cmpf ogt, %61, %62 : vector<1x128xf32>
    %cst_37 = arith.constant 0.000000e+00 : f32
    %64 = vector.broadcast %cst_37 : f32 to vector<1x128xf32>
    %65 = arith.select %63, %56, %64 : vector<1x128xi1>, vector<1x128xf32>
    %66 = tpu.concatenate %50, %65 in 0 : vector<1x128xf32>, vector<1x128xf32> -> vector<2x128xf32>
    %c0_38 = arith.constant 0 : index
    %c0_39 = arith.constant 0 : index
    %67 = vector.load %arg5[%c0_38, %c0_39] : memref<2x16xf32, #tpu.memory_space<vmem>>, vector<2x16xf32>
    %cst_40 = arith.constant dense<0.000000e+00> : vector<2xf32>
    %68 = vector.multi_reduction <add>, %67, %cst_40 [1] : vector<2x16xf32> to vector<2xf32>
    %69 = vector.shape_cast %68 : vector<2xf32> to vector<2x1xf32>
    %cst_41 = arith.constant 1.000000e+00 : f32
    %70 = vector.broadcast %cst_41 : f32 to vector<2x1xf32>
    %71 = arith.maximumf %69, %70 : vector<2x1xf32>
    %cst_42 = arith.constant dense<0.000000e+00> : vector<2x128xf32>
    %72 = tpu.matmul %67, %2, %cst_42 {dimension_numbers = #tpu.dot_dimension_numbers<[1], [0], [0], [1], [0, 0, 1, 1], [], []>} : vector<2x16xf32>, vector<16x128xf32>, vector<2x128xf32> -> vector<2x128xf32>
    %73 = vector.broadcast %71 : vector<2x1xf32> to vector<2x128xf32>
    %74 = arith.divf %72, %73 : vector<2x128xf32>
    %c0_43 = arith.constant 0 : index
    %c0_44 = arith.constant 0 : index
    %c0_45 = arith.constant 0 : index
    %75 = vector.load %arg6[%c0_43, %c0_44, %c0_45] : memref<5x128x128xf32, #tpu.memory_space<vmem>>, vector<1x128x128xf32>
    %76 = vector.shape_cast %75 : vector<1x128x128xf32> to vector<128x128xf32>
    %cst_46 = arith.constant dense<0.000000e+00> : vector<2x128xf32>
    %77 = tpu.matmul %34, %76, %cst_46 {dimension_numbers = #tpu.dot_dimension_numbers<[1], [0], [0], [1], [0, 0, 1, 1], [], []>} : vector<2x128xf32>, vector<128x128xf32>, vector<2x128xf32> -> vector<2x128xf32>
    %c1 = arith.constant 1 : index
    %c0_47 = arith.constant 0 : index
    %c0_48 = arith.constant 0 : index
    %78 = vector.load %arg6[%c1, %c0_47, %c0_48] : memref<5x128x128xf32, #tpu.memory_space<vmem>>, vector<1x128x128xf32>
    %79 = vector.shape_cast %78 : vector<1x128x128xf32> to vector<128x128xf32>
    %cst_49 = arith.constant dense<0.000000e+00> : vector<2x128xf32>
    %80 = tpu.matmul %66, %79, %cst_49 {dimension_numbers = #tpu.dot_dimension_numbers<[1], [0], [0], [1], [0, 0, 1, 1], [], []>} : vector<2x128xf32>, vector<128x128xf32>, vector<2x128xf32> -> vector<2x128xf32>
    %81 = arith.addf %77, %80 : vector<2x128xf32>
    %c2 = arith.constant 2 : index
    %c0_50 = arith.constant 0 : index
    %c0_51 = arith.constant 0 : index
    %82 = vector.load %arg6[%c2, %c0_50, %c0_51] : memref<5x128x128xf32, #tpu.memory_space<vmem>>, vector<1x128x128xf32>
    %83 = vector.shape_cast %82 : vector<1x128x128xf32> to vector<128x128xf32>
    %cst_52 = arith.constant dense<0.000000e+00> : vector<2x128xf32>
    %84 = tpu.matmul %74, %83, %cst_52 {dimension_numbers = #tpu.dot_dimension_numbers<[1], [0], [0], [1], [0, 0, 1, 1], [], []>} : vector<2x128xf32>, vector<128x128xf32>, vector<2x128xf32> -> vector<2x128xf32>
    %85 = arith.addf %81, %84 : vector<2x128xf32>
    %c0_53 = arith.constant 0 : index
    %c0_54 = arith.constant 0 : index
    %c0_55 = arith.constant 0 : index
    %86 = vector.load %arg7[%c0_53, %c0_54, %c0_55] : memref<3x1x128xf32, #tpu.memory_space<vmem>>, vector<1x1x128xf32>
    %87 = vector.shape_cast %86 : vector<1x1x128xf32> to vector<1x128xf32>
    %88 = vector.broadcast %87 : vector<1x128xf32> to vector<2x128xf32>
    %89 = arith.addf %85, %88 : vector<2x128xf32>
    %c3 = arith.constant 3 : index
    %c0_56 = arith.constant 0 : index
    %c0_57 = arith.constant 0 : index
    %90 = vector.load %arg6[%c3, %c0_56, %c0_57] : memref<5x128x128xf32, #tpu.memory_space<vmem>>, vector<1x128x128xf32>
    %91 = vector.shape_cast %90 : vector<1x128x128xf32> to vector<128x128xf32>
    %cst_58 = arith.constant dense<0.000000e+00> : vector<2x128xf32>
    %92 = tpu.matmul %89, %91, %cst_58 {dimension_numbers = #tpu.dot_dimension_numbers<[1], [0], [0], [1], [0, 0, 1, 1], [], []>} : vector<2x128xf32>, vector<128x128xf32>, vector<2x128xf32> -> vector<2x128xf32>
    %c1_59 = arith.constant 1 : index
    %c0_60 = arith.constant 0 : index
    %c0_61 = arith.constant 0 : index
    %93 = vector.load %arg7[%c1_59, %c0_60, %c0_61] : memref<3x1x128xf32, #tpu.memory_space<vmem>>, vector<1x1x128xf32>
    %94 = vector.shape_cast %93 : vector<1x1x128xf32> to vector<1x128xf32>
    %95 = vector.broadcast %94 : vector<1x128xf32> to vector<2x128xf32>
    %96 = arith.addf %92, %95 : vector<2x128xf32>
    %cst_62 = arith.constant 0.000000e+00 : f32
    %97 = vector.broadcast %cst_62 : f32 to vector<2x128xf32>
    %98 = arith.maximumf %96, %97 : vector<2x128xf32>
    %c4 = arith.constant 4 : index
    %c0_63 = arith.constant 0 : index
    %c0_64 = arith.constant 0 : index
    %99 = vector.load %arg6[%c4, %c0_63, %c0_64] : memref<5x128x128xf32, #tpu.memory_space<vmem>>, vector<1x128x128xf32>
    %100 = vector.shape_cast %99 : vector<1x128x128xf32> to vector<128x128xf32>
    %cst_65 = arith.constant dense<0.000000e+00> : vector<2x128xf32>
    %101 = tpu.matmul %98, %100, %cst_65 {dimension_numbers = #tpu.dot_dimension_numbers<[1], [0], [0], [1], [0, 0, 1, 1], [], []>} : vector<2x128xf32>, vector<128x128xf32>, vector<2x128xf32> -> vector<2x128xf32>
    %c2_66 = arith.constant 2 : index
    %c0_67 = arith.constant 0 : index
    %c0_68 = arith.constant 0 : index
    %102 = vector.load %arg7[%c2_66, %c0_67, %c0_68] : memref<3x1x128xf32, #tpu.memory_space<vmem>>, vector<1x1x128xf32>
    %103 = vector.shape_cast %102 : vector<1x1x128xf32> to vector<1x128xf32>
    %104 = vector.broadcast %103 : vector<1x128xf32> to vector<2x128xf32>
    %105 = arith.addf %101, %104 : vector<2x128xf32>
    %106 = tpu.iota {dimensions = array<i32: 1>} : vector<2x128xi32>
    %c5_i32 = arith.constant 5 : i32
    %107 = vector.broadcast %c5_i32 : i32 to vector<2x128xi32>
    %108 = arith.cmpi slt, %106, %107 : vector<2x128xi32>
    %cst_69 = arith.constant -1.000000e+30 : f32
    %109 = vector.broadcast %cst_69 : f32 to vector<2x128xf32>
    %110 = arith.select %108, %105, %109 : vector<2x128xi1>, vector<2x128xf32>
    %cst_70 = arith.constant dense<0xFF800000> : vector<2xf32>
    %111 = vector.multi_reduction <maximumf>, %110, %cst_70 [1] : vector<2x128xf32> to vector<2xf32>
    %112 = vector.shape_cast %111 : vector<2xf32> to vector<2x1xf32>
    %113 = vector.broadcast %112 : vector<2x1xf32> to vector<2x128xf32>
    %114 = arith.subf %105, %113 : vector<2x128xf32>
    %115 = math.exp %114 : vector<2x128xf32>
    %cst_71 = arith.constant 0.000000e+00 : f32
    %116 = vector.broadcast %cst_71 : f32 to vector<2x128xf32>
    %117 = arith.select %108, %115, %116 : vector<2x128xi1>, vector<2x128xf32>
    %cst_72 = arith.constant dense<0.000000e+00> : vector<2xf32>
    %118 = vector.multi_reduction <add>, %117, %cst_72 [1] : vector<2x128xf32> to vector<2xf32>
    %119 = vector.shape_cast %118 : vector<2xf32> to vector<2x1xf32>
    %120 = math.log %119 : vector<2x1xf32>
    %121 = vector.broadcast %120 : vector<2x1xf32> to vector<2x128xf32>
    %122 = arith.subf %114, %121 : vector<2x128xf32>
    %c0_73 = arith.constant 0 : index
    %c0_74 = arith.constant 0 : index
    %123 = vector.load %arg8[%c0_73, %c0_74] : memref<2x128xf32, #tpu.memory_space<vmem>>, vector<2x128xf32>
    tpu.vector_store %arg8[%c0_73, %c0_74], %122 {strides = array<i32>} : memref<2x128xf32, #tpu.memory_space<vmem>>, vector<2x128xf32>,
    return
  }
}

</mosaic_0001>

<bundles_post_ra>
// kernel: equivariant_hon_forward.3
= control target key start
LH: loop header
LB: loop body
LE: loop exit
PB: predicated region body
PF: predicated region fallthrough
CT: control target
= control target key end

     0   :  { %vm29_vm0 = vcmask 261120   ;;  %vm206_vm1 = vcmask 130048   ;;  %s761_s1 = inlined_call_operand.vmem [shape: f32[32,32], index: 1, kind: input, shape index: {}]   ;;  %s762_s0 = inlined_call_operand.vmem [shape: f32[32,32], index: 0, kind: input, shape index: {}]   ;;  %s763_s2 = inlined_call_operand.vmem [shape: f32[32,16], index: 2, kind: input, shape index: {}]   ;;  %s764_s3 = inlined_call_operand.vmem [shape: f32[16,32], index: 3, kind: input, shape index: {}]   ;;  %s765_s5 = inlined_call_operand.vmem [shape: f32[32,32], index: 5, kind: output, shape index: {1}]   ;;  %s766_s4 = inlined_call_operand.vmem [shape: f32[32,32], index: 4, kind: output, shape index: {0}]   ;;  %s767_s6 = inlined_call_operand.vmem [shape: f32[32,16], index: 6, kind: output, shape index: {2}]   ;;  %s768_s7 = inlined_call_operand.vmem [shape: f32[16,32], index: 7, kind: output, shape index: {3}]  }
   0x1   :  { %v418_v0 = vld [vmem:[%s761_s1] sm:$0xff]  ;;  %v423_v1 = vld [vmem:[%s762_s0 + $0x10] sm:$0xff]  ;;  %v436_v6 = vld [vmem:[%s761_s1 + $0x8] sm:$0xff] }
   0x2   :  { %v428_v2 = vld [vmem:[%s762_s0] sm:$0xff]  ;;  %v114_v3 = vand.u32 2147483647, %v418_v0  ;;  %v27_v4 = vand.u32 2147483647, %v423_v1  ;;  %v441_v7 = vld [vmem:[%s762_s0 + $0x18] sm:$0xff] }
   0x3   :  { %v25_v5 = vand.u32 2147483647, %v428_v2  ;;  %v455_v11 = vld [vmem:[%s762_s0 + $0x8] sm:$0xff]  ;;  %v115_v12 = vand.u32 2147483647, %v436_v6  ;;  %v472_v18 = vld [vmem:[%s763_s2] sm:$0xff] }
   0x4   :  { %v118_v8 = vsel %vm29_vm0, %v114_v3, 0.0  ;;  %v36_v9 = vsel %vm29_vm0, %v27_v4, 0.0  ;;  %v28_v13 = vand.u32 2147483647, %v441_v7  ;;  %v26_v14 = vand.u32 2147483647, %v455_v11 }
   0x5   :  { %v30_v10 = vsel %vm29_vm0, %v25_v5, 0.0  ;;  %119 = vadd.xlane.f32.xlu2 %v118_v8  ;;  %37 = vadd.xlane.f32.xlu1 %v36_v9  ;;  %v121_v15 = vsel %vm29_vm0, %v115_v12, 0.0  ;;  %v477_v19 = vld [vmem:[%s761_s1 + $0x18] sm:$0xff]  ;;  %v482_v20 = vld [vmem:[%s761_s1 + $0x10] sm:$0xff]  ;;  %v202_v21 = vand.u32 2147483647, %v472_v18 }
   0x6   :  { %31 = vadd.xlane.f32.xlu0 %v30_v10  ;;  %v39_v16 = vsel %vm29_vm0, %v28_v13, 0.0  ;;  %v33_v17 = vsel %vm29_vm0, %v26_v14, 0.0  ;;  %v117_v22 = vand.u32 2147483647, %v477_v19  ;;  %v116_v23 = vand.u32 2147483647, %v482_v20 }
   0x7   :  { %v207_v24 = vsel %vm206_vm1, %v202_v21, 0.0  ;;  %v499_v27 = vld [vmem:[%s763_s2 + $0x18] sm:$0xff]  ;;  %v504_v28 = vld [vmem:[%s763_s2 + $0x10] sm:$0xff]  ;;  %v509_v29 = vld [vmem:[%s763_s2 + $0x8] sm:$0xff] }
   0x8   :  { %v127_v25 = vsel %vm29_vm0, %v117_v22, 0.0  ;;  %v124_v26 = vsel %vm29_vm0, %v116_v23, 0.0  ;;  %v205_v30 = vand.u32 2147483647, %v499_v27  ;;  %v204_v31 = vand.u32 2147483647, %v504_v28 }
   0x9   :  { %v203_v32 = vand.u32 2147483647, %v509_v29  ;;  %v526_v36 = vld [vmem:[%s764_s3 + $0x8] sm:$0xff]  ;;  %v531_v37 = vld [vmem:[%s764_s3] sm:$0xff] }
   0xa   :  { %v216_v33 = vsel %vm206_vm1, %v205_v30, 0.0  ;;  %v213_v34 = vsel %vm206_vm1, %v204_v31, 0.0  ;;  %v290_v38 = vand.u32 2147483647, %v526_v36  ;;  %v289_v39 = vand.u32 2147483647, %v531_v37 }
   0xb   :  { %v210_v35 = vsel %vm206_vm1, %v203_v32, 0.0 }
   0xc   :  { %v294_v40 = vsel %vm29_vm0, %v290_v38, 0.0  ;;  %v291_v41 = vsel %vm29_vm0, %v289_v39, 0.0 }
   0xd   :  { %122 = vadd.xlane.f32.xlu2 %v121_v15  ;;  %40 = vadd.xlane.f32.xlu1 %v39_v16 }
   0xe   :  { %34 = vadd.xlane.f32.xlu0 %v33_v17 }
  0x15   :  { %208 = vadd.xlane.f32.xlu2 %v207_v24  ;;  %128 = vadd.xlane.f32.xlu1 %v127_v25 }
  0x16   :  { %125 = vadd.xlane.f32.xlu0 %v124_v26 }
  0x1d   :  { %217 = vadd.xlane.f32.xlu2 %v216_v33  ;;  %214 = vadd.xlane.f32.xlu1 %v213_v34 }
  0x1e   :  { %211 = vadd.xlane.f32.xlu0 %v210_v35 }
  0x25   :  { %295 = vadd.xlane.f32.xlu1 %v294_v40 }
  0x26   :  { %292 = vadd.xlane.f32.xlu0 %v291_v41 }
  0x78   :  { %v120_v42 = vpop.xlane.xlu2 %119  ;;  %v38_v43 = vpop.xlane.xlu1 %37 }
  0x79   :  { %v130_v44 = vmax.f32 %v120_v42, 1.0  ;;  %v44_v45 = vmax.f32 %v38_v43, 1.0  ;;  %v32_v46 = vpop.xlane.xlu0 %31 }
  0x7a   :  { %v42_v47 = vmax.f32 %v32_v46, 1.0 }
  0x7b   :  { %347 = vrcp.f32 %v130_v44  ;;  %v143_v48 = vand.u32 2147483647, %v130_v44  ;;  %v145_v49 = vand.u32 2147483648, %v130_v44  ;;  %vm139_vm2 = vweird.f32 %v130_v44 }
  0x7c   :  { %349 = vrcp.f32 %v44_v45  ;;  %vm81_vm3 = vweird.f32 %v44_v45  ;;  %v85_v58 = vand.u32 2147483647, %v44_v45  ;;  %v87_v59 = vand.u32 2147483648, %v44_v45 }
  0x7d   :  { %351 = vrcp.f32 %v42_v47  ;;  %vm545_vm4 = vcmp.eq.f32.partialorder %v143_v48, 8.507059e+37  ;;  %v146_v9 = vor.u32 1.1754944e-38, %v145_v49  ;;  %vm51_vm5 = vweird.f32 %v42_v47 }
  0x7e   :  { %v55_v16 = vand.u32 2147483647, %v42_v47  ;;  %v57_v17 = vand.u32 2147483648, %v42_v47  ;;  %vm553_vm7 = vcmp.eq.f32.partialorder %v85_v58, 8.507059e+37  ;;  %v88_v40 = vor.u32 1.1754944e-38, %v87_v59 }
  0x80   :  { %v123_v50 = vpop.xlane.xlu2 %122  ;;  %v41_v51 = vpop.xlane.xlu1 %40  ;;  %vm560_vm11 = vcmp.eq.f32.partialorder %v55_v16, 8.507059e+37  ;;  %v58_v48 = vor.u32 1.1754944e-38, %v57_v17 }
  0x81   :  { %v348_v52 = vpop.eup %347  ;;  %v541_v53 = vmax.f32 %v123_v50, 1.0  ;;  %v543_v54 = vmax.f32 %v41_v51, 1.0  ;;  %v35_v55 = vpop.xlane.xlu0 %34 }
  0x82   :  { %v350_v56 = vpop.eup %349  ;;  %v135_v57 = vmul.f32 %v348_v52, %v130_v44  ;;  %v550_v63 = vmax.f32 %v35_v55, 1.0  ;;  %vm140_vm6 = vweird.f32 %v348_v52 }
  0x83   :  { %v352_v60 = vpop.eup %351  ;;  %v77_v62 = vmul.f32 %v350_v56, %v44_v45  ;;  %353 = vrcp.f32 %v541_v53  ;;  %vm82_vm8 = vweird.f32 %v350_v56  ;;  %v158_v34 = vand.u32 2147483647, %v541_v53  ;;  %vm141_vm10 = vmor %vm139_vm2, %vm140_vm6 }
  0x84   :  { %v136_v8 = vsub.f32 1.0, %v135_v57  ;;  %v47_v10 = vmul.f32 %v352_v60, %v42_v47  ;;  %355 = vrcp.f32 %v543_v54  ;;  %vm52_vm9 = vweird.f32 %v352_v60  ;;  %vm83_vm12 = vmor %vm81_vm3, %vm82_vm8 }
  0x85   :  { %v78_v15 = vsub.f32 1.0, %v77_v62  ;;  %357 = vrcp.f32 %v550_v63  ;;  %v160_v49 = vand.u32 2147483648, %v541_v53  ;;  %vm154_vm13 = vweird.f32 %v541_v53  ;;  %vm53_vm14 = vmor %vm51_vm5, %vm52_vm9 }
  0x86   :  { %v137_v24 = vmul.f32 %v348_v52, %v136_v8  ;;  %v48_v26 = vsub.f32 1.0, %v47_v10  ;;  %vm572_vm15 = vcmp.eq.f32.partialorder %v158_v34, 8.507059e+37  ;;  %v100_v45 = vand.u32 2147483647, %v543_v54 }
  0x87   :  { %v79_v33 = vmul.f32 %v350_v56, %v78_v15  ;;  %v161_v16 = vor.u32 1.1754944e-38, %v160_v49  ;;  %v72_v34 = vand.u32 2147483648, %v550_v63  ;;  %vm96_vm6 = vweird.f32 %v543_v54 }
  0x88   :  { %v138_v35 = vadd.f32 %v348_v52, %v137_v24  ;;  %v49_v41 = vmul.f32 %v352_v60, %v48_v26  ;;  %v129_v57 = vpop.xlane.xlu1 %128  ;;  %v209_v61 = vpop.xlane.xlu2 %208  ;;  %v102_v24 = vand.u32 2147483648, %v543_v54  ;;  %vm66_vm8 = vweird.f32 %v550_v63 }
  0x89   :  { %v354_v42 = vpop.eup %353  ;;  %v80_v43 = vadd.f32 %v350_v56, %v79_v33  ;;  %v126_v1 = vpop.xlane.xlu0 %125  ;;  %v598_v25 = vmax.f32 %v209_v61, 1.0  ;;  %v600_v26 = vmax.f32 %v129_v57, 1.0  ;;  %v70_v33 = vand.u32 2147483647, %v550_v63 }
  0x8a   :  { %v142_v50 = vsel %vm141_vm10, %v348_v52, %v138_v35  ;;  %v50_v51 = vadd.f32 %v352_v60, %v49_v41  ;;  %v150_v55 = vmul.f32 %v354_v42, %v541_v53  ;;  %v356_v58 = vpop.eup %355  ;;  %vm155_vm2 = vweird.f32 %v354_v42 }
  0x8b   :  { %v147_v44 = vsel %vm545_vm4, %v146_v9, %v142_v50  ;;  %v84_v59 = vsel %vm83_vm12, %v350_v56, %v80_v43  ;;  %v358_v9 = vpop.eup %357  ;;  %v92_v17 = vmul.f32 %v356_v58, %v543_v54  ;;  %vm156_vm3 = vmor %vm154_vm13, %vm155_vm2  ;;  %vm97_vm4 = vweird.f32 %v356_v58 }
  0x8c   :  { %v148_v52 = vmul.f32 %v147_v44, %v114_v3  ;;  %v89_v8 = vsel %vm553_vm7, %v88_v40, %v84_v59  ;;  %v54_v10 = vsel %vm53_vm14, %v352_v60, %v50_v51  ;;  %v151_v15 = vsub.f32 1.0, %v150_v55  ;;  %vm98_vm7 = vmor %vm96_vm6, %vm97_vm4 }
  0x8d   :  { %v90_v47 = vmul.f32 %v89_v8, %v27_v4  ;;  %v59_v56 = vsel %vm560_vm11, %v58_v48, %v54_v10  ;;  %v62_v60 = vmul.f32 %v358_v9, %v550_v63  ;;  %v93_v4 = vsub.f32 1.0, %v92_v17 }
  0x8e   :  { %194 = vst.msk [vmem:[%s765_s5] sm:$0xff] %vm29_vm0, %v148_v52  ;;  %v60_v0 = vmul.f32 %v59_v56, %v25_v5  ;;  %v152_v3 = vmul.f32 %v354_v42, %v151_v15  ;;  %359 = vrcp.f32 %v598_v25  ;;  %v611_v40 = vmax.f32 %v126_v1, 1.0 }
  0x8f   :  { %108 = vst.msk [vmem:[%s766_s4 + $0x10] sm:$0xff] %vm29_vm0, %v90_v47  ;;  %v63_v5 = vsub.f32 1.0, %v62_v60  ;;  %v94_v35 = vmul.f32 %v356_v58, %v93_v4  ;;  %vm67_vm5 = vweird.f32 %v358_v9  ;;  %361 = vrcp.f32 %v600_v26 }
  0x90   :  { %106 = vst.msk [vmem:[%s766_s4] sm:$0xff] %vm29_vm0, %v60_v0  ;;  %v153_v2 = vadd.f32 %v354_v42, %v152_v3  ;;  %v103_v49 = vor.u32 1.1754944e-38, %v102_v24  ;;  %v215_v51 = vpop.xlane.xlu1 %214  ;;  %vm101_vm9 = vcmp.eq.f32.partialorder %v100_v45, 8.507059e+37  ;;  %vm68_vm10 = vmor %vm66_vm8, %vm67_vm5  ;;  %v73_v55 = vor.u32 1.1754944e-38, %v72_v34  ;;  %v218_v57 = vpop.xlane.xlu2 %217 }
  0x91   :  { %v64_v43 = vmul.f32 %v358_v9, %v63_v5  ;;  %v95_v48 = vadd.f32 %v356_v58, %v94_v35  ;;  %363 = vrcp.f32 %v611_v40  ;;  %vm71_vm11 = vcmp.eq.f32.partialorder %v70_v33, 8.507059e+37  ;;  %v212_v52 = vpop.xlane.xlu0 %211 }
  0x92   :  { %v157_v41 = vsel %vm156_vm3, %v354_v42, %v153_v2  ;;  %vm228_vm12 = vweird.f32 %v598_v25  ;;  %v234_v8 = vand.u32 2147483648, %v598_v25  ;;  %v188_v10 = vand.u32 2147483647, %v600_v26 }
  0x93   :  { %v162_v46 = vsel %vm572_vm15, %v161_v16, %v157_v41  ;;  %v65_v50 = vadd.f32 %v358_v9, %v64_v43  ;;  %v99_v42 = vsel %vm98_vm7, %v356_v58, %v95_v48  ;;  %v649_v15 = vmax.f32 %v215_v51, 1.0 }
  0x94   :  { %v163_v53 = vmul.f32 %v162_v46, %v115_v12  ;;  %v104_v54 = vsel %vm101_vm9, %v103_v49, %v99_v42  ;;  %v232_v12 = vand.u32 2147483647, %v598_v25  ;;  %v360_v44 = vpop.eup %359  ;;  %vm184_vm14 = vweird.f32 %v600_v26 }
  0x95   :  { %v69_v6 = vsel %vm68_vm10, %v358_v9, %v65_v50  ;;  %v105_v63 = vmul.f32 %v104_v54, %v28_v13  ;;  %v362_v59 = vpop.eup %361  ;;  %v224_v45 = vmul.f32 %v360_v44, %v598_v25  ;;  %v638_v13 = vmax.f32 %v218_v57, 1.0 }
  0x96   :  { %195 = vst.msk [vmem:[%s765_s5 + $0x8] sm:$0xff] %vm29_vm0, %v163_v53  ;;  %v74_v58 = vsel %vm71_vm11, %v73_v55, %v69_v6  ;;  %v180_v7 = vmul.f32 %v362_v59, %v600_v26  ;;  %vm644_vm13 = vcmp.eq.f32.partialorder %v232_v12, 8.507059e+37  ;;  %v653_v47 = vmax.f32 %v212_v52, 1.0 }
  0x97   :  { %v75_v62 = vmul.f32 %v74_v58, %v26_v14  ;;  %109 = vst.msk [vmem:[%s766_s4 + $0x18] sm:$0xff] %vm29_vm0, %v105_v63  ;;  %v225_v11 = vsub.f32 1.0, %v224_v45  ;;  %v364_v61 = vpop.eup %363  ;;  %365 = vrcp.f32 %v638_v13  ;;  %vm229_vm15 = vweird.f32 %v360_v44 }
  0x98   :  { %v181_v9 = vsub.f32 1.0, %v180_v7  ;;  %v190_v16 = vand.u32 2147483648, %v600_v26  ;;  %v165_v17 = vmul.f32 %v364_v61, %v611_v40  ;;  %v235_v0 = vor.u32 1.1754944e-38, %v234_v8  ;;  %v296_v24 = vpop.xlane.xlu1 %295  ;;  %vm230_vm5 = vmor %vm228_vm12, %vm229_vm15 }
  0x99   :  { %107 = vst.msk [vmem:[%s766_s4 + $0x8] sm:$0xff] %vm29_vm0, %v75_v62  ;;  %v226_v56 = vmul.f32 %v360_v44, %v225_v11  ;;  %vm185_vm2 = vweird.f32 %v362_v59  ;;  %367 = vrcp.f32 %v649_v15  ;;  %vm658_vm3 = vcmp.eq.f32.partialorder %v188_v10, 8.507059e+37  ;;  %v293_v19 = vpop.xlane.xlu0 %292 }
  0x9a   :  { %v182_v3 = vmul.f32 %v362_v59, %v181_v9  ;;  %v166_v4 = vsub.f32 1.0, %v165_v17  ;;  %vm169_vm4 = vweird.f32 %v611_v40  ;;  %v173_v5 = vand.u32 2147483647, %v611_v40  ;;  %vm186_vm6 = vmor %vm184_vm14, %vm185_vm2 }
  0x9b   :  { %v227_v60 = vadd.f32 %v360_v44, %v226_v56  ;;  %v175_v33 = vand.u32 2147483648, %v611_v40  ;;  %369 = vrcp.f32 %v653_v47  ;;  %v191_v35 = vor.u32 1.1754944e-38, %v190_v16 }
  0x9c   :  { %v183_v2 = vadd.f32 %v362_v59, %v182_v3  ;;  %v167_v41 = vmul.f32 %v364_v61, %v166_v4  ;;  %vm170_vm7 = vweird.f32 %v364_v61  ;;  %v277_v48 = vand.u32 2147483647, %v638_v13 }
  0x9d   :  { %v231_v34 = vsel %vm230_vm5, %v360_v44, %v227_v60  ;;  %v366_v43 = vpop.eup %365  ;;  %v673_v53 = vmax.f32 %v296_v24, 1.0  ;;  %vm171_vm8 = vmor %vm169_vm4, %vm170_vm7  ;;  %vm174_vm9 = vcmp.eq.f32.partialorder %v173_v5, 8.507059e+37  ;;  %v176_v54 = vor.u32 1.1754944e-38, %v175_v33 }
  0x9e   :  { %v236_v46 = vsel %vm644_vm13, %v235_v0, %v231_v34  ;;  %v187_v25 = vsel %vm186_vm6, %v362_v59, %v183_v2  ;;  %v168_v26 = vadd.f32 %v364_v61, %v167_v41  ;;  %v269_v51 = vmul.f32 %v366_v43, %v638_v13 }
  0x9f   :  { %v237_v49 = vmul.f32 %v236_v46, %v202_v21  ;;  %v192_v50 = vsel %vm658_vm3, %v191_v35, %v187_v25  ;;  %v368_v42 = vpop.eup %367  ;;  %vm273_vm10 = vweird.f32 %v638_v13  ;;  %v279_v6 = vand.u32 2147483648, %v638_v13 }
  0xa0   :  { %v193_v55 = vmul.f32 %v192_v50, %v117_v22  ;;  %v172_v18 = vsel %vm171_vm8, %v364_v61, %v168_v26  ;;  %v270_v21 = vsub.f32 1.0, %v269_v51  ;;  %v254_v12 = vmul.f32 %v368_v42, %v649_v15 }
  0xa1   :  { %283 = vst.msk [vmem:[%s767_s6] sm:$0xff] %vm206_vm1, %v237_v49  ;;  %v370_v22 = vpop.eup %369  ;;  %v177_v40 = vsel %vm174_vm9, %v176_v54, %v172_v18  ;;  %vm274_vm11 = vweird.f32 %v366_v43  ;;  %vm695_vm12 = vcmp.eq.f32.partialorder %v277_v48, 8.507059e+37  ;;  %371 = vrcp.f32 %v673_v53 }
  0xa2   :  { %197 = vst.msk [vmem:[%s765_s5 + $0x18] sm:$0xff] %vm29_vm0, %v193_v55  ;;  %v178_v44 = vmul.f32 %v177_v40, %v116_v23  ;;  %v271_v63 = vmul.f32 %v366_v43, %v270_v21  ;;  %v255_v58 = vsub.f32 1.0, %v254_v12  ;;  %v239_v59 = vmul.f32 %v370_v22, %v653_v47  ;;  %vm275_vm15 = vmor %vm273_vm10, %vm274_vm11 }
  0xa3   :  { %vm258_vm13 = vweird.f32 %v649_v15  ;;  %v262_v62 = vand.u32 2147483647, %v649_v15  ;;  %v264_v45 = vand.u32 2147483648, %v649_v15  ;;  %v706_v52 = vmax.f32 %v293_v19, 1.0 }
  0xa4   :  { %196 = vst.msk [vmem:[%s765_s5 + $0x10] sm:$0xff] %vm29_vm0, %v178_v44  ;;  %v272_v8 = vadd.f32 %v366_v43, %v271_v63  ;;  %v256_v20 = vmul.f32 %v368_v42, %v255_v58  ;;  %vm259_vm14 = vweird.f32 %v368_v42  ;;  %v240_v23 = vsub.f32 1.0, %v239_v59 }
  0xa5   :  { %v280_v7 = vor.u32 1.1754944e-38, %v279_v6  ;;  %v247_v11 = vand.u32 2147483647, %v653_v47  ;;  %v249_v14 = vand.u32 2147483648, %v653_v47  ;;  %373 = vrcp.f32 %v706_v52  ;;  %vm260_vm3 = vmor %vm258_vm13, %vm259_vm14 }
  0xa6   :  { %v276_v10 = vsel %vm275_vm15, %v366_v43, %v272_v8  ;;  %v257_v61 = vadd.f32 %v368_v42, %v256_v20  ;;  %v241_v9 = vmul.f32 %v370_v22, %v240_v23  ;;  %vm244_vm2 = vweird.f32 %v370_v22 }
  0xa7   :  { %v372_v56 = vpop.eup %371  ;;  %v281_v16 = vsel %vm695_vm12, %v280_v7, %v276_v10  ;;  %vm263_vm4 = vcmp.eq.f32.partialorder %v262_v62, 8.507059e+37  ;;  %v265_v13 = vor.u32 1.1754944e-38, %v264_v45  ;;  %vm243_vm5 = vweird.f32 %v653_v47 }
  0xa8   :  { %v282_v17 = vmul.f32 %v281_v16, %v205_v30  ;;  %v261_v0 = vsel %vm260_vm3, %v368_v42, %v257_v61  ;;  %v242_v3 = vadd.f32 %v370_v22, %v241_v9  ;;  %v315_v60 = vmul.f32 %v372_v56, %v673_v53  ;;  %vm245_vm6 = vmor %vm243_vm5, %vm244_vm2 }
  0xa9   :  { %v266_v1 = vsel %vm263_vm4, %v265_v13, %v261_v0  ;;  %v250_v4 = vor.u32 1.1754944e-38, %v249_v14  ;;  %vm248_vm7 = vcmp.eq.f32.partialorder %v247_v11, 8.507059e+37  ;;  %v323_v2 = vand.u32 2147483647, %v673_v53 }
  0xaa   :  { %286 = vst.msk [vmem:[%s767_s6 + $0x18] sm:$0xff] %vm206_vm1, %v282_v17  ;;  %v267_v15 = vmul.f32 %v266_v1, %v204_v31  ;;  %v246_v24 = vsel %vm245_vm6, %v370_v22, %v242_v3  ;;  %v316_v47 = vsub.f32 1.0, %v315_v60  ;;  %v325_v5 = vand.u32 2147483648, %v673_v53 }
  0xab   :  { %v374_v27 = vpop.eup %373  ;;  %v251_v30 = vsel %vm248_vm7, %v250_v4, %v246_v24  ;;  %vm320_vm8 = vweird.f32 %v372_v56  ;;  %vm319_vm9 = vweird.f32 %v673_v53  ;;  %vm324_vm11 = vcmp.eq.f32.partialorder %v323_v2, 8.507059e+37 }
  0xac   :  { %285 = vst.msk [vmem:[%s767_s6 + $0x10] sm:$0xff] %vm206_vm1, %v267_v15  ;;  %v252_v33 = vmul.f32 %v251_v30, %v203_v32  ;;  %v317_v34 = vmul.f32 %v372_v56, %v316_v47  ;;  %v300_v28 = vmul.f32 %v374_v27, %v706_v52  ;;  %vm321_vm10 = vmor %vm319_vm9, %vm320_vm8  ;;  %v326_v41 = vor.u32 1.1754944e-38, %v325_v5 }
  0xad   :  { %v310_v43 = vand.u32 2147483648, %v706_v52  ;;  %vm305_vm12 = vweird.f32 %v374_v27  ;;  %v308_v46 = vand.u32 2147483647, %v706_v52 }
  0xae   :  { %284 = vst.msk [vmem:[%s767_s6 + $0x8] sm:$0xff] %vm206_vm1, %v252_v33  ;;  %v318_v31 = vadd.f32 %v372_v56, %v317_v34  ;;  %v301_v35 = vsub.f32 1.0, %v300_v28  ;;  %vm304_vm1 = vweird.f32 %v706_v52 }
  0xaf   :  { %vm306_vm13 = vmor %vm304_vm1, %vm305_vm12  ;;  %v311_v53 = vor.u32 1.1754944e-38, %v310_v43  ;;  %vm309_vm14 = vcmp.eq.f32.partialorder %v308_v46, 8.507059e+37 }
  0xb0   :  { %v322_v29 = vsel %vm321_vm10, %v372_v56, %v318_v31  ;;  %v302_v32 = vmul.f32 %v374_v27, %v301_v35 }
  0xb1   :  { %v327_v25 = vsel %vm324_vm11, %v326_v41, %v322_v29 }
  0xb2   :  { %v328_v48 = vmul.f32 %v327_v25, %v290_v38  ;;  %v303_v49 = vadd.f32 %v374_v27, %v302_v32 }
  0xb4   :  { %330 = vst.msk [vmem:[%s768_s7 + $0x8] sm:$0xff] %vm29_vm0, %v328_v48  ;;  %v307_v50 = vsel %vm306_vm13, %v374_v27, %v303_v49 }
  0xb5   :  { %v312_v26 = vsel %vm309_vm14, %v311_v53, %v307_v50 }
  0xb6   :  { %v313_v51 = vmul.f32 %v312_v26, %v289_v39 }
  0xb8   :  { %329 = vst.msk [vmem:[%s768_s7] sm:$0xff] %vm29_vm0, %v313_v51 }

// kernel: equivariant_hon_forward.5
= control target key start
LH: loop header
LB: loop body
LE: loop exit
PB: predicated region body
PF: predicated region fallthrough
CT: control target
= control target key end

     0   :  { %13 = vsyncpa [#allocation3], 0  ;;  %s835_s0 = inlined_call_operand.vmem [shape: f32[32,128], index: 0, kind: input, shape index: {}]   ;;  %s836_s1 = inlined_call_operand.vmem [shape: f32[32,128], index: 1, kind: input, shape index: {}]   ;;  %s837_s2 = inlined_call_operand.vmem [shape: f32[16,128], index: 2, kind: input, shape index: {}]   ;;  %s838_s3 = inlined_call_operand.vmem [shape: s32[32,128], index: 3, kind: input, shape index: {}]   ;;  %s839_s4 = inlined_call_operand.vmem [shape: s32[32,128], index: 4, kind: input, shape index: {}]   ;;  %s840_s5 = inlined_call_operand.vmem [shape: f32[2,16], index: 5, kind: input, shape index: {}]   ;;  %s841_s6 = inlined_call_operand.hbm [shape: f32[5,128,128], index: 6, kind: input, shape index: {}]   ;;  %s842_s7 = inlined_call_operand.hbm [shape: f32[3,1,128], index: 7, kind: input, shape index: {}]   ;;  %s843_s8 = inlined_call_operand.hbm [shape: f32[2,128], index: 8, kind: output, shape index: {}]  }
   0x1   :  { %14 = vsyncpa [#allocation6], 0 }
   0x2   :  { %15 = vsyncpa [#allocation4], 0  ;;  %s32_s29 = sshll.u32 %s841_s6, 4  ;;  %s590_s30 = smov [#allocation2]   ;;  %s33_s29 = int_to_ptr.hbm [resolvable:$true] %s32_s29 }
   0x3   :  { %s34_s9 = sshll.u32 %s590_s30, 4  ;;  %s45_s12 = sshll.u32 %s842_s7, 4  ;;  %s35_s9 = int_to_ptr.vmem [resolvable:$true] %s34_s9  ;;  %s46_s12 = int_to_ptr.hbm [resolvable:$true] %s45_s12 }
   0x4   :  { %s591_s13 = smov 128   ;;  %s592_s14 = smov 8  }
   0x5   :  { %40 = dma.hbm_to_vmem [thread:$0]  %s33_s29, 10240, %s35_s9, [#allocation3], %s591_s13, %s591_s13, %s592_s14  }
   0x6   :  { %s593_s15 = smov [#allocation5]   ;;  %s594_s17 = smov 16  }
   0x7   :  { %s47_s16 = sshll.u32 %s593_s15, 4  ;;  %s595_s18 = smov 1   ;;  %s48_s16 = int_to_ptr.vmem [resolvable:$true] %s47_s16 }
   0x8   :  { %53 = dma.hbm_to_vmem [thread:$0]  %s46_s12, 48, %s48_s16, [#allocation6], %s594_s17, %s594_s17, %s595_s18  }
   0x9   :  { %584 = dma.done.wait [#allocation3], 10240  }
   0xa   :  { %585 = vsyncadd [#allocation3], 4294957056 }
   0xb   :  { %586 = dma.done.wait [#allocation6], 48  }
   0xc   :  { %587 = vsyncadd [#allocation6], 4294967248  ;;  %vm212_vm0 = vcmask 123904   ;;  %v211_v0 = vld [vmem:[%s840_s5] sm:$0x3]  ;;  %v71_v1 = vld [vmem:[%s837_s2 + $0x8] sm:$0xff] }
   0xd   :  { %v70_v2 = vld [vmem:[%s837_s2] sm:$0xff]  ;;  %v213_v3 = vsel %vm212_vm0, %v211_v0, 0.0  ;;  %235 = vmatpush.msra.mxu0 %v71_v1  ;;  %vm217_vm1 = vcmask 130048   ;;  %v271_v4 = vld [vmem:[#allocation2 + $0x78] sm:$0xff]  ;;  %v270_v5 = vld [vmem:[#allocation2 + $0x70] sm:$0xff]  ;;  %v596_v25 = vmov 0.0  }
   0xe   :  { %v345_v6 = vld [vmem:[#allocation2 + $0x178] sm:$0xff]  ;;  %214 = vadd.xlane.f32.xlu0 %v213_v3  ;;  %309 = vmatpush.msra.mxu2 %v271_v4  ;;  %v344_v7 = vld [vmem:[#allocation2 + $0x170] sm:$0xff]  ;;  %v269_v9 = vld [vmem:[#allocation2 + $0x68] sm:$0xff]  ;;  %s483_s27 = sshll.u32 %s843_s8, 4  ;;  %s484_s27 = int_to_ptr.hbm [resolvable:$true] %s483_s27 }
   0xf   :  { %v288_v8 = vld [vmem:[#allocation2 + $0xf8] sm:$0xff]  ;;  %236 = vmatpush.msra.mxu0 %v70_v2  ;;  %346 = vmatpush.msra.mxu3 %v345_v6  ;;  %v343_v10 = vld [vmem:[#allocation2 + $0x168] sm:$0xff]  ;;  %v287_v11 = vld [vmem:[#allocation2 + $0xf0] sm:$0xff] }
  0x10   :  { %494 = vmatmul.msk.f32.vlgmr.msra.gmra.mxu0 %vm217_vm1, %v211_v0  ;;  %310 = vmatpush.msra.mxu2 %v270_v5  ;;  %v268_v12 = vld [vmem:[#allocation2 + $0x60] sm:$0xff]  ;;  %v286_v14 = vld [vmem:[#allocation2 + $0xe8] sm:$0xff]  ;;  %v267_v15 = vld [vmem:[#allocation2 + $0x58] sm:$0xff] }
  0x11   :  { %347 = vmatpush.msra.mxu3 %v344_v7  ;;  %289 = vmatpush.msra.mxu1 %v288_v8  ;;  %v342_v13 = vld [vmem:[#allocation2 + $0x160] sm:$0xff]  ;;  %v341_v16 = vld [vmem:[#allocation2 + $0x158] sm:$0xff]  ;;  %v266_v17 = vld [vmem:[#allocation2 + $0x50] sm:$0xff] }
  0x12   :  { %311 = vmatpush.msra.mxu2 %v269_v9  ;;  %v72_v18 = vld [vmem:[%s838_s3] sm:$0xff]  ;;  %v73_v19 = vld [vmem:[%s838_s3 + $0x8] sm:$0xff]  ;;  %v667_v20 = vld [vmem:[%s838_s3 + $0x10] sm:$0xff] }
  0x13   :  { %348 = vmatpush.msra.mxu3 %v343_v10  ;;  %290 = vmatpush.msra.mxu1 %v287_v11  ;;  %v672_v21 = vld [vmem:[%s838_s3 + $0x18] sm:$0xff]  ;;  %vm76_vm2 = vcmp.eq.s32.totalorder %v72_v18, 0  ;;  %vm77_vm3 = vcmp.eq.s32.totalorder %v73_v19, 0  ;;  %vm78_vm4 = vcmp.eq.s32.totalorder %v667_v20, 0  ;;  %v285_v22 = vld [vmem:[#allocation2 + $0xe0] sm:$0xff]  ;;  %v265_v23 = vld [vmem:[#allocation2 + $0x48] sm:$0xff] }
  0x14   :  { %312 = vmatpush.msra.mxu2 %v268_v12  ;;  %v340_v24 = vld [vmem:[#allocation2 + $0x150] sm:$0xff]  ;;  %vm79_vm5 = vcmp.eq.s32.totalorder %v672_v21, 0  ;;  %v93_v26 = vsel %vm76_vm2, 1.0, %v596_v25  ;;  %v94_v27 = vsel %vm77_vm3, 1.0, %v596_v25  ;;  %v62_v28 = vld [vmem:[%s835_s0] sm:$0xff]  ;;  %v63_v29 = vld [vmem:[%s835_s0 + $0x8] sm:$0xff] }
  0x15   :  { %349 = vmatpush.msra.mxu3 %v342_v13  ;;  %291 = vmatpush.msra.mxu1 %v286_v14  ;;  %v64_v30 = vld [vmem:[%s835_s0 + $0x10] sm:$0xff]  ;;  %v95_v31 = vsel %vm78_vm4, 1.0, %v596_v25  ;;  %v96_v32 = vsel %vm79_vm5, 1.0, %v596_v25  ;;  %v97_v33 = vmax.f32 %v93_v26, %v94_v27  ;;  %v284_v34 = vld [vmem:[#allocation2 + $0xd8] sm:$0xff]  ;;  %v264_v35 = vld [vmem:[#allocation2 + $0x40] sm:$0xff]  ;;  %vm108_vm6 = vcmp.eq.s32.totalorder %v72_v18, 1 }
  0x16   :  { %313 = vmatpush.msra.mxu2 %v267_v15  ;;  %v339_v36 = vld [vmem:[#allocation2 + $0x148] sm:$0xff]  ;;  %v98_v37 = vmax.f32 %v95_v31, %v96_v32  ;;  %v283_v38 = vld [vmem:[#allocation2 + $0xd0] sm:$0xff]  ;;  %v263_v39 = vld [vmem:[#allocation2 + $0x38] sm:$0xff]  ;;  %v696_v43 = vsel %vm76_vm2, %v62_v28, -1e+30  ;;  %vm109_vm7 = vcmp.eq.s32.totalorder %v73_v19, 1 }
  0x17   :  { %350 = vmatpush.msra.mxu3 %v341_v16  ;;  %292 = vmatpush.msra.mxu1 %v285_v22  ;;  %v338_v40 = vld [vmem:[#allocation2 + $0x140] sm:$0xff]  ;;  %v282_v41 = vld [vmem:[#allocation2 + $0xc8] sm:$0xff]  ;;  %v262_v42 = vld [vmem:[#allocation2 + $0x30] sm:$0xff]  ;;  %v699_v46 = vsel %vm77_vm3, %v63_v29, -1e+30  ;;  %vm110_vm8 = vcmp.eq.s32.totalorder %v667_v20, 1 }
  0x18   :  { %314 = vmatpush.msra.mxu2 %v266_v17  ;;  %v99_v44 = vmax.f32 %v97_v33, %v98_v37  ;;  %v337_v45 = vld [vmem:[#allocation2 + $0x138] sm:$0xff]  ;;  %vm111_vm9 = vcmp.eq.s32.totalorder %v672_v21, 1  ;;  %v125_v47 = vsel %vm108_vm6, 1.0, %v596_v25  ;;  %v281_v48 = vld [vmem:[#allocation2 + $0xc0] sm:$0xff]  ;;  %v261_v49 = vld [vmem:[#allocation2 + $0x28] sm:$0xff]  ;;  %v126_v55 = vsel %vm109_vm7, 1.0, %v596_v25 }
  0x19   :  { %351 = vmatpush.msra.mxu3 %v340_v24  ;;  %293 = vmatpush.msra.mxu1 %v284_v34  ;;  %v82_v50 = vsel %vm78_vm4, %v64_v30, -1e+30  ;;  %v336_v52 = vld [vmem:[#allocation2 + $0x130] sm:$0xff]  ;;  %v112_v53 = vsel %vm108_vm6, %v62_v28, -1e+30  ;;  %v280_v56 = vld [vmem:[#allocation2 + $0xb8] sm:$0xff]  ;;  %v129_v62 = vmax.f32 %v125_v47, %v126_v55  ;;  %v84_v7 = vmax.f32 %v696_v43, %v699_v46 }
  0x1a   :  { %315 = vmatpush.msra.mxu2 %v265_v23  ;;  %v100_v51 = vrot.slane %v99_v44, 4  ;;  %v113_v54 = vsel %vm109_vm7, %v63_v29, -1e+30  ;;  %v260_v57 = vld [vmem:[#allocation2 + $0x20] sm:$0xff]  ;;  %v335_v58 = vld [vmem:[#allocation2 + $0x128] sm:$0xff]  ;;  %v127_v60 = vsel %vm110_vm8, 1.0, %v596_v25 }
  0x1b   :  { %352 = vmatpush.msra.mxu3 %v339_v36  ;;  %294 = vmatpush.msra.mxu1 %v283_v38  ;;  %v128_v61 = vsel %vm111_vm9, 1.0, %v596_v25  ;;  %v279_v63 = vld [vmem:[#allocation2 + $0xb0] sm:$0xff]  ;;  %v259_v0 = vld [vmem:[#allocation2 + $0x18] sm:$0xff]  ;;  %v334_v1 = vld [vmem:[#allocation2 + $0x120] sm:$0xff]  ;;  %v114_v2 = vsel %vm110_vm8, %v64_v30, -1e+30  ;;  %v116_v9 = vmax.f32 %v112_v53, %v113_v54 }
  0x1c   :  { %316 = vmatpush.msra.mxu2 %v264_v35  ;;  %v101_v59 = vmax.f32 %v99_v44, %v100_v51  ;;  %v130_v3 = vmax.f32 %v127_v60, %v128_v61  ;;  %v278_v4 = vld [vmem:[#allocation2 + $0xa8] sm:$0xff]  ;;  %v258_v5 = vld [vmem:[#allocation2 + $0x10] sm:$0xff]  ;;  %v65_v6 = vld [vmem:[%s835_s0 + $0x18] sm:$0xff]  ;;  %vm140_vm4 = vcmask 1040384  }
  0x1d   :  { %353 = vmatpush.msra.mxu3 %v338_v40  ;;  %295 = vmatpush.msra.mxu1 %v282_v41  ;;  %v727_v10 = vld [vmem:[%s836_s1] sm:$0xff]  ;;  %v333_v11 = vld [vmem:[#allocation2 + $0x118] sm:$0xff]  ;;  %v83_v12 = vsel %vm79_vm5, %v65_v6, -1e+30  ;;  %v115_v13 = vsel %vm111_vm9, %v65_v6, -1e+30 }
  0x1e   :  { %317 = vmatpush.msra.mxu2 %v263_v39  ;;  %v102_v8 = vrot.slane %v101_v59, 2  ;;  %v131_v14 = vmax.f32 %v129_v62, %v130_v3  ;;  %v736_v15 = vld [vmem:[%s836_s1 + $0x8] sm:$0xff]  ;;  %v741_v16 = vld [vmem:[%s836_s1 + $0x10] sm:$0xff]  ;;  %v85_v17 = vmax.f32 %v82_v50, %v83_v12  ;;  %v117_v19 = vmax.f32 %v114_v2, %v115_v13  ;;  %v746_v20 = vld [vmem:[%s839_s4] sm:$0xff] }
  0x1f   :  { %354 = vmatpush.msra.mxu3 %v337_v45  ;;  %296 = vmatpush.msra.mxu1 %v281_v48  ;;  %v751_v21 = vld [vmem:[%s839_s4 + $0x8] sm:$0xff]  ;;  %v756_v22 = vld [vmem:[%s839_s4 + $0x10] sm:$0xff]  ;;  %v761_v24 = vld [vmem:[%s836_s1 + $0x18] sm:$0xff]  ;;  %vm146_vm10 = vcmp.eq.s32.totalorder %v746_v20, 0  ;;  %vm178_vm15 = vcmp.eq.s32.totalorder %v746_v20, 1  ;;  %s597_s1 = smov [#allocation7]  }
  0x20   :  { %318 = vmatpush.msra.mxu2 %v262_v42  ;;  %v103_v18 = vmax.f32 %v101_v59, %v102_v8  ;;  %v132_v23 = vrot.slane %v131_v14, 4  ;;  %v766_v26 = vld [vmem:[%s839_s4 + $0x18] sm:$0xff]  ;;  %vm147_vm11 = vcmp.eq.s32.totalorder %v751_v21, 0  ;;  %vm148_vm12 = vcmp.eq.s32.totalorder %v756_v22, 0  ;;  %v277_v27 = vld [vmem:[#allocation2 + $0xa0] sm:$0xff]  ;;  %v257_v28 = vld [vmem:[#allocation2 + $0x8] sm:$0xff] }
  0x21   :  { %355 = vmatpush.msra.mxu3 %v336_v52  ;;  %297 = vmatpush.msra.mxu1 %v280_v56  ;;  %v332_v29 = vld [vmem:[#allocation2 + $0x110] sm:$0xff]  ;;  %v86_v30 = vmax.f32 %v84_v7, %v85_v17  ;;  %v118_v32 = vmax.f32 %v116_v9, %v117_v19  ;;  %vm149_vm13 = vcmp.eq.s32.totalorder %v766_v26, 0  ;;  %v150_v34 = vsel %vm146_vm10, %v727_v10, -1e+30  ;;  %v276_v45 = vld [vmem:[#allocation2 + $0x98] sm:$0xff]  ;;  %v256_v46 = vld [vmem:[#allocation2] sm:$0xff] }
  0x22   :  { %319 = vmatpush.msra.mxu2 %v261_v49  ;;  %v104_v31 = vrot.slane %v103_v18, 1  ;;  %v133_v33 = vmax.f32 %v131_v14, %v132_v23  ;;  %v151_v35 = vsel %vm147_vm11, %v736_v15, -1e+30  ;;  %v152_v36 = vsel %vm148_vm12, %v741_v16, -1e+30  ;;  %v331_v47 = vld [vmem:[#allocation2 + $0x108] sm:$0xff] }
  0x23   :  { %356 = vmatpush.msra.mxu3 %v335_v58  ;;  %298 = vmatpush.msra.mxu1 %v279_v63  ;;  %v87_v37 = vrot.slane %v86_v30, 4  ;;  %v119_v39 = vrot.slane %v118_v32, 4  ;;  %v153_v40 = vsel %vm149_vm13, %v761_v24, -1e+30  ;;  %v154_v42 = vmax.f32 %v150_v34, %v151_v35  ;;  %v275_v56 = vld [vmem:[#allocation2 + $0x90] sm:$0xff]  ;;  %v388_v2 = vld [vmem:[#allocation2 + $0x1f8] sm:$0xff] }
  0x24   :  { %320 = vmatpush.msra.mxu2 %v260_v57  ;;  %v781_v38 = vmax.f32 %v103_v18, %v104_v31  ;;  %v134_v41 = vrot.slane %v133_v33, 2  ;;  %v155_v43 = vmax.f32 %v152_v36, %v153_v40  ;;  %v163_v44 = vsel %vm146_vm10, 1.0, %v596_v25  ;;  %v330_v57 = vld [vmem:[#allocation2 + $0x100] sm:$0xff]  ;;  %394 = vmatpush.msrb.mxu0 %v388_v2  ;;  %v387_v6 = vld [vmem:[#allocation2 + $0x1f0] sm:$0xff]  ;;  %v386_v7 = vld [vmem:[#allocation2 + $0x1e8] sm:$0xff]  ;;  %s481_s4 = sshll.u32 %s597_s1, 4  ;;  %s482_s4 = int_to_ptr.vmem [resolvable:$true] %s481_s4 }
  0x25   :  { %357 = vmatpush.msra.mxu3 %v334_v1  ;;  %299 = vmatpush.msra.mxu1 %v278_v4  ;;  %v88_v48 = vmax.f32 %v86_v30, %v87_v37  ;;  %v120_v49 = vmax.f32 %v118_v32, %v119_v39  ;;  %v164_v52 = vsel %vm147_vm11, 1.0, %v596_v25  ;;  %v165_v53 = vsel %vm148_vm12, 1.0, %v596_v25  ;;  %v273_v1 = vld [vmem:[#allocation2 + $0x80] sm:$0xff]  ;;  %v384_v32 = vld [vmem:[#allocation2 + $0x1d8] sm:$0xff]  ;;  %v383_v37 = vld [vmem:[#allocation2 + $0x1d0] sm:$0xff] }
  0x26   :  { %321 = vmatpush.msra.mxu2 %v259_v0  ;;  %v135_v50 = vmax.f32 %v133_v33, %v134_v41  ;;  %v156_v51 = vmax.f32 %v154_v42, %v155_v43  ;;  %v166_v58 = vsel %vm149_vm13, 1.0, %v596_v25  ;;  %v167_v59 = vmax.f32 %v163_v44, %v164_v52  ;;  %v274_v0 = vld [vmem:[#allocation2 + $0x88] sm:$0xff]  ;;  %395 = vmatpush.msrb.mxu0 %v387_v6  ;;  %v385_v23 = vld [vmem:[#allocation2 + $0x1e0] sm:$0xff] }
  0x27   :  { %358 = vmatpush.msra.mxu3 %v333_v11  ;;  %300 = vmatpush.msra.mxu1 %v277_v27  ;;  %v89_v54 = vrot.slane %v88_v48, 2  ;;  %v121_v55 = vrot.slane %v120_v49, 2  ;;  %vm106_vm14 = vcmp.gt.f32.partialorder %v781_v38, 0.0  ;;  %v168_v61 = vmax.f32 %v165_v53, %v166_v58  ;;  %v382_v41 = vld [vmem:[#allocation2 + $0x1c8] sm:$0xff] }
  0x28   :  { %322 = vmatpush.msra.mxu2 %v258_v5  ;;  %v136_v60 = vrot.slane %v135_v50, 1  ;;  %vm179_vm0 = vcmp.eq.s32.totalorder %v751_v21, 1  ;;  %vm180_vm1 = vcmp.eq.s32.totalorder %v756_v22, 1  ;;  %v157_v4 = vrot.slane %v156_v51, 4  ;;  %396 = vmatpush.msrb.mxu0 %v386_v7 }
  0x29   :  { %359 = vmatpush.msra.mxu3 %v332_v29  ;;  %301 = vmatpush.msra.mxu1 %v276_v45  ;;  %v90_v62 = vmax.f32 %v88_v48, %v89_v54  ;;  %v122_v63 = vmax.f32 %v120_v49, %v121_v55  ;;  %v169_v5 = vmax.f32 %v167_v59, %v168_v61  ;;  %vm181_vm2 = vcmp.eq.s32.totalorder %v766_v26, 1  ;;  %v381_v45 = vld [vmem:[#allocation2 + $0x1c0] sm:$0xff]  ;;  %v380_v48 = vld [vmem:[#allocation2 + $0x1b8] sm:$0xff]  ;;  %v378_v55 = vld [vmem:[#allocation2 + $0x1a8] sm:$0xff] }
  0x2a   :  { %323 = vmatpush.msra.mxu2 %v257_v28  ;;  %v137_v3 = vmax.f32 %v135_v50, %v136_v60  ;;  %v182_v11 = vsel %vm178_vm15, %v727_v10, -1e+30  ;;  %v183_v12 = vsel %vm179_vm0, %v736_v15, -1e+30  ;;  %v184_v14 = vsel %vm180_vm1, %v741_v16, -1e+30  ;;  %397 = vmatpush.msrb.mxu0 %v385_v23 }
  0x2b   :  { %360 = vmatpush.msra.mxu3 %v331_v47  ;;  %302 = vmatpush.msra.mxu1 %v275_v56  ;;  %v91_v8 = vrot.slane %v90_v62, 1  ;;  %v123_v9 = vrot.slane %v122_v63, 1  ;;  %v170_v13 = vrot.slane %v169_v5, 4  ;;  %v185_v19 = vsel %vm181_vm2, %v761_v24, -1e+30  ;;  %v377_v60 = vld [vmem:[#allocation2 + $0x1a0] sm:$0xff] }
  0x2c   :  { %324 = vmatpush.msra.mxu2 %v256_v46  ;;  %vm138_vm3 = vcmp.gt.f32.partialorder %v137_v3, 0.0  ;;  %v186_v10 = vmax.f32 %v182_v11, %v183_v12  ;;  %v158_v27 = vmax.f32 %v156_v51, %v157_v4  ;;  %v187_v15 = vmax.f32 %v184_v14, %v185_v19  ;;  %398 = vmatpush.msrb.mxu0 %v384_v32  ;;  %v379_v51 = vld [vmem:[#allocation2 + $0x1b0] sm:$0xff]  ;;  %v374_v19 = vld [vmem:[#allocation2 + $0x188] sm:$0xff]  ;;  %v431_v23 = vld [vmem:[#allocation2 + $0x278] sm:$0xff] }
  0x2d   :  { %361 = vmatpush.msra.mxu3 %v330_v57  ;;  %303 = vmatpush.msra.mxu1 %v274_v0  ;;  %v92_v17 = vmax.f32 %v90_v62, %v91_v8  ;;  %v124_v18 = vmax.f32 %v122_v63, %v123_v9  ;;  %v171_v28 = vmax.f32 %v169_v5, %v170_v13  ;;  %v195_v29 = vsel %vm178_vm15, 1.0, %v596_v25  ;;  %v422_v32 = vld [vmem:[#allocation2 + $0x230] sm:$0xff] }
  0x2e   :  { %v196_v31 = vsel %vm179_vm0, 1.0, %v596_v25  ;;  %v197_v24 = vsel %vm180_vm1, 1.0, %v596_v25  ;;  %v188_v20 = vmax.f32 %v186_v10, %v187_v15  ;;  %v198_v35 = vsel %vm181_vm2, 1.0, %v596_v25  ;;  %399 = vmatpush.msrb.mxu0 %v383_v37  ;;  %v373_v10 = vld [vmem:[#allocation2 + $0x180] sm:$0xff] }
  0x2f   :  { %304 = vmatpush.msra.mxu1 %v273_v1  ;;  %v107_v16 = vsel %vm106_vm14, %v92_v17, 0.0  ;;  %v139_v30 = vsel %vm138_vm3, %v124_v18, 0.0  ;;  %v172_v34 = vrot.slane %v171_v28, 2  ;;  %v199_v36 = vmax.f32 %v195_v29, %v196_v31  ;;  %v376_v17 = vld [vmem:[#allocation2 + $0x198] sm:$0xff]  ;;  %v375_v18 = vld [vmem:[#allocation2 + $0x190] sm:$0xff]  ;;  %v428_v15 = vld [vmem:[#allocation2 + $0x260] sm:$0xff] }
  0x30   :  { %v141_v33 = vsel %vm140_vm4, %v107_v16, %v139_v30  ;;  %v159_v38 = vrot.slane %v158_v27, 2  ;;  %v189_v21 = vrot.slane %v188_v20, 4  ;;  %v200_v39 = vmax.f32 %v197_v24, %v198_v35  ;;  %400 = vmatpush.msrb.mxu0 %v382_v41  ;;  %v427_v29 = vld [vmem:[#allocation2 + $0x258] sm:$0xff]  ;;  %v426_v16 = vld [vmem:[#allocation2 + $0x250] sm:$0xff]  ;;  %v425_v30 = vld [vmem:[#allocation2 + $0x248] sm:$0xff] }
  0x31   :  { %325 = vmatmul.f32.vlgmr.msra.gmra.mxu2 %v141_v33  ;;  %v173_v22 = vmax.f32 %v171_v28, %v172_v34  ;;  %437 = vmatpush.msrb.mxu1 %v431_v23  ;;  %v429_v28 = vld [vmem:[#allocation2 + $0x268] sm:$0xff]  ;;  %v424_v31 = vld [vmem:[#allocation2 + $0x240] sm:$0xff]  ;;  %v423_v24 = vld [vmem:[#allocation2 + $0x238] sm:$0xff]  ;;  %vm461_vm12 = vcmask 1041408  }
  0x32   :  { %v190_v43 = vmax.f32 %v188_v20, %v189_v21  ;;  %v201_v44 = vmax.f32 %v199_v36, %v200_v39  ;;  %v160_v46 = vmax.f32 %v158_v27, %v159_v38  ;;  %401 = vmatpush.msrb.mxu0 %v381_v45  ;;  %v430_v27 = vld [vmem:[#allocation2 + $0x270] sm:$0xff]  ;;  %v421_v33 = vld [vmem:[#allocation2 + $0x228] sm:$0xff]  ;;  %v420_v34 = vld [vmem:[#allocation2 + $0x220] sm:$0xff] }
  0x33   :  { %v174_v47 = vrot.slane %v173_v22, 1  ;;  %438 = vmatpush.msrb.mxu1 %v430_v27  ;;  %v419_v36 = vld [vmem:[#allocation2 + $0x218] sm:$0xff]  ;;  %v503_v38 = vld [vmem:[#allocation5] ss:$0 sm:$0xff]  ;;  %v417_v41 = vld [vmem:[#allocation2 + $0x208] sm:$0xff] }
  0x34   :  { %v191_v26 = vrot.slane %v190_v43, 2  ;;  %v202_v25 = vrot.slane %v201_v44, 4  ;;  %v161_v52 = vrot.slane %v160_v46, 1  ;;  %402 = vmatpush.msrb.mxu0 %v380_v48 }
  0x35   :  { %v175_v53 = vmax.f32 %v173_v22, %v174_v47  ;;  %439 = vmatpush.msrb.mxu1 %v429_v28  ;;  %v418_v22 = vld [vmem:[#allocation2 + $0x210] sm:$0xff]  ;;  %v457_v47 = vlaneseq }
  0x36   :  { %v192_v49 = vmax.f32 %v190_v43, %v191_v26  ;;  %v203_v50 = vmax.f32 %v201_v44, %v202_v25  ;;  %403 = vmatpush.msrb.mxu0 %v379_v51  ;;  %v162_v61 = vmax.f32 %v160_v46, %v161_v52  ;;  %v504_v43 = vld [vmem:[#allocation5 + $0x1] ss:$0 sm:$0xff]  ;;  %v505_v25 = vld [vmem:[#allocation5 + $0x2] ss:$0 sm:$0xff] }
  0x37   :  { %vm176_vm5 = vcmp.gt.f32.partialorder %v175_v53, 0.0  ;;  %440 = vmatpush.msrb.mxu1 %v428_v15  ;;  %v458_v26 = vand.u32 127, %v457_v47 }
  0x38   :  { %v204_v54 = vrot.slane %v203_v50, 2  ;;  %v193_v57 = vrot.slane %v192_v49, 1  ;;  %404 = vmatpush.msrb.mxu0 %v378_v55  ;;  %v177_v5 = vsel %vm176_vm5, %v162_v61, 0.0 }
  0x39   :  { %441 = vmatpush.msrb.mxu1 %v427_v29  ;;  %vm459_vm11 = vcmp.lt.s32.totalorder %v458_v26, 5 }
  0x3a   :  { %v205_v59 = vmax.f32 %v203_v50, %v204_v54  ;;  %v194_v1 = vmax.f32 %v192_v49, %v193_v57  ;;  %405 = vmatpush.msrb.mxu0 %v377_v60 }
  0x3b   :  { %442 = vmatpush.msrb.mxu1 %v426_v16 }
  0x3c   :  { %v206_v63 = vrot.slane %v205_v59, 1  ;;  %406 = vmatpush.msrb.mxu0 %v376_v17 }
  0x3d   :  { %443 = vmatpush.msrb.mxu1 %v425_v30 }
  0x3e   :  { %v207_v4 = vmax.f32 %v205_v59, %v206_v63  ;;  %407 = vmatpush.msrb.mxu0 %v375_v18 }
  0x3f   :  { %444 = vmatpush.msrb.mxu1 %v424_v31 }
  0x40   :  { %vm208_vm8 = vcmp.gt.f32.partialorder %v207_v4, 0.0  ;;  %408 = vmatpush.msrb.mxu0 %v374_v19 }
  0x41   :  { %v209_v9 = vsel %vm208_vm8, %v194_v1, 0.0  ;;  %445 = vmatpush.msrb.mxu1 %v423_v24 }
  0x42   :  { %v210_v12 = vsel %vm140_vm4, %v177_v5, %v209_v9  ;;  %409 = vmatpush.msrb.mxu0 %v373_v10 }
  0x43   :  { %305 = vmatmul.f32.vlgmr.msra.gmra.mxu1 %v210_v12 }
  0x44   :  { %446 = vmatpush.msrb.mxu1 %v422_v32 }
  0x46   :  { %447 = vmatpush.msrb.mxu1 %v421_v33 }
  0x48   :  { %448 = vmatpush.msrb.mxu1 %v420_v34 }
  0x4a   :  { %449 = vmatpush.msrb.mxu1 %v419_v36 }
  0x4c   :  { %450 = vmatpush.msrb.mxu1 %v418_v22 }
  0x4e   :  { %451 = vmatpush.msrb.mxu1 %v417_v41 }
  0x81   :  { %v215_v40 = vpop.xlane.xlu0 %214 }
  0x82   :  { %v216_v42 = vmax.f32 %v215_v40, 1.0 }
  0x84   :  { %506 = vrcp.f32 %v216_v42  ;;  %v252_v0 = vand.u32 2147483648, %v216_v42  ;;  %v250_v3 = vand.u32 2147483647, %v216_v42  ;;  %vm246_vm7 = vweird.f32 %v216_v42 }
  0x86   :  { %v253_v8 = vor.u32 1.1754944e-38, %v252_v0  ;;  %vm251_vm10 = vcmp.eq.f32.partialorder %v250_v3, 8.507059e+37 }
  0x8a   :  { %v507_v56 = vpop.eup %506 }
  0x8b   :  { %v242_v58 = vmul.f32 %v507_v56, %v216_v42  ;;  %vm247_vm6 = vweird.f32 %v507_v56  ;;  %v416_v42 = vld [vmem:[#allocation2 + $0x200] sm:$0xff] }
  0x8c   :  { %vm248_vm9 = vmor %vm246_vm7, %vm247_vm6  ;;  %452 = vmatpush.msrb.mxu1 %v416_v42 }
  0x8d   :  { %v243_v62 = vsub.f32 1.0, %v242_v58  ;;  %v238_v7 = vpop.f32.mrf.mxu0 }
  0x8f   :  { %v244_v2 = vmul.f32 %v507_v56, %v243_v62 }
  0x91   :  { %v245_v6 = vadd.f32 %v507_v56, %v244_v2 }
  0x93   :  { %v249_v11 = vsel %vm248_vm9, %v507_v56, %v245_v6 }
  0x94   :  { %v254_v13 = vsel %vm251_vm10, %v253_v8, %v249_v11 }
  0x95   :  { %v255_v14 = vmul.f32 %v254_v13, %v238_v7 }
  0x97   :  { %362 = vmatmul.f32.vlgmr.msra.gmra.mxu3 %v255_v14 }
  0xb4   :  { %v326_v35 = vpop.f32.mrf.mxu2 }
  0xc0   :  { %v306_v20 = vpop.f32.mrf.mxu1 }
  0xc1   :  { %v327_v37 = vadd.f32 %v326_v35, %v306_v20 }
 0x11a   :  { %v363_v21 = vpop.f32.mrf.mxu3 }
 0x11b   :  { %v366_v39 = vadd.f32 %v363_v21, %v327_v37 }
 0x11d   :  { %v371_v40 = vadd.f32 %v503_v38, %v366_v39 }
 0x11f   :  { %410 = vmatmul.f32.vlgmr.msrb.gmra.mxu0 %v371_v40 }
 0x19c   :  { %v411_v44 = vpop.f32.mrf.mxu0 }
 0x19d   :  { %v412_v45 = vadd.f32 %v504_v43, %v411_v44 }
 0x19f   :  { %v414_v46 = vmax.f32 %v412_v45, 0.0 }
 0x1a1   :  { %453 = vmatmul.f32.vlgmr.msrb.gmra.mxu1 %v414_v46 }
 0x21e   :  { %v454_v48 = vpop.f32.mrf.mxu1 }
 0x21f   :  { %v455_v49 = vadd.f32 %v505_v25, %v454_v48 }
 0x221   :  { %v460_v50 = vsel %vm459_vm11, %v455_v49, -1e+30 }
 0x222   :  { %v462_v51 = vsel %vm461_vm12, %v460_v50, -inf }
 0x223   :  { %463 = vmax.xlane.f32.xlu0 %v462_v51 }
 0x296   :  { %v464_v52 = vpop.xlane.xlu0 %463 }
 0x297   :  { %v465_v53 = vsub.f32 %v455_v49, %v464_v52 }
 0x299   :  { %v466_v54 = vmul.f32 1.442695, %v465_v53 }
 0x29b   :  { %508 = vpow2.f32 %v466_v54 }
 0x2a1   :  { %v509_v55 = vpop.eup %508 }
 0x2a2   :  { %v468_v56 = vsel %vm459_vm11, %v509_v55, 0.0 }
 0x2a3   :  { %v469_v57 = vsel %vm461_vm12, %v468_v56, 0.0 }
 0x2a4   :  { %470 = vadd.xlane.f32.xlu1 %v469_v57 }
 0x317   :  { %v471_v58 = vpop.xlane.xlu1 %470 }
 0x318   :  { %510 = vlog2.f32 %v471_v58 }
 0x31e   :  { %v511_v59 = vpop.eup %510 }
 0x31f   :  { %v473_v60 = vmul.f32 0.6931472, %v511_v59 }
 0x321   :  { %v474_v61 = vsub.f32 %v465_v53, %v473_v60 }
 0x323   :  { %475 = vst [vmem:[#allocation7] sm:$0x3] %v474_v61 }
 0x324   :  { %486 = dma.vmem_to_hbm [thread:$0]  %s482_s4, 32, %s484_s27, [#allocation4]  }
 0x325   :  { %588 = dma.done.wait [#allocation4], 32  }
 0x326   :  { %589 = vsyncadd [#allocation4], 4294967264 }
 0x327   :  { %491 = vsyncpa [#allocation3], 1 }
 0x328   :  { %492 = vsyncpa [#allocation6], 1 }
 0x329   :  { %493 = vsyncpa [#allocation4], 1 }

// kernel: equivariant_hon_forward.4
= control target key start
LH: loop header
LB: loop body
LE: loop exit
PB: predicated region body
PF: predicated region fallthrough
CT: control target
= control target key end

     0   :  { %s4185_s0 = inlined_call_operand.vmem [shape: f32[32,128], index: 0, kind: input, shape index: {}]   ;;  %s4186_s1 = inlined_call_operand.vmem [shape: f32[32,128], index: 1, kind: input, shape index: {}]   ;;  %s4187_s2 = inlined_call_operand.vmem [shape: f32[16,128], index: 2, kind: input, shape index: {}]   ;;  %s4188_s3 = inlined_call_operand.vmem [shape: f32[32,32], index: 3, kind: input, shape index: {}]   ;;  %s4189_s4 = inlined_call_operand.vmem [shape: f32[32,32], index: 4, kind: input, shape index: {}]   ;;  %s4190_s5 = inlined_call_operand.vmem [shape: f32[32,16], index: 5, kind: input, shape index: {}]   ;;  %s4191_s6 = inlined_call_operand.vmem [shape: f32[16,32], index: 6, kind: input, shape index: {}]   ;;  %s4192_s7 = inlined_call_operand.hbm [shape: f32[3,128,128], index: 7, kind: input, shape index: {}]   ;;  %s4193_s8 = inlined_call_operand.hbm [shape: f32[3,1,128], index: 8, kind: input, shape index: {}]   ;;  %s4194_s9 = inlined_call_operand.hbm [shape: f32[2,22,128,128], index: 9, kind: input, shape index: {}]   ;;  %s4195_s10 = inlined_call_operand.hbm [shape: f32[2,22,1,128], index: 10, kind: input, shape index: {}]   ;;  %s4196_s11 = inlined_call_operand.vmem [shape: f32[32,128], index: 11, kind: output, shape index: {0}]   ;;  %s4197_s12 = inlined_call_operand.vmem [shape: f32[32,128], index: 12, kind: output, shape index: {1}]   ;;  %s4198_s13 = inlined_call_operand.vmem [shape: f32[16,128], index: 13, kind: output, shape index: {2}]  }
   0x1   :  { %4211 = sst [smem:[#allocation16_spill]] %s4188_s3 }
   0x2   :  { %4212 = sst [smem:[#allocation17_spill]] %s4189_s4 }
   0x3   :  { %4213 = sst [smem:[#allocation18_spill]] %s4190_s5 }
   0x4   :  { %4214 = sst [smem:[#allocation19_spill]] %s4191_s6 }
   0x5   :  { %4215 = sst [smem:[#allocation20_spill]] %s4192_s7 }
   0x6   :  { %4216 = sst [smem:[#allocation21_spill]] %s4193_s8 }
   0x7   :  { %4217 = sst [smem:[#allocation22_spill]] %s4194_s9 }
   0x8   :  { %4218 = sst [smem:[#allocation23_spill]] %s4196_s11 }
   0x9   :  { %4219 = sst [smem:[#allocation24_spill]] %s4197_s12 }
   0xa   :  { %4220 = sst [smem:[#allocation25_spill]] %s4198_s13 }
   0xb   :  { %19 = vsyncpa [#allocation6], 0 }
   0xc   :  { %20 = vsyncpa [#allocation8], 0  ;;  %s3189_s25 = smov 0   ;;  %s3191_s26 = smov 0  }
   0xd   :  { %s3193_s27 = smov 0   ;;  %s3195_s28 = smov 0  }
   0xe LB: > { %s3208_s29 = sadd.s32 4294967295, %s3109_s28   ;;  %p235_p0 = scmp.ne.s32.totalorder %s3101_s26, %s3097_s25  ;;  %s3109_s28 = sphi %s3195_s28, %s4242_s28   ;;  %s3105_s27 = sphi %s3193_s27, %s4246_s27   ;;  %s3101_s26 = sphi %s3191_s26, %s4245_s26   ;;  %s3097_s25 = sphi %s3189_s25, %s4244_s25  }
   0xf   : > { %p236_p1 = scmp.eq.s32.totalorder %s3208_s29, 0  ;;  %p2414_p2 = scmp.ge.s32.totalorder %s3109_s28, 1 }
  0x10   : > { %p335_p3 = scmp.lt.s32.totalorder %s3109_s28, 3  ;;  %p2415_p4 = scmp.ne.s32.totalorder %s3208_s29, 0 }
  0x11   : > { %p3217_p5 = por %p236_p1, %p235_p0  ;;  %s4222_s7 = sld [smem:[#allocation20_spill]] }
  0x12   : > { %p3224_p6 = pnand %p2414_p2, %p335_p3  ;;  %s3111_s18 = smov [#allocation5]  }
  0x13   : > { %s369_s19 = sshll.u32 %s3111_s18, 4  ;;  %s3237_s21 = sadd.s32 1, %s3109_s28   ;;  %s370_s19 = int_to_ptr.vmem [resolvable:$true] %s369_s19 }
  0x14   : > { %p2847_p7 = pneg %p3224_p6  ;;  %4225 = sst [smem:[#allocation14_spill]] %s3237_s21 }
  0x15   : > { %s4200_s22 = smov 128   ;;  %s4201_s23 = smov 8  }
  0x16   : > { %p3232_p8 = pnand %p2847_p7, %p236_p1  ;;  %s219_s24 = ssub.s32 %s3109_s28, %s3237_s21 }
  0x17   : > { %s367_s16 = sshll.u32 %s4222_s7, 4  ;;  %s222_s25 = sadd.s32 1, %s3105_s27  ;;  %s368_s16 = int_to_ptr.hbm [resolvable:$true] %s367_s16 }
  0x18   : > { %2850 = dma.hbm_to_vmem [thread:$0]  (!%p3232_p8), %s368_s16, 6144, %s370_s19, [#allocation6], %s4200_s22, %s4200_s22, %s4201_s23  }
  0x19   : > { %p220_p9 = scmp.eq.s32.totalorder %s219_s24, 0  ;;  %p229_p10 = scmp.ne.s32.totalorder %s3105_s27, %s3101_s26 }
  0x1a   : > { %p230_p11 = scmp.eq.s32.totalorder %s3109_s28, 0  ;;  %p2863_p12 = scmp.lt.s32.totalorder %s3109_s28, 2 }
  0x1b   : > { %s3252_s14 = scalar_select %p220_p9, %s3105_s27, %s222_s25  }
  0x1c   : > { %p231_p13 = por %p230_p11, %p229_p10  ;;  %s397_s15 = sand.u32 1, %s3109_s28  }
  0x1d   : > { %4226 = sst [smem:[#allocation15_spill]] %s3252_s14  ;;  %s4206_s18 = sand.u32 1, %s3105_s27  }
  0x1e   : > { %s2829_s7 = smul.u32 2816, %s4206_s18  ;;  %p3258_p0 = pnand %p2863_p12, %p231_p13 }
  0x1f   : > { %s2830_s16 = smul.u32 2816, %s3109_s28  ;;  %s4228_s8 = sld [smem:[#allocation21_spill]] }
  0x20   : > { %s4229_s9 = sld [smem:[#allocation22_spill]]  ;;  %s401_s14 = scalar_lea.vmem [#allocation9], %s2829_s7 }
  0x21   : > { %s409_s12 = sshll.u32 %s401_s14, 4  ;;  %s3269_s18 = scalar_lea.sflag [#allocation6], %s397_s15  ;;  %s410_s12 = int_to_ptr.vmem [resolvable:$true] %s409_s12 }
  0x22   : > { %p2981_p3 = pneg %p3258_p0 }
  0x25   : > { %s381_s24 = sshll.u32 %s4228_s8, 4  ;;  %s382_s24 = int_to_ptr.hbm [resolvable:$true] %s381_s24 }
  0x26   : > { %s406_s25 = scalar_lea.hbm %s4229_s9, %s2830_s16  ;;  %s2984_s7 = scalar_lea.hbm %s4229_s9, 5632 }
  0x27   : > { %s407_s11 = sshll.u32 %s406_s25, 4  ;;  %s408_s11 = int_to_ptr.hbm [resolvable:$true] %s407_s11 }
  0x28   : > { %s2977_s6 = sshra.s32 %s408_s11, 4  ;;  %s2978_s6 = int_to_ptr.hbm [resolvable:$true] %s2977_s6 }
  0x29   : > { %s2979_s4 = scalar_lea.hbm %s2978_s6, 2816  ;;  %p2985_p10 = scmp.lt.s32.totalorder %s2978_s6, %s4229_s9 }
  0x2a   : > { %p2980_p2 = scmp.ne.s32.totalorder %s2978_s6, %s2979_s4  ;;  %p2986_p11 = scmp.lt.s32.totalorder %s2984_s7, %s2979_s4 }
  0x2c   : > { %p2982_p7 = pnand %p2981_p3, %p2980_p2  ;;  %p2987_p12 = por %p2986_p11, %p2985_p10 }
  0x2e   : > { %p2983_p9 = pneg %p2982_p7 }
  0x30   : > { %p2988_p13 = pnand %p2987_p12, %p2983_p9 }
  0x32   : > { %2991 = shalt.err (!%p2988_p13)
}
  0x33   : > { %s4230_s15 = smov 8   ;;  %s4231_s16 = smov 128  }
  0x34   : > { %2857 = dma.hbm_to_vmem [thread:$0]  (!%p3258_p0), %s408_s11, 45056, %s410_s12, %s3269_s18, %s4231_s16, %s4231_s16, %s4230_s15  }
  0x35   : > { %s3114_s19 = smov [#allocation7]   ;;  %s4232_s21 = sand.u32 1, %s3105_s27  }
  0x36   : > { %s383_s25 = sshll.u32 %s3114_s19, 4  ;;  %s2831_s6 = smul.u32 22, %s4232_s21  ;;  %s384_s25 = int_to_ptr.vmem [resolvable:$true] %s383_s25 }
  0x37   : > { %s3115_s4 = smov 16   ;;  %s3116_s22 = smov 1  }
  0x38   : > { %2853 = dma.hbm_to_vmem [thread:$0]  (!%p3232_p8), %s382_s24, 48, %s384_s25, [#allocation8], %s3115_s4, %s3115_s4, %s3116_s22  }
  0x39   : > { %s2832_s7 = smul.u32 22, %s3109_s28  ;;  %s423_s23 = scalar_lea.vmem [#allocation10], %s2831_s6 }
  0x3a   : > { %s430_s14 = sshll.u32 %s423_s23, 4  ;;  %s3044_s28 = scalar_lea.hbm %s4195_s10, 44  ;;  %s431_s14 = int_to_ptr.vmem [resolvable:$true] %s430_s14 }
  0x3b   : > { %s427_s5 = scalar_lea.hbm %s4195_s10, %s2832_s7 }
  0x3c   : > { %s428_s3 = sshll.u32 %s427_s5, 4  ;;  %s429_s3 = int_to_ptr.hbm [resolvable:$true] %s428_s3 }
  0x3d   : > { %s3037_s11 = sshra.s32 %s429_s3, 4  ;;  %s3038_s11 = int_to_ptr.hbm [resolvable:$true] %s3037_s11 }
  0x3e   : > { %s3039_s12 = scalar_lea.hbm %s3038_s11, 22  ;;  %p3045_p8 = scmp.lt.s32.totalorder %s3038_s11, %s4195_s10 }
  0x3f   : > { %p3040_p2 = scmp.ne.s32.totalorder %s3038_s11, %s3039_s12  ;;  %p3046_p10 = scmp.lt.s32.totalorder %s3044_s28, %s3039_s12 }
  0x41   : > { %p3042_p7 = pnand %p3040_p2, %p2981_p3  ;;  %p3047_p11 = por %p3046_p10, %p3045_p8 }
  0x43   : > { %p3043_p9 = pneg %p3042_p7 }
  0x45   : > { %p3048_p12 = pnand %p3047_p11, %p3043_p9 }
  0x47   : > { %3051 = shalt.err (!%p3048_p12)
}
  0x48   : > { %2860 = dma.hbm_to_vmem [thread:$0]  (!%p3258_p0), %s429_s3, 352, %s431_s14, %s3269_s18, %s3115_s4, %s3115_s4, %s3116_s22  }
  0x49   : > { %442 = sbr.rel (%p3224_p6) target bundleno = 1735 (0x6c7), region = 64 }
  0x4e   : > { %3084 = dma.done.wait (%p236_p1), [#allocation6], 6144  }
  0x4f   : > { %3086 = vsyncadd (%p236_p1), [#allocation6], 4294961152 }
  0x50   : > { %3088 = dma.done.wait (%p236_p1), [#allocation8], 48  }
  0x51   : > { %3090 = vsyncadd (%p236_p1), [#allocation8], 4294967248  ;;  %s454_s5 = sand.u32 1, %s3208_s29   ;;  %s456_s3 = sand.u32 1, %s3101_s26  }
  0x52   : > { %s2833_s8 = smul.u32 2816, %s456_s3  ;;  %s455_s9 = scalar_lea.sflag [#allocation6], %s454_s5 }
  0x54   : > { %s3320_s13 = scalar_lea.vmem [#allocation9], %s2833_s8 }
  0x55   : > { %3092 = dma.done.wait (%p3217_p5), %s455_s9, 45408  }
  0x56   : > { %3094 = vsyncadd (%p3217_p5), %s455_s9, 4294921888  ;;  %s2834_s17 = smul.u32 22, %s456_s3  ;;  %v512_v0 = vlaneseq  ;;  %v3117_v3 = vmov 0.0  }
  0x58   : > { %v513_v1 = vand.u32 127, %v512_v0  ;;  %s3334_s18 = scalar_lea.vmem [#allocation10], %s2834_s17  ;;  %522 = sbr.rel (%p2415_p4) target bundleno = 280 (0x118), region = 84 }
  0x5a   : > { %vm514_vm0 = vcmp.ge.s32.totalorder %v513_v1, 120  ;;  %vm515_vm1 = vcmp.lt.s32.totalorder %v513_v1, 123 }
  0x5b   : > { %vm3326_vm2 = vmand %vm514_vm0, %vm515_vm1 }
  0x5c   : > { %v3332_v4 = vsel %vm3326_vm2, 1.0, %v3117_v3 }
  0x5d   : > { %v608_v5 = vld [vmem:[#allocation5 + $0xf8] sm:$0xff]  ;;  %v607_v7 = vld [vmem:[#allocation5 + $0xf0] sm:$0xff]  ;;  %v606_v9 = vld [vmem:[#allocation5 + $0xe8] sm:$0xff] }
  0x5e   : > { %v542_v6 = vld [vmem:[#allocation5 + $0x78] sm:$0xff]  ;;  %614 = vmatpush.msra.mxu1 %v608_v5  ;;  %v541_v8 = vld [vmem:[#allocation5 + $0x70] sm:$0xff]  ;;  %v540_v10 = vld [vmem:[#allocation5 + $0x68] sm:$0xff] }
  0x5f   : > { %2797 = vmatpush.msra.mxu3 %v542_v6  ;;  %547 = vmatpush.msra.mxu0 %v542_v6  ;;  %v673_v11 = vld [vmem:[#allocation5 + $0x178] sm:$0xff]  ;;  %v605_v12 = vld [vmem:[#allocation5 + $0xe0] sm:$0xff]  ;;  %v672_v14 = vld [vmem:[#allocation5 + $0x170] sm:$0xff] }
  0x60   : > { %615 = vmatpush.msra.mxu1 %v607_v7  ;;  %v539_v13 = vld [vmem:[#allocation5 + $0x60] sm:$0xff]  ;;  %679 = vmatpush.msra.mxu2 %v673_v11  ;;  %v671_v15 = vld [vmem:[#allocation5 + $0x168] sm:$0xff]  ;;  %v604_v16 = vld [vmem:[#allocation5 + $0xd8] sm:$0xff] }
  0x61   : > { %2798 = vmatpush.msra.mxu3 %v541_v8  ;;  %548 = vmatpush.msra.mxu0 %v541_v8  ;;  %v538_v17 = vld [vmem:[#allocation5 + $0x58] sm:$0xff]  ;;  %v670_v18 = vld [vmem:[#allocation5 + $0x160] sm:$0xff]  ;;  %v603_v19 = vld [vmem:[#allocation5 + $0xd0] sm:$0xff] }
  0x62   : > { %616 = vmatpush.msra.mxu1 %v606_v9  ;;  %680 = vmatpush.msra.mxu2 %v672_v14  ;;  %v537_v20 = vld [vmem:[#allocation5 + $0x50] sm:$0xff]  ;;  %v669_v21 = vld [vmem:[#allocation5 + $0x158] sm:$0xff]  ;;  %v602_v22 = vld [vmem:[#allocation5 + $0xc8] sm:$0xff] }
  0x63   : > { %2799 = vmatpush.msra.mxu3 %v540_v10  ;;  %549 = vmatpush.msra.mxu0 %v540_v10  ;;  %v536_v23 = vld [vmem:[#allocation5 + $0x48] sm:$0xff]  ;;  %v668_v24 = vld [vmem:[#allocation5 + $0x150] sm:$0xff]  ;;  %v601_v25 = vld [vmem:[#allocation5 + $0xc0] sm:$0xff] }
  0x64   : > { %617 = vmatpush.msra.mxu1 %v605_v12  ;;  %681 = vmatpush.msra.mxu2 %v671_v15  ;;  %v535_v26 = vld [vmem:[#allocation5 + $0x40] sm:$0xff]  ;;  %v667_v27 = vld [vmem:[#allocation5 + $0x148] sm:$0xff]  ;;  %v600_v28 = vld [vmem:[#allocation5 + $0xb8] sm:$0xff] }
  0x65   : > { %2800 = vmatpush.msra.mxu3 %v539_v13  ;;  %550 = vmatpush.msra.mxu0 %v539_v13  ;;  %v534_v29 = vld [vmem:[#allocation5 + $0x38] sm:$0xff]  ;;  %v666_v30 = vld [vmem:[#allocation5 + $0x140] sm:$0xff]  ;;  %v599_v31 = vld [vmem:[#allocation5 + $0xb0] sm:$0xff] }
  0x66   : > { %618 = vmatpush.msra.mxu1 %v604_v16  ;;  %682 = vmatpush.msra.mxu2 %v670_v18  ;;  %v533_v32 = vld [vmem:[#allocation5 + $0x30] sm:$0xff]  ;;  %v665_v33 = vld [vmem:[#allocation5 + $0x138] sm:$0xff]  ;;  %v598_v34 = vld [vmem:[#allocation5 + $0xa8] sm:$0xff] }
  0x67   : > { %2801 = vmatpush.msra.mxu3 %v538_v17  ;;  %551 = vmatpush.msra.mxu0 %v538_v17  ;;  %v532_v35 = vld [vmem:[#allocation5 + $0x28] sm:$0xff]  ;;  %v664_v36 = vld [vmem:[#allocation5 + $0x130] sm:$0xff]  ;;  %v597_v37 = vld [vmem:[#allocation5 + $0xa0] sm:$0xff] }
  0x68   : > { %619 = vmatpush.msra.mxu1 %v603_v19  ;;  %683 = vmatpush.msra.mxu2 %v669_v21  ;;  %v531_v38 = vld [vmem:[#allocation5 + $0x20] sm:$0xff]  ;;  %v663_v39 = vld [vmem:[#allocation5 + $0x128] sm:$0xff]  ;;  %v596_v40 = vld [vmem:[#allocation5 + $0x98] sm:$0xff] }
  0x69   : > { %2802 = vmatpush.msra.mxu3 %v537_v20  ;;  %552 = vmatpush.msra.mxu0 %v537_v20  ;;  %v530_v41 = vld [vmem:[#allocation5 + $0x18] sm:$0xff]  ;;  %v662_v42 = vld [vmem:[#allocation5 + $0x120] sm:$0xff]  ;;  %v595_v43 = vld [vmem:[#allocation5 + $0x90] sm:$0xff] }
  0x6a   : > { %620 = vmatpush.msra.mxu1 %v602_v22  ;;  %684 = vmatpush.msra.mxu2 %v668_v24  ;;  %v529_v44 = vld [vmem:[#allocation5 + $0x10] sm:$0xff]  ;;  %v661_v45 = vld [vmem:[#allocation5 + $0x118] sm:$0xff]  ;;  %v594_v46 = vld [vmem:[#allocation5 + $0x88] sm:$0xff] }
  0x6b   : > { %2803 = vmatpush.msra.mxu3 %v536_v23  ;;  %553 = vmatpush.msra.mxu0 %v536_v23  ;;  %v528_v47 = vld [vmem:[#allocation5 + $0x8] sm:$0xff]  ;;  %v660_v48 = vld [vmem:[#allocation5 + $0x110] sm:$0xff]  ;;  %v593_v49 = vld [vmem:[#allocation5 + $0x80] sm:$0xff] }
  0x6c   : > { %621 = vmatpush.msra.mxu1 %v601_v25  ;;  %685 = vmatpush.msra.mxu2 %v667_v27  ;;  %v527_v50 = vld [vmem:[#allocation5] sm:$0xff]  ;;  %v588_v51 = vld [vmem:[%s4186_s1] sm:$0xff]  ;;  %v524_v52 = vld [vmem:[%s4185_s0 + $0x8] sm:$0xff] }
  0x6d   : > { %2804 = vmatpush.msra.mxu3 %v535_v26  ;;  %554 = vmatpush.msra.mxu0 %v535_v26  ;;  %v659_v53 = vld [vmem:[#allocation5 + $0x108] sm:$0xff]  ;;  %v523_v54 = vld [vmem:[%s4185_s0] sm:$0xff]  ;;  %v658_v55 = vld [vmem:[#allocation5 + $0x100] sm:$0xff]  ;;  %v643_v0 = vmul.f32 %v3332_v4, %v588_v51  ;;  %v577_v10 = vmul.f32 %v3332_v4, %v524_v52 }
  0x6e   : > { %622 = vmatpush.msra.mxu1 %v600_v28  ;;  %686 = vmatpush.msra.mxu2 %v666_v30  ;;  %v655_v56 = vld [vmem:[%s4187_s2] sm:$0xff]  ;;  %v589_v57 = vld [vmem:[%s4186_s1 + $0x8] sm:$0xff]  ;;  %v525_v58 = vld [vmem:[%s4185_s0 + $0x10] sm:$0xff]  ;;  %v576_v3 = vmul.f32 %v3332_v4, %v523_v54 }
  0x6f   : > { %2805 = vmatpush.msra.mxu3 %v534_v29  ;;  %555 = vmatpush.msra.mxu0 %v534_v29  ;;  %v656_v59 = vld [vmem:[%s4187_s2 + $0x8] sm:$0xff]  ;;  %v590_v60 = vld [vmem:[%s4186_s1 + $0x10] sm:$0xff]  ;;  %v526_v61 = vld [vmem:[%s4185_s0 + $0x18] sm:$0xff]  ;;  %v644_v13 = vmul.f32 %v3332_v4, %v589_v57  ;;  %v702_v17 = vmul.f32 %v3332_v4, %v655_v56  ;;  %v578_v23 = vmul.f32 %v3332_v4, %v525_v58 }
  0x70   : > { %623 = vmatpush.msra.mxu1 %v599_v31  ;;  %687 = vmatpush.msra.mxu2 %v665_v33  ;;  %v591_v62 = vld [vmem:[%s4186_s1 + $0x18] sm:$0xff]  ;;  %v2906_v63 = vld [vmem:[#allocation7 + $0x1] ss:$0 sm:$0xff]  ;;  %v2907_v6 = vld [vmem:[#allocation7] ss:$0 sm:$0xff]  ;;  %v645_v26 = vmul.f32 %v3332_v4, %v590_v60  ;;  %v703_v29 = vmul.f32 %v3332_v4, %v656_v59 }
  0x71   : > { %2806 = vmatpush.msra.mxu3 %v533_v32  ;;  %556 = vmatpush.msra.mxu0 %v533_v32  ;;  %v2908_v15 = vld [vmem:[#allocation7 + $0x2] ss:$0 sm:$0xff] }
  0x72   : > { %624 = vmatpush.msra.mxu1 %v598_v34  ;;  %688 = vmatpush.msra.mxu2 %v664_v36 }
  0x73   : > { %2807 = vmatpush.msra.mxu3 %v532_v35  ;;  %557 = vmatpush.msra.mxu0 %v532_v35  ;;  %v579_v35 = vmul.f32 %v3332_v4, %v526_v61 }
  0x74   : > { %625 = vmatpush.msra.mxu1 %v597_v37  ;;  %689 = vmatpush.msra.mxu2 %v663_v39 }
  0x75   : > { %2808 = vmatpush.msra.mxu3 %v531_v38  ;;  %558 = vmatpush.msra.mxu0 %v531_v38  ;;  %v646_v38 = vmul.f32 %v3332_v4, %v591_v62 }
  0x76   : > { %626 = vmatpush.msra.mxu1 %v596_v40  ;;  %690 = vmatpush.msra.mxu2 %v662_v42 }
  0x77   : > { %2809 = vmatpush.msra.mxu3 %v530_v41  ;;  %559 = vmatpush.msra.mxu0 %v530_v41 }
  0x78   : > { %627 = vmatpush.msra.mxu1 %v595_v43  ;;  %691 = vmatpush.msra.mxu2 %v661_v45 }
  0x79   : > { %2810 = vmatpush.msra.mxu3 %v529_v44  ;;  %560 = vmatpush.msra.mxu0 %v529_v44 }
  0x7a   : > { %628 = vmatpush.msra.mxu1 %v594_v46  ;;  %692 = vmatpush.msra.mxu2 %v660_v48 }
  0x7b   : > { %2811 = vmatpush.msra.mxu3 %v528_v47  ;;  %561 = vmatpush.msra.mxu0 %v528_v47 }
  0x7c   : > { %629 = vmatpush.msra.mxu1 %v593_v49  ;;  %693 = vmatpush.msra.mxu2 %v659_v53 }
  0x7d   : > { %2812 = vmatpush.msra.mxu3 %v527_v50  ;;  %630 = vmatmul.f32.vlgmr.msra.gmra.mxu1 %v588_v51 }
  0x7e   : > { %566 = vmatmul.f32.vlgmr.msra.gmra.mxu3 %v524_v52  ;;  %562 = vmatpush.msra.mxu0 %v527_v50 }
  0x7f   : > { %563 = vmatmul.f32.vlgmr.msra.gmra.mxu0 %v523_v54  ;;  %694 = vmatpush.msra.mxu2 %v658_v55 }
  0x80   : > { %695 = vmatmul.f32.vlgmr.msra.gmra.mxu2 %v655_v56 }
  0x85   : > { %633 = vmatmul.f32.gmra.mxu1 %v589_v57 }
  0x86   : > { %569 = vmatmul.f32.gmra.mxu3 %v525_v58 }
  0x88   : > { %698 = vmatmul.f32.gmra.mxu2 %v656_v59 }
  0x8d   : > { %636 = vmatmul.f32.gmra.mxu1 %v590_v60 }
  0x8e   : > { %572 = vmatmul.f32.gmra.mxu3 %v526_v61 }
  0x95   : > { %639 = vmatmul.f32.gmra.mxu1 %v591_v62 }
  0xfa   : > { %v631_v1 = vpop.f32.mrf.mxu1 }
  0xfb   : > { %v632_v5 = vadd.f32 %v2906_v63, %v631_v1 }
  0xfc   : > { %v564_v7 = vpop.f32.mrf.mxu0 }
  0xfd   : > { %v647_v8 = vadd.f32 %v643_v0, %v632_v5  ;;  %v565_v9 = vadd.f32 %v2907_v6, %v564_v7 }
  0xff   : > { %651 = vst [vmem:[#allocation3] sm:$0xff] %v647_v8  ;;  %v580_v11 = vadd.f32 %v576_v3, %v565_v9 }
 0x101   : > { %v567_v12 = vpop.f32.mrf.mxu3  ;;  %584 = vst [vmem:[#allocation2 + $0x10] sm:$0xff] %v580_v11 }
 0x102   : > { %v568_v14 = vadd.f32 %v2907_v6, %v567_v12  ;;  %v634_v16 = vpop.f32.mrf.mxu1 }
 0x103   : > { %v635_v19 = vadd.f32 %v2906_v63, %v634_v16  ;;  %v696_v20 = vpop.f32.mrf.mxu2 }
 0x104   : > { %v581_v18 = vadd.f32 %v577_v10, %v568_v14  ;;  %v697_v22 = vadd.f32 %v2908_v15, %v696_v20 }
 0x105   : > { %v648_v21 = vadd.f32 %v644_v13, %v635_v19 }
 0x106   : > { %585 = vst [vmem:[#allocation2] sm:$0xff] %v581_v18  ;;  %v704_v24 = vadd.f32 %v702_v17, %v697_v22 }
 0x107   : > { %652 = vst [vmem:[#allocation3 + $0x18] sm:$0xff] %v648_v21 }
 0x108   : > { %706 = vst [vmem:[#allocation4] sm:$0xff] %v704_v24 }
 0x109   : > { %v570_v25 = vpop.f32.mrf.mxu3 }
 0x10a   : > { %v571_v27 = vadd.f32 %v2907_v6, %v570_v25  ;;  %v637_v28 = vpop.f32.mrf.mxu1 }
 0x10b   : > { %v638_v31 = vadd.f32 %v2906_v63, %v637_v28  ;;  %v699_v32 = vpop.f32.mrf.mxu2 }
 0x10c   : > { %v582_v30 = vadd.f32 %v578_v23, %v571_v27  ;;  %v700_v34 = vadd.f32 %v2908_v15, %v699_v32 }
 0x10d   : > { %v649_v33 = vadd.f32 %v645_v26, %v638_v31 }
 0x10e   : > { %586 = vst [vmem:[#allocation2 + $0x18] sm:$0xff] %v582_v30  ;;  %v705_v36 = vadd.f32 %v703_v29, %v700_v34 }
 0x10f   : > { %653 = vst [vmem:[#allocation3 + $0x8] sm:$0xff] %v649_v33 }
 0x110   : > { %707 = vst [vmem:[#allocation4 + $0x8] sm:$0xff] %v705_v36 }
 0x111   : > { %v573_v37 = vpop.f32.mrf.mxu3 }
 0x112   : > { %v574_v39 = vadd.f32 %v2907_v6, %v573_v37  ;;  %v640_v40 = vpop.f32.mrf.mxu1 }
 0x113   : > { %v641_v42 = vadd.f32 %v2906_v63, %v640_v40 }
 0x114   : > { %v583_v41 = vadd.f32 %v579_v35, %v574_v39 }
 0x115   : > { %v650_v43 = vadd.f32 %v646_v38, %v641_v42 }
 0x116   : > { %587 = vst [vmem:[#allocation2 + $0x8] sm:$0xff] %v583_v41 }
 0x117   : > { %654 = vst [vmem:[#allocation3 + $0x10] sm:$0xff] %v650_v43 }
 0x118 PF: > { %v3380_v45 = vld [vmem:[#allocation3 + $0x8] sm:$0xff]  ;;  %v3383_v46 = vld [vmem:[#allocation3 + $0x18] sm:$0xff]  ;;  %v3389_v50 = vld [vmem:[#allocation3] sm:$0xff]  ;;  %s4235_s17 = sld [smem:[#allocation16_spill]]  ;;  %vm796_vm3 = vcmask 261120   ;;  %vm1245_vm4 = vcmask 130048  }
 0x119   : > { %v733_v47 = vld [vmem:[%s3320_s13 + $0x78] sm:$0xff]  ;;  %v732_v48 = vld [vmem:[%s3320_s13 + $0x70] sm:$0xff]  ;;  %v731_v51 = vld [vmem:[%s3320_s13 + $0x68] sm:$0xff]  ;;  %s4236_s7 = sld [smem:[#allocation18_spill]] }
 0x11a   : > { %887 = vmatpush.msra.mxu2 %v733_v47  ;;  %v2439_v49 = vld [vmem:[%s3320_s13 + $0xf8] sm:$0xff]  ;;  %v2438_v52 = vld [vmem:[%s3320_s13 + $0xf0] sm:$0xff]  ;;  %v2437_v54 = vld [vmem:[%s3320_s13 + $0xe8] sm:$0xff]  ;;  %s4237_s16 = sld [smem:[#allocation17_spill]] }
 0x11b   : > { %858 = vmatpush.msra.mxu1 %v2439_v49  ;;  %v730_v55 = vld [vmem:[%s3320_s13 + $0x60] sm:$0xff]  ;;  %v729_v57 = vld [vmem:[%s3320_s13 + $0x58] sm:$0xff]  ;;  %v728_v59 = vld [vmem:[%s3320_s13 + $0x50] sm:$0xff]  ;;  %s4238_s21 = sld [smem:[#allocation19_spill]] }
 0x11c   : > { %888 = vmatpush.msra.mxu2 %v732_v48  ;;  %v2436_v56 = vld [vmem:[%s3320_s13 + $0xe0] sm:$0xff]  ;;  %v2435_v58 = vld [vmem:[%s3320_s13 + $0xd8] sm:$0xff]  ;;  %v2434_v61 = vld [vmem:[%s3320_s13 + $0xd0] sm:$0xff]  ;;  %s4239_s14 = sld [smem:[#allocation23_spill]] }
 0x11d   : > { %859 = vmatpush.msra.mxu1 %v2438_v52  ;;  %v727_v62 = vld [vmem:[%s3320_s13 + $0x48] sm:$0xff]  ;;  %v726_v63 = vld [vmem:[%s3320_s13 + $0x40] sm:$0xff]  ;;  %v725_v3 = vld [vmem:[%s3320_s13 + $0x38] sm:$0xff]  ;;  %s4240_s8 = sld [smem:[#allocation24_spill]] }
 0x11e   : > { %v3378_v44 = vld [vmem:[#allocation3 + $0x10] sm:$0xff]  ;;  %v792_v53 = vld [vmem:[%s4235_s17] sm:$0xff]  ;;  %889 = vmatpush.msra.mxu2 %v731_v51  ;;  %v793_v60 = vld [vmem:[%s4235_s17 + $0x8] sm:$0xff]  ;;  %s4241_s22 = sld [smem:[#allocation25_spill]] }
 0x11f   : > { %821 = vmatpush.msra.mxu0 %v3378_v44  ;;  %860 = vmatpush.msra.mxu1 %v2437_v54  ;;  %v2433_v0 = vld [vmem:[%s3320_s13 + $0xc8] sm:$0xff]  ;;  %v2432_v1 = vld [vmem:[%s3320_s13 + $0xc0] sm:$0xff]  ;;  %v2431_v5 = vld [vmem:[%s3320_s13 + $0xb8] sm:$0xff] }
 0x120   : > { %890 = vmatpush.msra.mxu2 %v730_v55  ;;  %v724_v6 = vld [vmem:[%s3320_s13 + $0x30] sm:$0xff]  ;;  %v723_v8 = vld [vmem:[%s3320_s13 + $0x28] sm:$0xff]  ;;  %v794_v9 = vld [vmem:[%s4235_s17 + $0x10] sm:$0xff] }
 0x121   : > { %822 = vmatpush.msra.mxu0 %v3380_v45  ;;  %861 = vmatpush.msra.mxu1 %v2436_v56  ;;  %v2430_v7 = vld [vmem:[%s3320_s13 + $0xb0] sm:$0xff]  ;;  %v2429_v10 = vld [vmem:[%s3320_s13 + $0xa8] sm:$0xff]  ;;  %v722_v11 = vld [vmem:[%s3320_s13 + $0x20] sm:$0xff] }
 0x122   : > { %891 = vmatpush.msra.mxu2 %v729_v57  ;;  %v2428_v12 = vld [vmem:[%s3320_s13 + $0xa0] sm:$0xff]  ;;  %v721_v13 = vld [vmem:[%s3320_s13 + $0x18] sm:$0xff]  ;;  %v720_v15 = vld [vmem:[%s3320_s13 + $0x10] sm:$0xff] }
 0x123   : > { %823 = vmatpush.msra.mxu0 %v3383_v46  ;;  %862 = vmatpush.msra.mxu1 %v2435_v58  ;;  %v2427_v14 = vld [vmem:[%s3320_s13 + $0x98] sm:$0xff]  ;;  %v2426_v16 = vld [vmem:[%s3320_s13 + $0x90] sm:$0xff]  ;;  %v719_v17 = vld [vmem:[%s3320_s13 + $0x8] sm:$0xff] }
 0x124   : > { %892 = vmatpush.msra.mxu2 %v728_v59  ;;  %v795_v18 = vld [vmem:[%s4235_s17 + $0x18] sm:$0xff]  ;;  %v3436_v21 = vld [vmem:[#allocation2 + $0x10] sm:$0xff]  ;;  %v3441_v23 = vld [vmem:[#allocation2] sm:$0xff] }
 0x125   : > { %824 = vmatpush.msra.mxu0 %v3389_v50  ;;  %863 = vmatpush.msra.mxu1 %v2434_v61  ;;  %v2425_v19 = vld [vmem:[%s3320_s13 + $0x88] sm:$0xff]  ;;  %v718_v20 = vld [vmem:[%s3320_s13] sm:$0xff]  ;;  %v3447_v25 = vld [vmem:[#allocation2 + $0x8] sm:$0xff] }
 0x126   : > { %2475 = vmatmul.msk.f32.vlgmr.msra.gmra.mxu0 %vm796_vm3, %v792_v53  ;;  %893 = vmatpush.msra.mxu2 %v727_v62  ;;  %v2424_v22 = vld [vmem:[%s3320_s13 + $0x80] sm:$0xff]  ;;  %v2455_v26 = vld [vmem:[%s3320_s13 + $0x178] sm:$0xff]  ;;  %v2454_v27 = vld [vmem:[%s3320_s13 + $0x170] sm:$0xff] }
 0x127   : > { %864 = vmatpush.msra.mxu1 %v2433_v0  ;;  %v3444_v24 = vld [vmem:[#allocation2 + $0x18] sm:$0xff]  ;;  %941 = vmatpush.msra.mxu3 %v2455_v26  ;;  %v2451_v34 = vld [vmem:[%s3320_s13 + $0x158] sm:$0xff]  ;;  %v2450_v35 = vld [vmem:[%s3320_s13 + $0x150] sm:$0xff] }
 0x128   : > { %894 = vmatpush.msra.mxu2 %v726_v63  ;;  %v2453_v30 = vld [vmem:[%s3320_s13 + $0x168] sm:$0xff]  ;;  %v2452_v32 = vld [vmem:[%s3320_s13 + $0x160] sm:$0xff]  ;;  %v2447_v42 = vld [vmem:[%s3320_s13 + $0x138] sm:$0xff] }
 0x129   : > { %865 = vmatpush.msra.mxu1 %v2432_v1  ;;  %942 = vmatpush.msra.mxu3 %v2454_v27  ;;  %v2449_v38 = vld [vmem:[%s3320_s13 + $0x148] sm:$0xff]  ;;  %v2448_v40 = vld [vmem:[%s3320_s13 + $0x140] sm:$0xff]  ;;  %v2446_v43 = vld [vmem:[%s3320_s13 + $0x130] sm:$0xff] }
 0x12a   : > { %895 = vmatpush.msra.mxu2 %v725_v3  ;;  %v2445_v56 = vld [vmem:[%s3320_s13 + $0x128] sm:$0xff]  ;;  %v2444_v57 = vld [vmem:[%s3320_s13 + $0x120] sm:$0xff]  ;;  %v2443_v58 = vld [vmem:[%s3320_s13 + $0x118] sm:$0xff] }
 0x12b   : > { %866 = vmatpush.msra.mxu1 %v2431_v5  ;;  %943 = vmatpush.msra.mxu3 %v2453_v30  ;;  %v2442_v59 = vld [vmem:[%s3320_s13 + $0x110] sm:$0xff]  ;;  %v2440_v61 = vld [vmem:[%s3320_s13 + $0x100] sm:$0xff] }
 0x12c   : > { %896 = vmatpush.msra.mxu2 %v724_v6  ;;  %v717_v62 = vld [vmem:[#allocation4 + $0x8] sm:$0xff]  ;;  %v716_v0 = vld [vmem:[#allocation4] sm:$0xff] }
 0x12d   : > { %867 = vmatpush.msra.mxu1 %v2430_v7  ;;  %944 = vmatpush.msra.mxu3 %v2452_v32  ;;  %v2912_v3 = vld [vmem:[%s3334_s18] ss:$0 sm:$0xff] }
 0x12e   : > { %2476 = vmatmul.msk.f32.gmra.mxu0 %vm796_vm3, %v793_v60  ;;  %897 = vmatpush.msra.mxu2 %v723_v8  ;;  %v2441_v60 = vld [vmem:[%s3320_s13 + $0x108] sm:$0xff]  ;;  %v2913_v8 = vld [vmem:[%s3334_s18 + $0x1] ss:$0 sm:$0xff] }
 0x12f   : > { %868 = vmatpush.msra.mxu1 %v2429_v10  ;;  %945 = vmatpush.msra.mxu3 %v2451_v34 }
 0x130   : > { %898 = vmatpush.msra.mxu2 %v722_v11 }
 0x131   : > { %869 = vmatpush.msra.mxu1 %v2428_v12  ;;  %946 = vmatpush.msra.mxu3 %v2450_v35 }
 0x132   : > { %899 = vmatpush.msra.mxu2 %v721_v13 }
 0x133   : > { %870 = vmatpush.msra.mxu1 %v2427_v14  ;;  %947 = vmatpush.msra.mxu3 %v2449_v38 }
 0x134   : > { %900 = vmatpush.msra.mxu2 %v720_v15 }
 0x135   : > { %871 = vmatpush.msra.mxu1 %v2426_v16  ;;  %948 = vmatpush.msra.mxu3 %v2448_v40 }
 0x136   : > { %2477 = vmatmul.msk.f32.gmra.mxu0 %vm796_vm3, %v794_v9  ;;  %901 = vmatpush.msra.mxu2 %v719_v17 }
 0x137   : > { %872 = vmatpush.msra.mxu1 %v2425_v19  ;;  %949 = vmatpush.msra.mxu3 %v2447_v42  ;;  %v1241_v42 = vld [vmem:[%s4236_s7] sm:$0xff] }
 0x138   : > { %902 = vmatpush.msra.mxu2 %v718_v20 }
 0x139   : > { %903 = vmatmul.f32.vlgmr.msra.gmra.mxu2 %v3436_v21  ;;  %873 = vmatpush.msra.mxu1 %v2424_v22 }
 0x13a   : > { %950 = vmatpush.msra.mxu3 %v2446_v43  ;;  %v1242_v43 = vld [vmem:[%s4236_s7 + $0x8] sm:$0xff] }
 0x13c   : > { %951 = vmatpush.msra.mxu3 %v2445_v56  ;;  %v2492_v56 = vld [vmem:[%s3320_s13 + $0x268] sm:$0xff] }
 0x13e   : > { %2478 = vmatmul.msk.f32.gmra.mxu0 %vm796_vm3, %v795_v18  ;;  %952 = vmatpush.msra.mxu3 %v2444_v57  ;;  %v2469_v57 = vld [vmem:[%s3320_s13 + $0x1e8] sm:$0xff] }
 0x140   : > { %953 = vmatpush.msra.mxu3 %v2443_v58  ;;  %v2491_v58 = vld [vmem:[%s3320_s13 + $0x260] sm:$0xff] }
 0x141   : > { %906 = vmatmul.f32.gmra.mxu2 %v3441_v23 }
 0x142   : > { %954 = vmatpush.msra.mxu3 %v2442_v59  ;;  %v2468_v59 = vld [vmem:[%s3320_s13 + $0x1e0] sm:$0xff] }
 0x144   : > { %955 = vmatpush.msra.mxu3 %v2441_v60  ;;  %v1542_v60 = vld [vmem:[%s4237_s16] sm:$0xff] }
 0x146   : > { %956 = vmatpush.msra.mxu3 %v2440_v61  ;;  %v2490_v61 = vld [vmem:[%s3320_s13 + $0x258] sm:$0xff] }
 0x148   : > { %1272 = vmatpush.msrb.mxu3 %v717_v62  ;;  %v2467_v62 = vld [vmem:[%s3320_s13 + $0x1d8] sm:$0xff] }
 0x149   : > { %909 = vmatmul.f32.gmra.mxu2 %v3444_v24 }
 0x14a   : > { %1273 = vmatpush.msrb.mxu3 %v716_v0  ;;  %v2466_v0 = vld [vmem:[%s3320_s13 + $0x1d0] sm:$0xff] }
 0x151   : > { %912 = vmatmul.f32.gmra.mxu2 %v3447_v25 }
 0x1a3   : > { %v826_v28 = vpop.f32.mrf.mxu0 }
 0x1a4   : > { %v838_v29 = vsub.f32 %v3436_v21, %v826_v28  ;;  %874 = vmatmul.f32.vlgmr.msra.gmra.mxu1 %v826_v28 }
 0x1a6   : > { %v3455_v31 = vmul.f32 %v3332_v4, %v838_v29 }
 0x1a8   : > { %v846_v33 = vmul.f32 %v3455_v31, %v3455_v31 }
 0x1aa   : > { %850 = vadd.xlane.f32.xlu0 %v846_v33 }
 0x1ab   : > { %v829_v36 = vpop.f32.mrf.mxu0 }
 0x1ac   : > { %v839_v37 = vsub.f32 %v3441_v23, %v829_v36  ;;  %877 = vmatmul.f32.gmra.mxu1 %v829_v36 }
 0x1ae   : > { %v3465_v39 = vmul.f32 %v3332_v4, %v839_v37 }
 0x1b0   : > { %v847_v41 = vmul.f32 %v3465_v39, %v3465_v39 }
 0x1b2   : > { %852 = vadd.xlane.f32.xlu0 %v847_v41 }
 0x1b3   : > { %v832_v47 = vpop.f32.mrf.mxu0 }
 0x1b4   : > { %v840_v48 = vsub.f32 %v3444_v24, %v832_v47  ;;  %880 = vmatmul.f32.gmra.mxu1 %v832_v47  ;;  %v1243_v47 = vld [vmem:[%s4236_s7 + $0x10] sm:$0xff] }
 0x1b6   : > { %v3474_v49 = vmul.f32 %v3332_v4, %v840_v48  ;;  %v1244_v48 = vld [vmem:[%s4236_s7 + $0x18] sm:$0xff] }
 0x1b8   : > { %v848_v51 = vmul.f32 %v3474_v49, %v3474_v49 }
 0x1ba   : > { %854 = vadd.xlane.f32.xlu1 %v848_v51  ;;  %v2494_v51 = vld [vmem:[%s3320_s13 + $0x278] sm:$0xff] }
 0x1bb   : > { %v835_v52 = vpop.f32.mrf.mxu0  ;;  %1055 = vmatpush.msrb.mxu0 %v2494_v51  ;;  %v2536_v51 = vld [vmem:[%s3320_s13 + $0x3b8] sm:$0xff] }
 0x1bc   : > { %v841_v53 = vsub.f32 %v3447_v25, %v835_v52  ;;  %883 = vmatmul.f32.gmra.mxu1 %v835_v52  ;;  %v904_v63 = vpop.f32.mrf.mxu2  ;;  %v2471_v52 = vld [vmem:[%s3320_s13 + $0x1f8] sm:$0xff] }
 0x1bd   : > { %1084 = vmatpush.msrb.mxu1 %v2471_v52  ;;  %v2520_v52 = vld [vmem:[%s3320_s13 + $0x338] sm:$0xff] }
 0x1be   : > { %v3480_v54 = vmul.f32 %v3332_v4, %v841_v53  ;;  %v2493_v53 = vld [vmem:[%s3320_s13 + $0x270] sm:$0xff] }
 0x1bf   : > { %1056 = vmatpush.msrb.mxu0 %v2493_v53  ;;  %v2535_v53 = vld [vmem:[%s3320_s13 + $0x3b0] sm:$0xff] }
 0x1c0   : > { %v849_v55 = vmul.f32 %v3480_v54, %v3480_v54 }
 0x1c1   : > { %1057 = vmatpush.msrb.mxu0 %v2492_v56  ;;  %v2534_v56 = vld [vmem:[%s3320_s13 + $0x3a8] sm:$0xff] }
 0x1c2   : > { %856 = vadd.xlane.f32.xlu1 %v849_v55  ;;  %v2470_v55 = vld [vmem:[%s3320_s13 + $0x1f0] sm:$0xff] }
 0x1c3   : > { %1085 = vmatpush.msrb.mxu1 %v2470_v55  ;;  %1058 = vmatpush.msrb.mxu0 %v2491_v58  ;;  %v2519_v55 = vld [vmem:[%s3320_s13 + $0x330] sm:$0xff]  ;;  %v2533_v58 = vld [vmem:[%s3320_s13 + $0x3a0] sm:$0xff] }
 0x1c4   : > { %v907_v9 = vpop.f32.mrf.mxu2 }
 0x1c5   : > { %1086 = vmatpush.msrb.mxu1 %v2469_v57  ;;  %1059 = vmatpush.msrb.mxu0 %v2490_v61  ;;  %v2518_v57 = vld [vmem:[%s3320_s13 + $0x328] sm:$0xff]  ;;  %v2516_v61 = vld [vmem:[%s3320_s13 + $0x318] sm:$0xff] }
 0x1c7   : > { %1087 = vmatpush.msrb.mxu1 %v2468_v59  ;;  %v2517_v59 = vld [vmem:[%s3320_s13 + $0x320] sm:$0xff] }
 0x1c9   : > { %1088 = vmatpush.msrb.mxu1 %v2467_v62  ;;  %v2531_v62 = vld [vmem:[%s3320_s13 + $0x390] sm:$0xff] }
 0x1cb   : > { %1089 = vmatpush.msrb.mxu1 %v2466_v0 }
 0x1cc   : > { %v910_v19 = vpop.f32.mrf.mxu2 }
 0x1d4   : > { %v913_v33 = vpop.f32.mrf.mxu2 }
 0x21d   : > { %v851_v1 = vpop.xlane.xlu0 %850 }
 0x21e   : > { %v919_v6 = vmul.f32 %v2912_v3, %v851_v1  ;;  %v2488_v1 = vld [vmem:[%s3320_s13 + $0x248] sm:$0xff] }
 0x221   : > { %v875_v5 = vpop.f32.mrf.mxu1 }
 0x222   : > { %v905_v7 = vadd.f32 %v904_v63, %v875_v5  ;;  %v2489_v63 = vld [vmem:[%s3320_s13 + $0x250] sm:$0xff]  ;;  %v2487_v5 = vld [vmem:[%s3320_s13 + $0x240] sm:$0xff] }
 0x223   : > { %1060 = vmatpush.msrb.mxu0 %v2489_v63  ;;  %v2515_v63 = vld [vmem:[%s3320_s13 + $0x310] sm:$0xff] }
 0x224   : > { %v923_v10 = vadd.f32 %v919_v6, %v905_v7  ;;  %v2464_v6 = vld [vmem:[%s3320_s13 + $0x1c0] sm:$0xff]  ;;  %v1543_v7 = vld [vmem:[%s4237_s16 + $0x8] sm:$0xff] }
 0x225   : > { %v853_v12 = vpop.xlane.xlu0 %852  ;;  %1061 = vmatpush.msrb.mxu0 %v2488_v1 }
 0x226   : > { %v930_v11 = vadd.f32 %v2913_v8, %v923_v10  ;;  %v920_v15 = vmul.f32 %v2912_v3, %v853_v12  ;;  %v2485_v10 = vld [vmem:[%s3320_s13 + $0x230] sm:$0xff]  ;;  %v2484_v12 = vld [vmem:[%s3320_s13 + $0x228] sm:$0xff] }
 0x227   : > { %1062 = vmatpush.msrb.mxu0 %v2487_v5  ;;  %v2514_v5 = vld [vmem:[%s3320_s13 + $0x308] sm:$0xff] }
 0x228   : > { %v934_v13 = vmax.f32 %v930_v11, 0.0  ;;  %v2462_v11 = vld [vmem:[%s3320_s13 + $0x1b0] sm:$0xff] }
 0x229   : > { %v878_v14 = vpop.f32.mrf.mxu1 }
 0x22a   : > { %v908_v16 = vadd.f32 %v907_v9, %v878_v14  ;;  %957 = vmatmul.f32.vlgmr.msra.gmra.mxu3 %v934_v13  ;;  %v2463_v9 = vld [vmem:[%s3320_s13 + $0x1b8] sm:$0xff]  ;;  %v2461_v13 = vld [vmem:[%s3320_s13 + $0x1a8] sm:$0xff]  ;;  %v2483_v14 = vld [vmem:[%s3320_s13 + $0x220] sm:$0xff] }
 0x22b   : > { %1570 = vmatpush.msra.mxu3 %v3447_v25 }
 0x22c   : > { %v924_v17 = vadd.f32 %v920_v15, %v908_v16  ;;  %v2460_v15 = vld [vmem:[%s3320_s13 + $0x1a0] sm:$0xff] }
 0x22d   : > { %v855_v18 = vpop.xlane.xlu1 %854  ;;  %1571 = vmatpush.msra.mxu3 %v3444_v24  ;;  %v1544_v16 = vld [vmem:[%s4237_s16 + $0x10] sm:$0xff] }
 0x22e   : > { %v931_v20 = vadd.f32 %v2913_v8, %v924_v17  ;;  %v921_v27 = vmul.f32 %v2912_v3, %v855_v18  ;;  %v2482_v17 = vld [vmem:[%s3320_s13 + $0x218] sm:$0xff] }
 0x22f   : > { %1572 = vmatpush.msra.mxu3 %v3441_v23  ;;  %v2459_v18 = vld [vmem:[%s3320_s13 + $0x198] sm:$0xff] }
 0x230   : > { %v935_v22 = vmax.f32 %v931_v20, 0.0  ;;  %v2458_v20 = vld [vmem:[%s3320_s13 + $0x190] sm:$0xff] }
 0x231   : > { %v881_v26 = vpop.f32.mrf.mxu1  ;;  %1573 = vmatpush.msra.mxu3 %v3436_v21 }
 0x232   : > { %v911_v28 = vadd.f32 %v910_v19, %v881_v26  ;;  %960 = vmatmul.f32.gmra.mxu3 %v935_v22  ;;  %v2481_v19 = vld [vmem:[%s3320_s13 + $0x210] sm:$0xff]  ;;  %v1545_v22 = vld [vmem:[%s4237_s16 + $0x18] sm:$0xff] }
 0x233   : > { %v2480_v26 = vld [vmem:[%s3320_s13 + $0x208] sm:$0xff] }
 0x234   : > { %v925_v29 = vadd.f32 %v921_v27, %v911_v28  ;;  %v2457_v27 = vld [vmem:[%s3320_s13 + $0x188] sm:$0xff]  ;;  %v2479_v28 = vld [vmem:[%s3320_s13 + $0x200] sm:$0xff] }
 0x235   : > { %v857_v32 = vpop.xlane.xlu1 %856 }
 0x236   : > { %v932_v30 = vadd.f32 %v2913_v8, %v925_v29  ;;  %v922_v36 = vmul.f32 %v2912_v3, %v857_v32  ;;  %v2465_v3 = vld [vmem:[%s3320_s13 + $0x1c8] sm:$0xff]  ;;  %v2456_v29 = vld [vmem:[%s3320_s13 + $0x180] sm:$0xff]  ;;  %v2528_v32 = vld [vmem:[%s3320_s13 + $0x378] sm:$0xff] }
 0x237   : > { %1090 = vmatpush.msrb.mxu1 %v2465_v3  ;;  %v2530_v3 = vld [vmem:[%s3320_s13 + $0x388] sm:$0xff] }
 0x238   : > { %v936_v34 = vmax.f32 %v932_v30, 0.0  ;;  %v2544_v30 = vld [vmem:[%s3320_s13 + $0x3f8] sm:$0xff] }
 0x239   : > { %v884_v35 = vpop.f32.mrf.mxu1  ;;  %1091 = vmatpush.msrb.mxu1 %v2464_v6  ;;  %v2513_v6 = vld [vmem:[%s3320_s13 + $0x300] sm:$0xff] }
 0x23a   : > { %v914_v37 = vadd.f32 %v913_v33, %v884_v35  ;;  %963 = vmatmul.f32.gmra.mxu3 %v936_v34  ;;  %v2543_v33 = vld [vmem:[%s3320_s13 + $0x3f0] sm:$0xff]  ;;  %v2542_v35 = vld [vmem:[%s3320_s13 + $0x3e8] sm:$0xff] }
 0x23b   : > { %1092 = vmatpush.msrb.mxu1 %v2463_v9  ;;  %v2527_v34 = vld [vmem:[%s3320_s13 + $0x370] sm:$0xff]  ;;  %v2600_v9 = vld [vmem:[%s3320_s13 + $0x578] sm:$0xff] }
 0x23c   : > { %v926_v38 = vadd.f32 %v922_v36, %v914_v37  ;;  %v2526_v36 = vld [vmem:[%s3320_s13 + $0x368] sm:$0xff]  ;;  %v2541_v37 = vld [vmem:[%s3320_s13 + $0x3e0] sm:$0xff] }
 0x23d   : > { %1093 = vmatpush.msrb.mxu1 %v2462_v11  ;;  %v2599_v11 = vld [vmem:[%s3320_s13 + $0x570] sm:$0xff] }
 0x23e   : > { %v933_v40 = vadd.f32 %v2913_v8, %v926_v38  ;;  %v2486_v8 = vld [vmem:[%s3320_s13 + $0x238] sm:$0xff] }
 0x23f   : > { %1063 = vmatpush.msrb.mxu0 %v2486_v8  ;;  %1094 = vmatpush.msrb.mxu1 %v2461_v13  ;;  %v2540_v38 = vld [vmem:[%s3320_s13 + $0x3d8] sm:$0xff] }
 0x240   : > { %v937_v41 = vmax.f32 %v933_v40, 0.0  ;;  %v2524_v40 = vld [vmem:[%s3320_s13 + $0x358] sm:$0xff] }
 0x241   : > { %1064 = vmatpush.msrb.mxu0 %v2485_v10  ;;  %1095 = vmatpush.msrb.mxu1 %v2460_v15  ;;  %v2616_v8 = vld [vmem:[%s3320_s13 + $0x5f8] sm:$0xff]  ;;  %v2615_v10 = vld [vmem:[%s3320_s13 + $0x5f0] sm:$0xff]  ;;  %v2598_v15 = vld [vmem:[%s3320_s13 + $0x568] sm:$0xff] }
 0x242   : > { %966 = vmatmul.f32.gmra.mxu3 %v937_v41  ;;  %v2539_v41 = vld [vmem:[%s3320_s13 + $0x3d0] sm:$0xff] }
 0x243   : > { %1065 = vmatpush.msrb.mxu0 %v2484_v12  ;;  %1096 = vmatpush.msrb.mxu1 %v2459_v18  ;;  %v2597_v18 = vld [vmem:[%s3320_s13 + $0x560] sm:$0xff] }
 0x245   : > { %1066 = vmatpush.msrb.mxu0 %v2483_v14  ;;  %1097 = vmatpush.msrb.mxu1 %v2458_v20  ;;  %v2614_v14 = vld [vmem:[%s3320_s13 + $0x5e8] sm:$0xff]  ;;  %v2596_v20 = vld [vmem:[%s3320_s13 + $0x558] sm:$0xff] }
 0x247   : > { %1067 = vmatpush.msrb.mxu0 %v2482_v17  ;;  %1098 = vmatpush.msrb.mxu1 %v2457_v27  ;;  %v2613_v17 = vld [vmem:[%s3320_s13 + $0x5e0] sm:$0xff] }
 0x249   : > { %1068 = vmatpush.msrb.mxu0 %v2481_v19  ;;  %1099 = vmatpush.msrb.mxu1 %v2456_v29  ;;  %v2612_v19 = vld [vmem:[%s3320_s13 + $0x5d8] sm:$0xff]  ;;  %v2610_v29 = vld [vmem:[%s3320_s13 + $0x5c8] sm:$0xff] }
 0x24a   : > { %2581 = vmatmul.msk.f32.vlgmr.msrb.gmra.mxu3 %vm1245_vm4, %v1241_v42  ;;  %v2523_v42 = vld [vmem:[%s3320_s13 + $0x350] sm:$0xff] }
 0x24b   : > { %1069 = vmatpush.msrb.mxu0 %v2480_v26  ;;  %1336 = vmatpush.msra.mxu1 %v2528_v32  ;;  %v2595_v26 = vld [vmem:[%s3320_s13 + $0x550] sm:$0xff] }
 0x24d   : > { %1070 = vmatpush.msrb.mxu0 %v2479_v28  ;;  %1337 = vmatpush.msra.mxu1 %v2527_v34  ;;  %v2593_v34 = vld [vmem:[%s3320_s13 + $0x540] sm:$0xff] }
 0x24e   : > { %1071 = vmatmul.f32.vlgmr.msrb.gmra.mxu0 %v3436_v21  ;;  %v2525_v21 = vld [vmem:[%s3320_s13 + $0x360] sm:$0xff] }
 0x24f   : > { %1307 = vmatpush.msra.mxu0 %v2544_v30  ;;  %1338 = vmatpush.msra.mxu1 %v2526_v36  ;;  %v2594_v30 = vld [vmem:[%s3320_s13 + $0x548] sm:$0xff]  ;;  %v2592_v36 = vld [vmem:[%s3320_s13 + $0x538] sm:$0xff] }
 0x251   : > { %1308 = vmatpush.msra.mxu0 %v2543_v33  ;;  %1339 = vmatpush.msra.mxu1 %v2525_v21  ;;  %v2609_v33 = vld [vmem:[%s3320_s13 + $0x5c0] sm:$0xff]  ;;  %v2591_v21 = vld [vmem:[%s3320_s13 + $0x530] sm:$0xff] }
 0x252   : > { %2582 = vmatmul.msk.f32.gmra.mxu3 %vm1245_vm4, %v1242_v43  ;;  %v2538_v43 = vld [vmem:[%s3320_s13 + $0x3c8] sm:$0xff] }
 0x253   : > { %1309 = vmatpush.msra.mxu0 %v2542_v35  ;;  %1340 = vmatpush.msra.mxu1 %v2524_v40  ;;  %v2608_v35 = vld [vmem:[%s3320_s13 + $0x5b8] sm:$0xff] }
 0x255   : > { %1310 = vmatpush.msra.mxu0 %v2541_v37  ;;  %1341 = vmatpush.msra.mxu1 %v2523_v42  ;;  %v2607_v37 = vld [vmem:[%s3320_s13 + $0x5b0] sm:$0xff]  ;;  %v2590_v42 = vld [vmem:[%s3320_s13 + $0x528] sm:$0xff] }
 0x256   : > { %1074 = vmatmul.f32.gmra.mxu0 %v3441_v23  ;;  %v2521_v23 = vld [vmem:[%s3320_s13 + $0x340] sm:$0xff] }
 0x257   : > { %1311 = vmatpush.msra.mxu0 %v2540_v38 }
 0x259   : > { %1312 = vmatpush.msra.mxu0 %v2539_v41  ;;  %v2606_v41 = vld [vmem:[%s3320_s13 + $0x5a8] sm:$0xff] }
 0x25a   : > { %2583 = vmatmul.msk.f32.gmra.mxu3 %vm1245_vm4, %v1243_v47  ;;  %v2522_v47 = vld [vmem:[%s3320_s13 + $0x348] sm:$0xff] }
 0x25b   : > { %1313 = vmatpush.msra.mxu0 %v2538_v43  ;;  %1342 = vmatpush.msra.mxu1 %v2522_v47  ;;  %v2605_v47 = vld [vmem:[%s3320_s13 + $0x5a0] sm:$0xff] }
 0x25d   : > { %1343 = vmatpush.msra.mxu1 %v2521_v23  ;;  %v2604_v23 = vld [vmem:[%s3320_s13 + $0x598] sm:$0xff] }
 0x25e   : > { %1077 = vmatmul.f32.gmra.mxu0 %v3444_v24  ;;  %v3584_v24 = vld [vmem:[%s3334_s18 + $0x2] ss:$0 sm:$0xff] }
 0x25f   : > { %1344 = vmatpush.msra.mxu1 %v2520_v52  ;;  %v2603_v52 = vld [vmem:[%s3320_s13 + $0x590] sm:$0xff] }
 0x261   : > { %1345 = vmatpush.msra.mxu1 %v2519_v55 }
 0x262   : > { %2584 = vmatmul.msk.f32.gmra.mxu3 %vm1245_vm4, %v1244_v48  ;;  %v2537_v48 = vld [vmem:[%s3320_s13 + $0x3c0] sm:$0xff] }
 0x263   : > { %1314 = vmatpush.msra.mxu0 %v2537_v48  ;;  %1346 = vmatpush.msra.mxu1 %v2518_v57  ;;  %v2589_v48 = vld [vmem:[%s3320_s13 + $0x520] sm:$0xff]  ;;  %v2602_v57 = vld [vmem:[%s3320_s13 + $0x588] sm:$0xff] }
 0x265   : > { %1315 = vmatpush.msra.mxu0 %v2536_v51  ;;  %1347 = vmatpush.msra.mxu1 %v2517_v59  ;;  %v2588_v51 = vld [vmem:[%s3320_s13 + $0x518] sm:$0xff] }
 0x266   : > { %1080 = vmatmul.f32.gmra.mxu0 %v3447_v25  ;;  %v2529_v25 = vld [vmem:[%s3320_s13 + $0x380] sm:$0xff] }
 0x267   : > { %1316 = vmatpush.msra.mxu0 %v2535_v53  ;;  %1348 = vmatpush.msra.mxu1 %v2516_v61  ;;  %v2587_v53 = vld [vmem:[%s3320_s13 + $0x510] sm:$0xff] }
 0x269   : > { %1317 = vmatpush.msra.mxu0 %v2534_v56  ;;  %1349 = vmatpush.msra.mxu1 %v2515_v63 }
 0x26a   : > { %2653 = vmatmul.msk.f32.vlgmr.msra.gmra.mxu3 %vm796_vm3, %v1542_v60  ;;  %v2532_v60 = vld [vmem:[%s3320_s13 + $0x398] sm:$0xff] }
 0x26b   : > { %1318 = vmatpush.msra.mxu0 %v2533_v58  ;;  %1350 = vmatpush.msra.mxu1 %v2514_v5  ;;  %v2586_v58 = vld [vmem:[%s3320_s13 + $0x508] sm:$0xff] }
 0x26d   : > { %1319 = vmatpush.msra.mxu0 %v2532_v60  ;;  %1351 = vmatpush.msra.mxu1 %v2513_v6  ;;  %v2585_v60 = vld [vmem:[%s3320_s13 + $0x500] sm:$0xff] }
 0x26f   : > { %1320 = vmatpush.msra.mxu0 %v2531_v62 }
 0x271   : > { %1321 = vmatpush.msra.mxu0 %v2530_v3 }
 0x272   : > { %2654 = vmatmul.msk.f32.gmra.mxu3 %vm796_vm3, %v1543_v7 }
 0x273   : > { %1322 = vmatpush.msra.mxu0 %v2529_v25 }
 0x275   : > { %1607 = vmatpush.msrb.mxu0 %v2616_v8 }
 0x277   : > { %1608 = vmatpush.msrb.mxu0 %v2615_v10 }
 0x279   : > { %1609 = vmatpush.msrb.mxu0 %v2614_v14 }
 0x27a   : > { %2655 = vmatmul.msk.f32.gmra.mxu3 %vm796_vm3, %v1544_v16 }
 0x27b   : > { %1610 = vmatpush.msrb.mxu0 %v2613_v17 }
 0x27d   : > { %1611 = vmatpush.msrb.mxu0 %v2612_v19  ;;  %v2510_v19 = vld [vmem:[%s3320_s13 + $0x2f8] sm:$0xff] }
 0x27e   : > { %1127 = vmatpush.msrb.mxu2 %v2510_v19  ;;  %v2548_v19 = vld [vmem:[%s3320_s13 + $0x418] sm:$0xff] }
 0x282   : > { %2656 = vmatmul.msk.f32.gmra.mxu3 %vm796_vm3, %v1545_v22  ;;  %v2611_v22 = vld [vmem:[%s3320_s13 + $0x5d0] sm:$0xff] }
 0x283   : > { %1612 = vmatpush.msrb.mxu0 %v2611_v22 }
 0x285   : > { %1613 = vmatpush.msrb.mxu0 %v2610_v29 }
 0x287   : > { %1614 = vmatpush.msrb.mxu0 %v2609_v33  ;;  %v2506_v33 = vld [vmem:[%s3320_s13 + $0x2d8] sm:$0xff] }
 0x289   : > { %1615 = vmatpush.msrb.mxu0 %v2608_v35 }
 0x28b   : > { %1616 = vmatpush.msrb.mxu0 %v2607_v37 }
 0x28d   : > { %1617 = vmatpush.msrb.mxu0 %v2606_v41  ;;  %v2502_v41 = vld [vmem:[%s3320_s13 + $0x2b8] sm:$0xff] }
 0x28f   : > { %1618 = vmatpush.msrb.mxu0 %v2605_v47 }
 0x291   : > { %1619 = vmatpush.msrb.mxu0 %v2604_v23  ;;  %v2500_v23 = vld [vmem:[%s3320_s13 + $0x2a8] sm:$0xff] }
 0x293   : > { %1620 = vmatpush.msrb.mxu0 %v2603_v52 }
 0x295   : > { %1621 = vmatpush.msrb.mxu0 %v2602_v57 }
 0x2ad   : > { %v958_v0 = vpop.f32.mrf.mxu3 }
 0x2ae   : > { %v3592_v1 = vadd.f32 %v3584_v24, %v958_v0 }
 0x2b0   : > { %v970_v7 = vmax.f32 %v3592_v1, 0.0  ;;  %v2558_v1 = vld [vmem:[%s3320_s13 + $0x468] sm:$0xff] }
 0x2b2   : > { %1100 = vmatmul.f32.vlgmr.msrb.gmra.mxu1 %v970_v7 }
 0x2b3   : > { %1636 = vmatpush.msrb.mxu1 %v2600_v9 }
 0x2b5   : > { %v961_v12 = vpop.f32.mrf.mxu3  ;;  %1637 = vmatpush.msrb.mxu1 %v2599_v11 }
 0x2b6   : > { %v3606_v13 = vadd.f32 %v3584_v24, %v961_v12 }
 0x2b7   : > { %1638 = vmatpush.msrb.mxu1 %v2598_v15 }
 0x2b8   : > { %v971_v16 = vmax.f32 %v3606_v13, 0.0  ;;  %v2738_v13 = vld [vmem:[%s3320_s13 + $0x978] sm:$0xff] }
 0x2b9   : > { %1639 = vmatpush.msrb.mxu1 %v2597_v18 }
 0x2ba   : > { %1103 = vmatmul.f32.gmra.mxu1 %v971_v16 }
 0x2bb   : > { %1640 = vmatpush.msrb.mxu1 %v2596_v20  ;;  %v2509_v20 = vld [vmem:[%s3320_s13 + $0x2f0] sm:$0xff] }
 0x2bc   : > { %1128 = vmatpush.msrb.mxu2 %v2509_v20 }
 0x2bd   : > { %v964_v27 = vpop.f32.mrf.mxu3  ;;  %1641 = vmatpush.msrb.mxu1 %v2595_v26 }
 0x2be   : > { %v3620_v28 = vadd.f32 %v3584_v24, %v964_v27  ;;  %v2508_v27 = vld [vmem:[%s3320_s13 + $0x2e8] sm:$0xff] }
 0x2bf   : > { %1642 = vmatpush.msrb.mxu1 %v2594_v30  ;;  %1129 = vmatpush.msrb.mxu2 %v2508_v27  ;;  %v2507_v30 = vld [vmem:[%s3320_s13 + $0x2e0] sm:$0xff]  ;;  %v2546_v27 = vld [vmem:[%s3320_s13 + $0x408] sm:$0xff] }
 0x2c0   : > { %v972_v32 = vmax.f32 %v3620_v28, 0.0 }
 0x2c1   : > { %1643 = vmatpush.msrb.mxu1 %v2593_v34  ;;  %1130 = vmatpush.msrb.mxu2 %v2507_v30 }
 0x2c2   : > { %1106 = vmatmul.f32.gmra.mxu1 %v972_v32 }
 0x2c3   : > { %1644 = vmatpush.msrb.mxu1 %v2592_v36  ;;  %v2505_v36 = vld [vmem:[%s3320_s13 + $0x2d0] sm:$0xff]  ;;  %1131 = vmatpush.msrb.mxu2 %v2506_v33 }
 0x2c5   : > { %v967_v38 = vpop.f32.mrf.mxu3  ;;  %1645 = vmatpush.msrb.mxu1 %v2591_v21  ;;  %1132 = vmatpush.msrb.mxu2 %v2505_v36 }
 0x2c6   : > { %v3634_v40 = vadd.f32 %v3584_v24, %v967_v38  ;;  %v2601_v24 = vld [vmem:[%s3320_s13 + $0x580] sm:$0xff] }
 0x2c7   : > { %1646 = vmatpush.msrb.mxu1 %v2590_v42  ;;  %1622 = vmatpush.msrb.mxu0 %v2601_v24  ;;  %v2503_v38 = vld [vmem:[%s3320_s13 + $0x2c0] sm:$0xff] }
 0x2c8   : > { %v973_v43 = vmax.f32 %v3634_v40, 0.0  ;;  %v2495_v24 = vld [vmem:[%s3320_s13 + $0x280] sm:$0xff] }
 0x2c9   : > { %1647 = vmatpush.msrb.mxu1 %v2589_v48  ;;  %v2501_v48 = vld [vmem:[%s3320_s13 + $0x2b0] sm:$0xff]  ;;  %v2553_v40 = vld [vmem:[%s3320_s13 + $0x440] sm:$0xff] }
 0x2ca   : > { %1109 = vmatmul.f32.gmra.mxu1 %v973_v43 }
 0x2cb   : > { %1648 = vmatpush.msrb.mxu1 %v2588_v51  ;;  %v3715_v51 = vld [vmem:[#allocation3 + $0x10] sm:$0xff] }
 0x2cd   : > { %v1275_v55 = vpop.f32.mrf.mxu3  ;;  %1649 = vmatpush.msrb.mxu1 %v2587_v53  ;;  %v3722_v53 = vld [vmem:[%s3334_s18 + $0x3] ss:$0 sm:$0xff] }
 0x2ce   : > { %v1287_v56 = vsub.f32 %v3389_v50, %v1275_v55  ;;  %1323 = vmatmul.f32.vlgmr.msra.gmra.mxu0 %v1275_v55  ;;  %v2498_v55 = vld [vmem:[%s3320_s13 + $0x298] sm:$0xff]  ;;  %v977_v57 = vmul.f32 %v3722_v53, %v970_v7  ;;  %v2557_v7 = vld [vmem:[%s3320_s13 + $0x460] sm:$0xff] }
 0x2cf   : > { %1650 = vmatpush.msrb.mxu1 %v2586_v58  ;;  %v2496_v58 = vld [vmem:[%s3320_s13 + $0x288] sm:$0xff] }
 0x2d0   : > { %v3651_v59 = vmul.f32 %v3332_v4, %v1287_v56  ;;  %v2497_v56 = vld [vmem:[%s3320_s13 + $0x290] sm:$0xff] }
 0x2d1   : > { %1651 = vmatpush.msrb.mxu1 %v2585_v60  ;;  %v2560_v60 = vld [vmem:[%s3320_s13 + $0x478] sm:$0xff] }
 0x2d2   : > { %1352 = vmatmul.f32.vlgmr.msra.gmra.mxu1 %v3389_v50  ;;  %v1295_v61 = vmul.f32 %v3651_v59, %v3651_v59 }
 0x2d4   : > { %1299 = vadd.xlane.f32.xlu2 %v1295_v61  ;;  %v2559_v61 = vld [vmem:[%s3320_s13 + $0x470] sm:$0xff] }
 0x2d5   : > { %v1278_v62 = vpop.f32.mrf.mxu3 }
 0x2d6   : > { %v1288_v63 = vsub.f32 %v3383_v46, %v1278_v62  ;;  %1326 = vmatmul.f32.gmra.mxu0 %v1278_v62  ;;  %v980_v62 = vmul.f32 %v3722_v53, %v973_v43  ;;  %v2552_v43 = vld [vmem:[%s3320_s13 + $0x438] sm:$0xff] }
 0x2d8   : > { %v3660_v0 = vmul.f32 %v3332_v4, %v1288_v63  ;;  %v2556_v63 = vld [vmem:[%s3320_s13 + $0x458] sm:$0xff] }
 0x2da   : > { %1355 = vmatmul.f32.gmra.mxu1 %v3383_v46  ;;  %v1296_v3 = vmul.f32 %v3660_v0, %v3660_v0 }
 0x2dc   : > { %1301 = vadd.xlane.f32.xlu2 %v1296_v3  ;;  %v2555_v3 = vld [vmem:[%s3320_s13 + $0x450] sm:$0xff] }
 0x2dd   : > { %v1281_v5 = vpop.f32.mrf.mxu3 }
 0x2de   : > { %v1289_v25 = vsub.f32 %v3380_v45, %v1281_v5  ;;  %1329 = vmatmul.f32.gmra.mxu0 %v1281_v5  ;;  %v2554_v5 = vld [vmem:[%s3320_s13 + $0x448] sm:$0xff] }
 0x2e0   : > { %v3667_v6 = vmul.f32 %v3332_v4, %v1289_v25  ;;  %v1072_v25 = vpop.f32.mrf.mxu0 }
 0x2e2   : > { %1358 = vmatmul.f32.gmra.mxu1 %v3380_v45  ;;  %v1297_v8 = vmul.f32 %v3667_v6, %v3667_v6 }
 0x2e4   : > { %1303 = vadd.xlane.f32.xlu0 %v1297_v8  ;;  %v2551_v8 = vld [vmem:[%s3320_s13 + $0x430] sm:$0xff] }
 0x2e5   : > { %v1284_v9 = vpop.f32.mrf.mxu3 }
 0x2e6   : > { %v1290_v10 = vsub.f32 %v3378_v44, %v1284_v9  ;;  %1332 = vmatmul.f32.gmra.mxu0 %v1284_v9  ;;  %v2550_v9 = vld [vmem:[%s3320_s13 + $0x428] sm:$0xff] }
 0x2e8   : > { %v3674_v11 = vmul.f32 %v3332_v4, %v1290_v10  ;;  %v1075_v10 = vpop.f32.mrf.mxu0 }
 0x2ea   : > { %1361 = vmatmul.f32.gmra.mxu1 %v3378_v44  ;;  %v1298_v12 = vmul.f32 %v3674_v11, %v3674_v11 }
 0x2ec   : > { %1305 = vadd.xlane.f32.xlu1 %v1298_v12  ;;  %v2916_v12 = vld [vmem:[%s3334_s18 + $0x4] ss:$0 sm:$0xff] }
 0x2ed   : > { %v1575_v14 = vpop.f32.mrf.mxu3 }
 0x2ee   : > { %v1587_v15 = vsub.f32 %v3389_v50, %v1575_v14  ;;  %1623 = vmatmul.f32.vlgmr.msrb.gmra.mxu0 %v1575_v14  ;;  %v2549_v14 = vld [vmem:[%s3320_s13 + $0x420] sm:$0xff] }
 0x2f0   : > { %v3681_v17 = vmul.f32 %v3332_v4, %v1587_v15  ;;  %v1078_v33 = vpop.f32.mrf.mxu0 }
 0x2f2   : > { %1652 = vmatmul.f32.vlgmr.msrb.gmra.mxu1 %v3389_v50  ;;  %v1595_v18 = vmul.f32 %v3681_v17, %v3681_v17 }
 0x2f4   : > { %1599 = vadd.xlane.f32.xlu2 %v1595_v18 }
 0x2f5   : > { %v1578_v22 = vpop.f32.mrf.mxu3 }
 0x2f6   : > { %v1588_v26 = vsub.f32 %v3383_v46, %v1578_v22  ;;  %1626 = vmatmul.f32.gmra.mxu0 %v1578_v22  ;;  %v2547_v22 = vld [vmem:[%s3320_s13 + $0x410] sm:$0xff] }
 0x2f8   : > { %v3691_v29 = vmul.f32 %v3332_v4, %v1588_v26 }
 0x2fa   : > { %1655 = vmatmul.f32.gmra.mxu1 %v3383_v46  ;;  %v1596_v50 = vmul.f32 %v3691_v29, %v3691_v29  ;;  %v2504_v46 = vld [vmem:[%s3320_s13 + $0x2c8] sm:$0xff] }
 0x2fb   : > { %1133 = vmatpush.msrb.mxu2 %v2504_v46  ;;  %v2631_v46 = vld [vmem:[%s3320_s13 + $0x670] sm:$0xff] }
 0x2fc   : > { %1601 = vadd.xlane.f32.xlu0 %v1596_v50  ;;  %v2545_v50 = vld [vmem:[%s3320_s13 + $0x400] sm:$0xff] }
 0x2fd   : > { %v1581_v34 = vpop.f32.mrf.mxu3  ;;  %1134 = vmatpush.msrb.mxu2 %v2503_v38 }
 0x2fe   : > { %v1589_v35 = vsub.f32 %v3380_v45, %v1581_v34  ;;  %1629 = vmatmul.f32.gmra.mxu0 %v1581_v34 }
 0x2ff   : > { %1135 = vmatpush.msrb.mxu2 %v2502_v41  ;;  %v2629_v41 = vld [vmem:[%s3320_s13 + $0x660] sm:$0xff] }
 0x300   : > { %v3701_v37 = vmul.f32 %v3332_v4, %v1589_v35  ;;  %v2632_v35 = vld [vmem:[%s3320_s13 + $0x678] sm:$0xff] }
 0x301   : > { %1136 = vmatpush.msrb.mxu2 %v2501_v48  ;;  %v2628_v48 = vld [vmem:[%s3320_s13 + $0x658] sm:$0xff] }
 0x302   : > { %1658 = vmatmul.f32.gmra.mxu1 %v3380_v45  ;;  %v1597_v21 = vmul.f32 %v3701_v37, %v3701_v37 }
 0x303   : > { %1137 = vmatpush.msrb.mxu2 %v2500_v23  ;;  %v1081_v23 = vpop.f32.mrf.mxu0 }
 0x304   : > { %1603 = vadd.xlane.f32.xlu1 %v1597_v21  ;;  %v2630_v21 = vld [vmem:[%s3320_s13 + $0x668] sm:$0xff] }
 0x305   : > { %v1584_v42 = vpop.f32.mrf.mxu3 }
 0x306   : > { %v1590_v47 = vsub.f32 %v3378_v44, %v1584_v42  ;;  %1632 = vmatmul.f32.gmra.mxu0 %v1584_v42  ;;  %v2499_v44 = vld [vmem:[%s3320_s13 + $0x2a0] sm:$0xff] }
 0x307   : > { %1138 = vmatpush.msrb.mxu2 %v2499_v44  ;;  %v2627_v44 = vld [vmem:[%s3320_s13 + $0x650] sm:$0xff] }
 0x308   : > { %v3712_v45 = vmul.f32 %v3332_v4, %v1590_v47 }
 0x309   : > { %1139 = vmatpush.msrb.mxu2 %v2498_v55  ;;  %v2626_v55 = vld [vmem:[%s3320_s13 + $0x648] sm:$0xff] }
 0x30a   : > { %1661 = vmatmul.f32.gmra.mxu1 %v3715_v51  ;;  %v1598_v52 = vmul.f32 %v3712_v45, %v3712_v45 }
 0x30b   : > { %1140 = vmatpush.msrb.mxu2 %v2497_v56 }
 0x30c   : > { %1605 = vadd.xlane.f32.xlu2 %v1598_v52 }
 0x30d   : > { %1141 = vmatpush.msrb.mxu2 %v2496_v58 }
 0x30f   : > { %1142 = vmatpush.msrb.mxu2 %v2495_v24 }
 0x311   : > { %1390 = vmatpush.msra.mxu2 %v2560_v60  ;;  %v2624_v60 = vld [vmem:[%s3320_s13 + $0x638] sm:$0xff] }
 0x313   : > { %1391 = vmatpush.msra.mxu2 %v2559_v61 }
 0x314   : > { %981 = vadd.xlane.f32.xlu2 %v977_v57  ;;  %v2625_v57 = vld [vmem:[%s3320_s13 + $0x640] sm:$0xff] }
 0x315   : > { %1392 = vmatpush.msra.mxu2 %v2558_v1  ;;  %v2622_v1 = vld [vmem:[%s3320_s13 + $0x628] sm:$0xff] }
 0x317   : > { %1393 = vmatpush.msra.mxu2 %v2557_v7 }
 0x319   : > { %1394 = vmatpush.msra.mxu2 %v2556_v63 }
 0x31b   : > { %1395 = vmatpush.msra.mxu2 %v2555_v3  ;;  %v2917_v3 = vld [vmem:[%s3334_s18 + $0x6] ss:$0 sm:$0xff] }
 0x31c   : > { %987 = vadd.xlane.f32.xlu2 %v980_v62  ;;  %v2623_v62 = vld [vmem:[%s3320_s13 + $0x630] sm:$0xff] }
 0x31d   : > { %1396 = vmatpush.msra.mxu2 %v2554_v5 }
 0x31f   : > { %1397 = vmatpush.msra.mxu2 %v2553_v40 }
 0x321   : > { %1398 = vmatpush.msra.mxu2 %v2552_v43 }
 0x323   : > { %1399 = vmatpush.msra.mxu2 %v2551_v8 }
 0x325   : > { %1400 = vmatpush.msra.mxu2 %v2550_v9  ;;  %v2918_v9 = vld [vmem:[%s3334_s18 + $0x7] ss:$0 sm:$0xff] }
 0x327   : > { %1401 = vmatpush.msra.mxu2 %v2549_v14  ;;  %v2619_v14 = vld [vmem:[%s3320_s13 + $0x610] sm:$0xff] }
 0x329   : > { %1402 = vmatpush.msra.mxu2 %v2548_v19  ;;  %v2618_v19 = vld [vmem:[%s3320_s13 + $0x608] sm:$0xff] }
 0x32b   : > { %1403 = vmatpush.msra.mxu2 %v2547_v22 }
 0x32d   : > { %1404 = vmatpush.msra.mxu2 %v2546_v27 }
 0x32f   : > { %v1101_v15 = vpop.f32.mrf.mxu1  ;;  %1405 = vmatpush.msra.mxu2 %v2545_v50 }
 0x330   : > { %v1102_v18 = vadd.f32 %v1101_v15, %v1072_v25  ;;  %v2621_v25 = vld [vmem:[%s3320_s13 + $0x620] sm:$0xff] }
 0x332   : > { %v1116_v20 = vadd.f32 %v2916_v12, %v1102_v18 }
 0x334   : > { %v1120_v26 = vmax.f32 %v1116_v20, 0.0 }
 0x336   : > { %1143 = vmatmul.f32.vlgmr.msrb.gmra.mxu2 %v1120_v26  ;;  %v2617_v26 = vld [vmem:[%s3320_s13 + $0x600] sm:$0xff] }
 0x337   : > { %v1104_v30 = vpop.f32.mrf.mxu1  ;;  %1690 = vmatpush.msrb.mxu2 %v2632_v35 }
 0x338   : > { %v1105_v34 = vadd.f32 %v1104_v30, %v1075_v10  ;;  %v2620_v10 = vld [vmem:[%s3320_s13 + $0x618] sm:$0xff] }
 0x339   : > { %1691 = vmatpush.msrb.mxu2 %v2631_v46 }
 0x33a   : > { %v1117_v36 = vadd.f32 %v2916_v12, %v1105_v34 }
 0x33b   : > { %1692 = vmatpush.msrb.mxu2 %v2630_v21 }
 0x33c   : > { %v1121_v38 = vmax.f32 %v1117_v36, 0.0 }
 0x33d   : > { %1693 = vmatpush.msrb.mxu2 %v2629_v41 }
 0x33e   : > { %1146 = vmatmul.f32.gmra.mxu2 %v1121_v38 }
 0x33f   : > { %v1107_v42 = vpop.f32.mrf.mxu1  ;;  %1694 = vmatpush.msrb.mxu2 %v2628_v48 }
 0x340   : > { %v1108_v47 = vadd.f32 %v1107_v42, %v1078_v33 }
 0x341   : > { %1695 = vmatpush.msrb.mxu2 %v2627_v44 }
 0x342   : > { %v1118_v52 = vadd.f32 %v2916_v12, %v1108_v47 }
 0x343   : > { %1696 = vmatpush.msrb.mxu2 %v2626_v55 }
 0x344   : > { %v1122_v56 = vmax.f32 %v1118_v52, 0.0 }
 0x345   : > { %1697 = vmatpush.msrb.mxu2 %v2625_v57 }
 0x346   : > { %1149 = vmatmul.f32.gmra.mxu2 %v1122_v56 }
 0x347   : > { %v1110_v58 = vpop.f32.mrf.mxu1  ;;  %1698 = vmatpush.msrb.mxu2 %v2624_v60  ;;  %v1300_v7 = vpop.xlane.xlu2 %1299 }
 0x348   : > { %v1111_v24 = vadd.f32 %v1110_v58, %v1081_v23  ;;  %v1368_v43 = vmul.f32 %v2917_v3, %v1300_v7 }
 0x349   : > { %1699 = vmatpush.msrb.mxu2 %v2623_v62 }
 0x34a   : > { %v1119_v61 = vadd.f32 %v2916_v12, %v1111_v24  ;;  %v2919_v24 = vld [vmem:[%s3334_s18 + $0xa] ss:$0 sm:$0xff] }
 0x34b   : > { %v1324_v63 = vpop.f32.mrf.mxu0  ;;  %1700 = vmatpush.msrb.mxu2 %v2622_v1 }
 0x34c   : > { %v1123_v5 = vmax.f32 %v1119_v61, 0.0 }
 0x34d   : > { %1701 = vmatpush.msrb.mxu2 %v2621_v25 }
 0x34e   : > { %1152 = vmatmul.f32.gmra.mxu2 %v1123_v5  ;;  %v2920_v5 = vld [vmem:[%s3334_s18 + $0xb] ss:$0 sm:$0xff] }
 0x34f   : > { %v1353_v40 = vpop.f32.mrf.mxu1  ;;  %1702 = vmatpush.msrb.mxu2 %v2620_v10  ;;  %v1302_v20 = vpop.xlane.xlu2 %1301 }
 0x350   : > { %v1354_v8 = vadd.f32 %v1353_v40, %v1324_v63  ;;  %v1369_v50 = vmul.f32 %v2917_v3, %v1302_v20 }
 0x351   : > { %1703 = vmatpush.msrb.mxu2 %v2619_v14 }
 0x352   : > { %v1372_v12 = vadd.f32 %v1368_v43, %v1354_v8 }
 0x353   : > { %v1327_v15 = vpop.f32.mrf.mxu0  ;;  %1704 = vmatpush.msrb.mxu2 %v2618_v19 }
 0x354   : > { %v1379_v18 = vadd.f32 %v2918_v9, %v1372_v12 }
 0x355   : > { %1705 = vmatpush.msrb.mxu2 %v2617_v26 }
 0x356   : > { %v1383_v22 = vmax.f32 %v1379_v18, 0.0 }
 0x357   : > { %v1356_v27 = vpop.f32.mrf.mxu1  ;;  %v1304_v36 = vpop.xlane.xlu0 %1303 }
 0x358   : > { %v1357_v30 = vadd.f32 %v1356_v27, %v1327_v15  ;;  %1406 = vmatmul.f32.vlgmr.msra.gmra.mxu2 %v1383_v22  ;;  %v1370_v38 = vmul.f32 %v2917_v3, %v1304_v36 }
 0x35a   : > { %v1373_v33 = vadd.f32 %v1369_v50, %v1357_v30 }
 0x35b   : > { %v1330_v34 = vpop.f32.mrf.mxu0 }
 0x35c   : > { %v1380_v35 = vadd.f32 %v2918_v9, %v1373_v33 }
 0x35e   : > { %v1384_v46 = vmax.f32 %v1380_v35, 0.0 }
 0x35f   : > { %v1359_v21 = vpop.f32.mrf.mxu1  ;;  %v1306_v23 = vpop.xlane.xlu1 %1305 }
 0x360   : > { %v1360_v41 = vadd.f32 %v1359_v21, %v1330_v34  ;;  %1409 = vmatmul.f32.gmra.mxu2 %v1384_v46  ;;  %v1371_v55 = vmul.f32 %v2917_v3, %v1306_v23  ;;  %v2574_v23 = vld [vmem:[%s3320_s13 + $0x4e8] sm:$0xff] }
 0x362   : > { %v1374_v42 = vadd.f32 %v1370_v38, %v1360_v41 }
 0x363   : > { %v1333_v47 = vpop.f32.mrf.mxu0 }
 0x364   : > { %v1381_v48 = vadd.f32 %v2918_v9, %v1374_v42 }
 0x366   : > { %v1385_v52 = vmax.f32 %v1381_v48, 0.0  ;;  %v2575_v48 = vld [vmem:[%s3320_s13 + $0x4f0] sm:$0xff] }
 0x367   : > { %v1362_v44 = vpop.f32.mrf.mxu1  ;;  %v1600_v61 = vpop.xlane.xlu2 %1599 }
 0x368   : > { %v1363_v56 = vadd.f32 %v1362_v44, %v1333_v47  ;;  %1412 = vmatmul.f32.gmra.mxu2 %v1385_v52  ;;  %v1668_v7 = vmul.f32 %v2919_v24, %v1600_v61  ;;  %v2576_v47 = vld [vmem:[%s3320_s13 + $0x4f8] sm:$0xff]  ;;  %v2573_v52 = vld [vmem:[%s3320_s13 + $0x4e0] sm:$0xff] }
 0x369   : > { %1771 = vmatpush.msra.mxu0 %v2576_v47  ;;  %v2572_v44 = vld [vmem:[%s3320_s13 + $0x4d8] sm:$0xff]  ;;  %v2565_v61 = vld [vmem:[%s3320_s13 + $0x4a0] sm:$0xff] }
 0x36a   : > { %v1375_v57 = vadd.f32 %v1371_v55, %v1363_v56  ;;  %v2571_v55 = vld [vmem:[%s3320_s13 + $0x4d0] sm:$0xff]  ;;  %v2570_v56 = vld [vmem:[%s3320_s13 + $0x4c8] sm:$0xff]  ;;  %v2636_v47 = vld [vmem:[%s3320_s13 + $0x698] sm:$0xff] }
 0x36b   : > { %v1624_v58 = vpop.f32.mrf.mxu0  ;;  %1772 = vmatpush.msra.mxu0 %v2575_v48  ;;  %v2922_v48 = vld [vmem:[%s3334_s18 + $0x8] ss:$0 sm:$0xff] }
 0x36c   : > { %v1382_v60 = vadd.f32 %v2918_v9, %v1375_v57  ;;  %v2569_v57 = vld [vmem:[%s3320_s13 + $0x4c0] sm:$0xff] }
 0x36d   : > { %1773 = vmatpush.msra.mxu0 %v2574_v23  ;;  %v2664_v23 = vld [vmem:[%s3320_s13 + $0x738] sm:$0xff] }
 0x36e   : > { %v1386_v62 = vmax.f32 %v1382_v60, 0.0  ;;  %v2566_v60 = vld [vmem:[%s3320_s13 + $0x4a8] sm:$0xff] }
 0x36f   : > { %v1653_v1 = vpop.f32.mrf.mxu1  ;;  %v1602_v8 = vpop.xlane.xlu0 %1601  ;;  %1774 = vmatpush.msra.mxu0 %v2573_v52  ;;  %v2635_v52 = vld [vmem:[%s3320_s13 + $0x690] sm:$0xff] }
 0x370   : > { %v1654_v63 = vadd.f32 %v1653_v1, %v1624_v58  ;;  %1415 = vmatmul.f32.gmra.mxu2 %v1386_v62  ;;  %v1669_v3 = vmul.f32 %v2919_v24, %v1602_v8  ;;  %v2568_v58 = vld [vmem:[%s3320_s13 + $0x4b8] sm:$0xff] }
 0x371   : > { %1775 = vmatpush.msra.mxu0 %v2572_v44  ;;  %v2564_v62 = vld [vmem:[%s3320_s13 + $0x498] sm:$0xff]  ;;  %v2663_v44 = vld [vmem:[%s3320_s13 + $0x730] sm:$0xff] }
 0x372   : > { %v1672_v25 = vadd.f32 %v1668_v7, %v1654_v63  ;;  %v2563_v7 = vld [vmem:[%s3320_s13 + $0x490] sm:$0xff]  ;;  %v2562_v63 = vld [vmem:[%s3320_s13 + $0x488] sm:$0xff] }
 0x373   : > { %v1627_v40 = vpop.f32.mrf.mxu0  ;;  %1776 = vmatpush.msra.mxu0 %v2571_v55 }
 0x374   : > { %v1679_v43 = vadd.f32 %v2920_v5, %v1672_v25  ;;  %v2648_v25 = vld [vmem:[%s3320_s13 + $0x6f8] sm:$0xff] }
 0x375   : > { %1777 = vmatpush.msra.mxu0 %v2570_v56  ;;  %1742 = vmatpush.msrb.mxu3 %v2648_v25 }
 0x376   : > { %v1683_v10 = vmax.f32 %v1679_v43, 0.0  ;;  %v2647_v43 = vld [vmem:[%s3320_s13 + $0x6f0] sm:$0xff] }
 0x377   : > { %v1656_v12 = vpop.f32.mrf.mxu1  ;;  %v1604_v9 = vpop.xlane.xlu1 %1603  ;;  %1778 = vmatpush.msra.mxu0 %v2569_v57  ;;  %1743 = vmatpush.msrb.mxu3 %v2647_v43  ;;  %v2634_v57 = vld [vmem:[%s3320_s13 + $0x688] sm:$0xff] }
 0x378   : > { %v1657_v14 = vadd.f32 %v1656_v12, %v1627_v40  ;;  %1706 = vmatmul.f32.vlgmr.msrb.gmra.mxu2 %v1683_v10  ;;  %v1670_v26 = vmul.f32 %v2919_v24, %v1604_v9  ;;  %v3791_v40 = vld [vmem:[%s3334_s18 + $0x5] ss:$0 sm:$0xff]  ;;  %v2646_v12 = vld [vmem:[%s3320_s13 + $0x6e8] sm:$0xff] }
 0x379   : > { %1779 = vmatpush.msra.mxu0 %v2568_v58  ;;  %1744 = vmatpush.msrb.mxu3 %v2646_v12  ;;  %v2662_v58 = vld [vmem:[%s3320_s13 + $0x728] sm:$0xff] }
 0x37a   : > { %v1673_v15 = vadd.f32 %v1669_v3, %v1657_v14  ;;  %v2645_v3 = vld [vmem:[%s3320_s13 + $0x6e0] sm:$0xff]  ;;  %v2644_v14 = vld [vmem:[%s3320_s13 + $0x6d8] sm:$0xff]  ;;  %v2658_v43 = vld [vmem:[%s3320_s13 + $0x708] sm:$0xff] }
 0x37b   : > { %v1630_v18 = vpop.f32.mrf.mxu0  ;;  %1745 = vmatpush.msrb.mxu3 %v2645_v3  ;;  %v3843_v3 = vld [vmem:[%s3334_s18 + $0x9] ss:$0 sm:$0xff] }
 0x37c   : > { %v1680_v19 = vadd.f32 %v2920_v5, %v1673_v15  ;;  %v2672_v15 = vld [vmem:[%s3320_s13 + $0x778] sm:$0xff] }
 0x37d   : > { %1746 = vmatpush.msrb.mxu3 %v2644_v14  ;;  %1866 = vmatpush.msra.mxu1 %v2672_v15  ;;  %v2657_v14 = vld [vmem:[%s3320_s13 + $0x700] sm:$0xff]  ;;  %v3846_v15 = vld [vmem:[#allocation3] sm:$0xff] }
 0x37e   : > { %v1684_v20 = vmax.f32 %v1680_v19, 0.0 }
 0x37f   : > { %v1659_v22 = vpop.f32.mrf.mxu1  ;;  %v1606_v35 = vpop.xlane.xlu2 %1605 }
 0x380   : > { %v1660_v27 = vadd.f32 %v1659_v22, %v1630_v18  ;;  %1709 = vmatmul.f32.gmra.mxu2 %v1684_v20  ;;  %v1671_v46 = vmul.f32 %v2919_v24, %v1606_v35  ;;  %v2567_v24 = vld [vmem:[%s3320_s13 + $0x4b0] sm:$0xff]  ;;  %v2642_v22 = vld [vmem:[%s3320_s13 + $0x6c8] sm:$0xff] }
 0x381   : > { %1780 = vmatpush.msra.mxu0 %v2567_v24  ;;  %v2643_v18 = vld [vmem:[%s3320_s13 + $0x6d0] sm:$0xff] }
 0x382   : > { %v1674_v50 = vadd.f32 %v1670_v26, %v1660_v27  ;;  %v2671_v20 = vld [vmem:[%s3320_s13 + $0x770] sm:$0xff]  ;;  %1747 = vmatpush.msrb.mxu3 %v2643_v18  ;;  %v2670_v26 = vld [vmem:[%s3320_s13 + $0x768] sm:$0xff]  ;;  %v2641_v27 = vld [vmem:[%s3320_s13 + $0x6c0] sm:$0xff] }
 0x383   : > { %v1633_v33 = vpop.f32.mrf.mxu0  ;;  %1781 = vmatpush.msra.mxu0 %v2566_v60  ;;  %1867 = vmatpush.msra.mxu1 %v2671_v20  ;;  %v2633_v60 = vld [vmem:[%s3320_s13 + $0x680] sm:$0xff] }
 0x384   : > { %v1681_v30 = vadd.f32 %v2920_v5, %v1674_v50  ;;  %1748 = vmatpush.msrb.mxu3 %v2642_v22  ;;  %v2669_v50 = vld [vmem:[%s3320_s13 + $0x760] sm:$0xff] }
 0x385   : > { %1782 = vmatpush.msra.mxu0 %v2565_v61  ;;  %1868 = vmatpush.msra.mxu1 %v2670_v26  ;;  %v2661_v61 = vld [vmem:[%s3320_s13 + $0x720] sm:$0xff] }
 0x386   : > { %v1685_v34 = vmax.f32 %v1681_v30, 0.0  ;;  %v2640_v30 = vld [vmem:[%s3320_s13 + $0x6b8] sm:$0xff]  ;;  %1749 = vmatpush.msrb.mxu3 %v2641_v27 }
 0x387   : > { %v1662_v36 = vpop.f32.mrf.mxu1  ;;  %1783 = vmatpush.msra.mxu0 %v2564_v62  ;;  %1869 = vmatpush.msra.mxu1 %v2669_v50  ;;  %v2660_v62 = vld [vmem:[%s3320_s13 + $0x718] sm:$0xff] }
 0x388   : > { %v1663_v21 = vadd.f32 %v1662_v36, %v1633_v33  ;;  %1712 = vmatmul.f32.gmra.mxu2 %v1685_v34  ;;  %v2668_v33 = vld [vmem:[%s3320_s13 + $0x758] sm:$0xff]  ;;  %v2639_v34 = vld [vmem:[%s3320_s13 + $0x6b0] sm:$0xff]  ;;  %1750 = vmatpush.msrb.mxu3 %v2640_v30  ;;  %v2924_v30 = vld [vmem:[%s3334_s18 + $0xc] ss:$0 sm:$0xff] }
 0x389   : > { %1784 = vmatpush.msra.mxu0 %v2563_v7  ;;  %1870 = vmatpush.msra.mxu1 %v2668_v33  ;;  %v2659_v7 = vld [vmem:[%s3320_s13 + $0x710] sm:$0xff] }
 0x38a   : > { %v1675_v38 = vadd.f32 %v1671_v46, %v1663_v21  ;;  %v2667_v46 = vld [vmem:[%s3320_s13 + $0x750] sm:$0xff]  ;;  %1751 = vmatpush.msrb.mxu3 %v2639_v34  ;;  %v2638_v21 = vld [vmem:[%s3320_s13 + $0x6a8] sm:$0xff] }
 0x38b   : > { %1785 = vmatpush.msra.mxu0 %v2562_v63  ;;  %1871 = vmatpush.msra.mxu1 %v2667_v46  ;;  %v2935_v63 = vld [vmem:[#allocation3 + $0x8] sm:$0xff] }
 0x38c   : > { %v1682_v41 = vadd.f32 %v2920_v5, %v1675_v38  ;;  %v2561_v5 = vld [vmem:[%s3320_s13 + $0x480] sm:$0xff]  ;;  %v2666_v38 = vld [vmem:[%s3320_s13 + $0x748] sm:$0xff]  ;;  %1752 = vmatpush.msrb.mxu3 %v2638_v21 }
 0x38d   : > { %1786 = vmatpush.msra.mxu0 %v2561_v5  ;;  %1872 = vmatpush.msra.mxu1 %v2666_v38 }
 0x38e   : > { %v1686_v42 = vmax.f32 %v1682_v41, 0.0  ;;  %v2637_v41 = vld [vmem:[%s3320_s13 + $0x6a0] sm:$0xff] }
 0x38f   : > { %1753 = vmatpush.msrb.mxu3 %v2637_v41 }
 0x390   : > { %1715 = vmatmul.f32.gmra.mxu2 %v1686_v42  ;;  %v2665_v42 = vld [vmem:[%s3320_s13 + $0x740] sm:$0xff] }
 0x391   : > { %1873 = vmatpush.msra.mxu1 %v2665_v42  ;;  %1754 = vmatpush.msrb.mxu3 %v2636_v47 }
 0x393   : > { %1874 = vmatpush.msra.mxu1 %v2664_v23  ;;  %1755 = vmatpush.msrb.mxu3 %v2635_v52  ;;  %v2030_v52 = vld [vmem:[%s4238_s21] sm:$0xff] }
 0x395   : > { %1875 = vmatpush.msra.mxu1 %v2663_v44  ;;  %1756 = vmatpush.msrb.mxu3 %v2634_v57  ;;  %v2031_v44 = vld [vmem:[%s4238_s21 + $0x8] sm:$0xff] }
 0x396   : > { %v2687_v57 = vld [vmem:[%s3320_s13 + $0x7f0] sm:$0xff] }
 0x397   : > { %1876 = vmatpush.msra.mxu1 %v2662_v58  ;;  %1757 = vmatpush.msrb.mxu3 %v2633_v60  ;;  %v2686_v58 = vld [vmem:[%s3320_s13 + $0x7e8] sm:$0xff]  ;;  %v2685_v60 = vld [vmem:[%s3320_s13 + $0x7e0] sm:$0xff] }
 0x399   : > { %1877 = vmatpush.msra.mxu1 %v2661_v61  ;;  %2050 = vmatpush.msra.mxu3 %v3715_v51  ;;  %v2684_v61 = vld [vmem:[%s3320_s13 + $0x7d8] sm:$0xff] }
 0x39b   : > { %1878 = vmatpush.msra.mxu1 %v2660_v62  ;;  %2051 = vmatpush.msra.mxu3 %v2935_v63  ;;  %v2683_v62 = vld [vmem:[%s3320_s13 + $0x7d0] sm:$0xff] }
 0x39d   : > { %1879 = vmatpush.msra.mxu1 %v2659_v7  ;;  %v2682_v7 = vld [vmem:[%s3320_s13 + $0x7c8] sm:$0xff] }
 0x39f   : > { %1880 = vmatpush.msra.mxu1 %v2658_v43  ;;  %v2678_v43 = vld [vmem:[%s3320_s13 + $0x7a8] sm:$0xff] }
 0x3a1   : > { %1881 = vmatpush.msra.mxu1 %v2657_v14  ;;  %v2722_v14 = vld [vmem:[%s3320_s13 + $0x8f8] sm:$0xff] }
 0x3a2   : > { %1882 = vmatmul.f32.vlgmr.msra.gmra.mxu1 %v3846_v15  ;;  %2071 = vmatpush.msrb.mxu0 %v2722_v14  ;;  %v2697_v14 = vld [vmem:[%s3320_s13 + $0x830] sm:$0xff] }
 0x3b9   : > { %v3784_v1 = vpop.f32.mrf.mxu2 }
 0x3c1   : > { %v1147_v8 = vpop.f32.mrf.mxu2 }
 0x3c2   : > { %v3795_v10 = vadd.f32 %v3791_v40, %v1147_v8  ;;  %v3839_v8 = vld [vmem:[#allocation3 + $0x18] sm:$0xff] }
 0x3c3   : > { %2052 = vmatpush.msra.mxu3 %v3839_v8  ;;  %1885 = vmatmul.f32.gmra.mxu1 %v3839_v8 }
 0x3c5   : > { %2053 = vmatpush.msra.mxu3 %v3846_v15 }
 0x3c9   : > { %v1150_v19 = vpop.f32.mrf.mxu2 }
 0x3ca   : > { %v3803_v9 = vadd.f32 %v3791_v40, %v1150_v19 }
 0x3cb   : > { %1888 = vmatmul.f32.gmra.mxu1 %v2935_v63  ;;  %v2681_v63 = vld [vmem:[%s3320_s13 + $0x7c0] sm:$0xff] }
 0x3d1   : > { %v1153_v35 = vpop.f32.mrf.mxu2 }
 0x3d2   : > { %v3814_v36 = vadd.f32 %v3791_v40, %v1153_v35 }
 0x3d3   : > { %1891 = vmatmul.f32.gmra.mxu1 %v3715_v51 }
 0x3db   : > { %v1407_v55 = vpop.f32.mrf.mxu2 }
 0x3dc   : > { %v3826_v56 = vadd.f32 %v2922_v48, %v1407_v55  ;;  %v2688_v55 = vld [vmem:[%s3320_s13 + $0x7f8] sm:$0xff] }
 0x3dd   : > { %1913 = vmatpush.msra.mxu2 %v2688_v55  ;;  %v2673_v55 = vld [vmem:[%s3320_s13 + $0x780] sm:$0xff] }
 0x3de   : > { %v1419_v24 = vmax.f32 %v3826_v56, 0.0 }
 0x3df   : > { %1914 = vmatpush.msra.mxu2 %v2687_v57  ;;  %v2718_v57 = vld [vmem:[%s3320_s13 + $0x8d8] sm:$0xff] }
 0x3e0   : > { %1787 = vmatmul.f32.vlgmr.msra.gmra.mxu0 %v1419_v24  ;;  %v1426_v28 = vmul.f32 %v3843_v3, %v1419_v24  ;;  %v982_v24 = vpop.xlane.xlu2 %981 }
 0x3e1   : > { %1915 = vmatpush.msra.mxu2 %v2686_v58  ;;  %v2702_v58 = vld [vmem:[%s3320_s13 + $0x858] sm:$0xff] }
 0x3e3   : > { %v1410_v5 = vpop.f32.mrf.mxu2  ;;  %1916 = vmatpush.msra.mxu2 %v2685_v60  ;;  %v2717_v60 = vld [vmem:[%s3320_s13 + $0x8d0] sm:$0xff] }
 0x3e4   : > { %v1411_v25 = vadd.f32 %v2922_v48, %v1410_v5  ;;  %v2680_v5 = vld [vmem:[%s3320_s13 + $0x7b8] sm:$0xff] }
 0x3e5   : > { %1917 = vmatpush.msra.mxu2 %v2684_v61  ;;  %v2701_v61 = vld [vmem:[%s3320_s13 + $0x850] sm:$0xff] }
 0x3e6   : > { %v1420_v12 = vmax.f32 %v1411_v25, 0.0  ;;  %v2679_v25 = vld [vmem:[%s3320_s13 + $0x7b0] sm:$0xff] }
 0x3e7   : > { %1918 = vmatpush.msra.mxu2 %v2683_v62  ;;  %v2716_v62 = vld [vmem:[%s3320_s13 + $0x8c8] sm:$0xff] }
 0x3e8   : > { %1790 = vmatmul.f32.gmra.mxu0 %v1420_v12  ;;  %v1427_v18 = vmul.f32 %v3843_v3, %v1420_v12  ;;  %v2677_v12 = vld [vmem:[%s3320_s13 + $0x7a0] sm:$0xff] }
 0x3e9   : > { %1919 = vmatpush.msra.mxu2 %v2682_v7  ;;  %v2700_v7 = vld [vmem:[%s3320_s13 + $0x848] sm:$0xff] }
 0x3ea   : > { %1432 = vadd.xlane.f32.xlu2 %v1427_v18  ;;  %v2706_v18 = vld [vmem:[%s3320_s13 + $0x878] sm:$0xff] }
 0x3eb   : > { %v1413_v19 = vpop.f32.mrf.mxu2  ;;  %1920 = vmatpush.msra.mxu2 %v2681_v63  ;;  %2094 = vmatpush.msrb.mxu1 %v2706_v18  ;;  %v2715_v63 = vld [vmem:[%s3320_s13 + $0x8c0] sm:$0xff]  ;;  %v2712_v18 = vld [vmem:[%s3320_s13 + $0x8a8] sm:$0xff] }
 0x3ec   : > { %v3851_v20 = vadd.f32 %v2922_v48, %v1413_v19  ;;  %v2676_v19 = vld [vmem:[%s3320_s13 + $0x798] sm:$0xff] }
 0x3ed   : > { %1921 = vmatpush.msra.mxu2 %v2680_v5  ;;  %v2699_v5 = vld [vmem:[%s3320_s13 + $0x840] sm:$0xff] }
 0x3ee   : > { %v1421_v22 = vmax.f32 %v3851_v20, 0.0 }
 0x3ef   : > { %1922 = vmatpush.msra.mxu2 %v2679_v25  ;;  %v2714_v25 = vld [vmem:[%s3320_s13 + $0x8b8] sm:$0xff] }
 0x3f0   : > { %1793 = vmatmul.f32.gmra.mxu0 %v1421_v22 }
 0x3f1   : > { %1923 = vmatpush.msra.mxu2 %v2678_v43  ;;  %v2698_v43 = vld [vmem:[%s3320_s13 + $0x838] sm:$0xff] }
 0x3f3   : > { %v1416_v26 = vpop.f32.mrf.mxu2  ;;  %1924 = vmatpush.msra.mxu2 %v2677_v12  ;;  %v2713_v12 = vld [vmem:[%s3320_s13 + $0x8b0] sm:$0xff] }
 0x3f4   : > { %v3857_v27 = vadd.f32 %v2922_v48, %v1416_v26  ;;  %v2721_v26 = vld [vmem:[%s3320_s13 + $0x8f0] sm:$0xff] }
 0x3f5   : > { %1925 = vmatpush.msra.mxu2 %v2676_v19  ;;  %2072 = vmatpush.msrb.mxu0 %v2721_v26  ;;  %v2696_v19 = vld [vmem:[%s3320_s13 + $0x828] sm:$0xff]  ;;  %v2711_v26 = vld [vmem:[%s3320_s13 + $0x8a0] sm:$0xff] }
 0x3f6   : > { %v1422_v50 = vmax.f32 %v3857_v27, 0.0  ;;  %v2735_v27 = vld [vmem:[%s3320_s13 + $0x960] sm:$0xff] }
 0x3f8   : > { %1796 = vmatmul.f32.gmra.mxu0 %v1422_v50  ;;  %v1429_v20 = vmul.f32 %v3843_v3, %v1422_v50  ;;  %v2734_v50 = vld [vmem:[%s3320_s13 + $0x958] sm:$0xff] }
 0x3fb   : > { %v1707_v33 = vpop.f32.mrf.mxu2 }
 0x3fc   : > { %v3863_v34 = vadd.f32 %v2924_v30, %v1707_v33  ;;  %v2675_v33 = vld [vmem:[%s3320_s13 + $0x790] sm:$0xff] }
 0x3fd   : > { %1926 = vmatpush.msra.mxu2 %v2675_v33 }
 0x3fe   : > { %v1719_v35 = vmax.f32 %v3863_v34, 0.0  ;;  %v2733_v34 = vld [vmem:[%s3320_s13 + $0x950] sm:$0xff] }
 0x400   : > { %1758 = vmatmul.f32.vlgmr.msrb.gmra.mxu3 %v1719_v35 }
 0x403   : > { %v1710_v46 = vpop.f32.mrf.mxu2 }
 0x404   : > { %v3869_v21 = vadd.f32 %v2924_v30, %v1710_v46  ;;  %v2720_v46 = vld [vmem:[%s3320_s13 + $0x8e8] sm:$0xff] }
 0x405   : > { %2073 = vmatpush.msrb.mxu0 %v2720_v46  ;;  %v2710_v46 = vld [vmem:[%s3320_s13 + $0x898] sm:$0xff] }
 0x406   : > { %v1720_v38 = vmax.f32 %v3869_v21, 0.0 }
 0x408   : > { %1761 = vmatmul.f32.gmra.mxu3 %v1720_v38 }
 0x40b   : > { %v1713_v41 = vpop.f32.mrf.mxu2 }
 0x40c   : > { %v3874_v42 = vadd.f32 %v2924_v30, %v1713_v41  ;;  %v2704_v41 = vld [vmem:[%s3320_s13 + $0x868] sm:$0xff] }
 0x40e   : > { %v1721_v47 = vmax.f32 %v3874_v42, 0.0  ;;  %v2771_v42 = vld [vmem:[%s3320_s13 + $0xa50] sm:$0xff] }
 0x410   : > { %1764 = vmatmul.f32.gmra.mxu3 %v1721_v47 }
 0x413   : > { %v1716_v51 = vpop.f32.mrf.mxu2 }
 0x414   : > { %v3879_v48 = vadd.f32 %v2924_v30, %v1716_v51  ;;  %v2705_v30 = vld [vmem:[%s3320_s13 + $0x870] sm:$0xff]  ;;  %v2674_v51 = vld [vmem:[%s3320_s13 + $0x788] sm:$0xff] }
 0x415   : > { %2095 = vmatpush.msrb.mxu1 %v2705_v30  ;;  %1927 = vmatpush.msra.mxu2 %v2674_v51  ;;  %v2695_v30 = vld [vmem:[%s3320_s13 + $0x820] sm:$0xff] }
 0x416   : > { %v1722_v23 = vmax.f32 %v3879_v48, 0.0  ;;  %v2729_v48 = vld [vmem:[%s3320_s13 + $0x930] sm:$0xff] }
 0x417   : > { %2096 = vmatpush.msrb.mxu1 %v2704_v41  ;;  %1928 = vmatpush.msra.mxu2 %v2673_v55  ;;  %v2694_v41 = vld [vmem:[%s3320_s13 + $0x818] sm:$0xff]  ;;  %v2708_v55 = vld [vmem:[%s3320_s13 + $0x888] sm:$0xff] }
 0x418   : > { %1767 = vmatmul.f32.gmra.mxu3 %v1722_v23 }
 0x419   : > { %2134 = vmatpush.msrb.mxu2 %v2738_v13 }
 0x41f   : > { %v1883_v51 = vpop.f32.mrf.mxu1 }
 0x420   : > { %2759 = vmatmul.msk.f32.vlgmr.msra.gmra.mxu3 %vm796_vm3, %v2030_v52  ;;  %v2719_v52 = vld [vmem:[%s3320_s13 + $0x8e0] sm:$0xff] }
 0x421   : > { %2074 = vmatpush.msrb.mxu0 %v2719_v52  ;;  %v2709_v52 = vld [vmem:[%s3320_s13 + $0x890] sm:$0xff] }
 0x423   : > { %2075 = vmatpush.msrb.mxu0 %v2718_v57  ;;  %v2692_v57 = vld [vmem:[%s3320_s13 + $0x808] sm:$0xff] }
 0x425   : > { %2076 = vmatpush.msrb.mxu0 %v2717_v60  ;;  %v2691_v60 = vld [vmem:[%s3320_s13 + $0x800] sm:$0xff] }
 0x427   : > { %2077 = vmatpush.msrb.mxu0 %v2716_v62 }
 0x428   : > { %2760 = vmatmul.msk.f32.gmra.mxu3 %vm796_vm3, %v2031_v44  ;;  %v2703_v44 = vld [vmem:[%s3320_s13 + $0x860] sm:$0xff] }
 0x429   : > { %2097 = vmatpush.msrb.mxu1 %v2703_v44  ;;  %2078 = vmatpush.msrb.mxu0 %v2715_v63  ;;  %v2693_v44 = vld [vmem:[%s3320_s13 + $0x810] sm:$0xff] }
 0x42a   : > { %v3941_v63 = vld [vmem:[#allocation4] sm:$0xff] }
 0x42b   : > { %2098 = vmatpush.msrb.mxu1 %v2702_v58  ;;  %2079 = vmatpush.msrb.mxu0 %v2714_v25  ;;  %v2707_v58 = vld [vmem:[%s3320_s13 + $0x880] sm:$0xff] }
 0x42d   : > { %2099 = vmatpush.msrb.mxu1 %v2701_v61  ;;  %2080 = vmatpush.msrb.mxu0 %v2713_v12 }
 0x42f   : > { %2100 = vmatpush.msrb.mxu1 %v2700_v7  ;;  %2081 = vmatpush.msrb.mxu0 %v2712_v18  ;;  %v2925_v7 = vld [vmem:[%s3334_s18 + $0xe] ss:$0 sm:$0xff] }
 0x431   : > { %2101 = vmatpush.msrb.mxu1 %v2699_v5  ;;  %2082 = vmatpush.msrb.mxu0 %v2711_v26  ;;  %v3944_v26 = vld [vmem:[#allocation4 + $0x8] sm:$0xff] }
 0x433   : > { %2102 = vmatpush.msrb.mxu1 %v2698_v43  ;;  %2083 = vmatpush.msrb.mxu0 %v2710_v46 }
 0x435   : > { %2103 = vmatpush.msrb.mxu1 %v2697_v14  ;;  %2084 = vmatpush.msrb.mxu0 %v2709_v52 }
 0x437   : > { %2104 = vmatpush.msrb.mxu1 %v2696_v19  ;;  %2085 = vmatpush.msrb.mxu0 %v2708_v55 }
 0x439   : > { %2105 = vmatpush.msrb.mxu1 %v2695_v30  ;;  %2086 = vmatpush.msrb.mxu0 %v2707_v58 }
 0x43b   : > { %2106 = vmatpush.msrb.mxu1 %v2694_v41 }
 0x43d   : > { %2107 = vmatpush.msrb.mxu1 %v2693_v44 }
 0x43f   : > { %2108 = vmatpush.msrb.mxu1 %v2692_v57 }
 0x440   : > { %v1886_v43 = vpop.f32.mrf.mxu1 }
 0x441   : > { %2109 = vmatpush.msrb.mxu1 %v2691_v60 }
 0x442   : > { %2110 = vmatmul.f32.vlgmr.msrb.gmra.mxu1 %v3941_v63 }
 0x448   : > { %v1889_v41 = vpop.f32.mrf.mxu1 }
 0x44a   : > { %2113 = vmatmul.f32.gmra.mxu1 %v3944_v26 }
 0x45d   : > { %v1788_v33 = vpop.f32.mrf.mxu0 }
 0x465   : > { %v1791_v5 = vpop.f32.mrf.mxu0 }
 0x46d   : > { %v1794_v46 = vpop.f32.mrf.mxu0 }
 0x475   : > { %v1797_v58 = vpop.f32.mrf.mxu0 }
 0x483   : > { %v1759_v61 = vpop.f32.mrf.mxu3 }
 0x484   : > { %v1789_v62 = vadd.f32 %v1788_v33, %v1759_v61 }
 0x486   : > { %v1895_v25 = vadd.f32 %v1883_v51, %v1789_v62  ;;  %v1892_v62 = vpop.f32.mrf.mxu1 }
 0x488   : > { %v1902_v12 = vadd.f32 %v2925_v7, %v1895_v25 }
 0x48a   : > { %v1906_v14 = vmax.f32 %v1902_v12, 0.0 }
 0x48b   : > { %v1762_v18 = vpop.f32.mrf.mxu3 }
 0x48c   : > { %v1792_v19 = vadd.f32 %v1791_v5, %v1762_v18  ;;  %1929 = vmatmul.f32.vlgmr.msra.gmra.mxu2 %v1906_v14 }
 0x48e   : > { %v1896_v30 = vadd.f32 %v1886_v43, %v1792_v19 }
 0x490   : > { %v1903_v33 = vadd.f32 %v2925_v7, %v1896_v30 }
 0x492   : > { %v1907_v52 = vmax.f32 %v1903_v33, 0.0 }
 0x493   : > { %v1765_v44 = vpop.f32.mrf.mxu3 }
 0x494   : > { %v1795_v55 = vadd.f32 %v1794_v46, %v1765_v44  ;;  %1932 = vmatmul.f32.gmra.mxu2 %v1907_v52  ;;  %v978_v52 = vmul.f32 %v3722_v53, %v971_v16  ;;  %v3118_v44 = vmov 127   ;;  %v2736_v16 = vld [vmem:[%s3320_s13 + $0x968] sm:$0xff] }
 0x495   : > { %2910 = vset.pattern.permute.xlu0 %v3118_v44  ;;  %2911 = vset.pattern.permute.xlu1 %v3118_v44 }
 0x496   : > { %v1897_v57 = vadd.f32 %v1889_v41, %v1795_v55  ;;  %2909 = vset.pattern.permute.xlu2 %v3118_v44  ;;  %v1428_v55 = vmul.f32 %v3843_v3, %v1421_v22  ;;  %v989_v22 = vadd.f32 %v3722_v53, %v982_v24 }
 0x498   : > { %v1904_v51 = vadd.f32 %v2925_v7, %v1897_v57  ;;  %v2737_v57 = vld [vmem:[%s3320_s13 + $0x970] sm:$0xff] }
 0x499   : > { %2135 = vmatpush.msrb.mxu2 %v2737_v57 }
 0x49a   : > { %v1908_v60 = vmax.f32 %v1904_v51, 0.0  ;;  %v3972_v51 = vld [vmem:[%s3334_s18 + $0xd] ss:$0 sm:$0xff] }
 0x49b   : > { %v1768_v61 = vpop.f32.mrf.mxu3  ;;  %2136 = vmatpush.msrb.mxu2 %v2736_v16  ;;  %v1726_v56 = vmul.f32 %v3972_v51, %v1719_v35  ;;  %v1729_v21 = vmul.f32 %v3972_v51, %v1722_v23  ;;  %v2732_v35 = vld [vmem:[%s3320_s13 + $0x948] sm:$0xff] }
 0x49c   : > { %v1798_v5 = vadd.f32 %v1797_v58, %v1768_v61  ;;  %1935 = vmatmul.f32.gmra.mxu2 %v1908_v60  ;;  %v2728_v23 = vld [vmem:[%s3320_s13 + $0x928] sm:$0xff]  ;;  %v2727_v58 = vld [vmem:[%s3320_s13 + $0x920] sm:$0xff]  ;;  %v2726_v60 = vld [vmem:[%s3320_s13 + $0x918] sm:$0xff] }
 0x49d   : > { %2137 = vmatpush.msrb.mxu2 %v2735_v27  ;;  %v2725_v61 = vld [vmem:[%s3320_s13 + $0x910] sm:$0xff] }
 0x49e   : > { %v1898_v25 = vadd.f32 %v1892_v62, %v1798_v5  ;;  %v2724_v62 = vld [vmem:[%s3320_s13 + $0x908] sm:$0xff]  ;;  %v2723_v5 = vld [vmem:[%s3320_s13 + $0x900] sm:$0xff] }
 0x49f   : > { %2138 = vmatpush.msrb.mxu2 %v2734_v50 }
 0x4a0   : > { %v1905_v12 = vadd.f32 %v2925_v7, %v1898_v25 }
 0x4a1   : > { %2139 = vmatpush.msrb.mxu2 %v2733_v34 }
 0x4a2   : > { %v1909_v14 = vmax.f32 %v1905_v12, 0.0 }
 0x4a3   : > { %v2055_v18 = vpop.f32.mrf.mxu3  ;;  %2140 = vmatpush.msrb.mxu2 %v2732_v35 }
 0x4a4   : > { %v2061_v43 = vsub.f32 %v3941_v63, %v2055_v18  ;;  %1938 = vmatmul.f32.gmra.mxu2 %v1909_v14  ;;  %2087 = vmatmul.f32.vlgmr.msrb.gmra.mxu0 %v2055_v18 }
 0x4a6   : > { %v3949_v19 = vmul.f32 %v3332_v4, %v2061_v43  ;;  %v4008_v43 = vld [vmem:[%s3334_s18 + $0xf] ss:$0 sm:$0xff] }
 0x4a8   : > { %v2065_v30 = vmul.f32 %v3949_v19, %v3949_v19 }
 0x4aa   : > { %2067 = vadd.xlane.f32.xlu0 %v2065_v30  ;;  %v2928_v30 = vld [vmem:[%s3334_s18 + $0x10] ss:$0 sm:$0xff] }
 0x4ab   : > { %v2058_v46 = vpop.f32.mrf.mxu3 }
 0x4ac   : > { %v2062_v33 = vsub.f32 %v3944_v26, %v2058_v46  ;;  %2090 = vmatmul.f32.gmra.mxu0 %v2058_v46 }
 0x4ae   : > { %v3955_v7 = vmul.f32 %v3332_v4, %v2062_v33  ;;  %v979_v4 = vmul.f32 %v3722_v53, %v972_v32  ;;  %v1727_v32 = vmul.f32 %v3972_v51, %v1720_v38  ;;  %v2731_v53 = vld [vmem:[%s3320_s13 + $0x940] sm:$0xff]  ;;  %v2730_v38 = vld [vmem:[%s3320_s13 + $0x938] sm:$0xff] }
 0x4af   : > { %2141 = vmatpush.msrb.mxu2 %v2731_v53 }
 0x4b0   : > { %v2066_v41 = vmul.f32 %v3955_v7, %v3955_v7 }
 0x4b1   : > { %2142 = vmatpush.msrb.mxu2 %v2730_v38 }
 0x4b2   : > { %2069 = vadd.xlane.f32.xlu1 %v2066_v41  ;;  %983 = vadd.xlane.f32.xlu0 %v978_v52 }
 0x4b3   : > { %2143 = vmatpush.msrb.mxu2 %v2729_v48 }
 0x4b5   : > { %2144 = vmatpush.msrb.mxu2 %v2728_v23 }
 0x4b7   : > { %2145 = vmatpush.msrb.mxu2 %v2727_v58 }
 0x4b9   : > { %2146 = vmatpush.msrb.mxu2 %v2726_v60 }
 0x4ba   : > { %985 = vadd.xlane.f32.xlu1 %v979_v4  ;;  %1434 = vadd.xlane.f32.xlu0 %v1428_v55  ;;  %v2929_v4 = vld [vmem:[%s3334_s18 + $0x11] ss:$0 sm:$0xff]  ;;  %v988_v55 = vpop.xlane.xlu2 %987 }
 0x4bb   : > { %2147 = vmatpush.msrb.mxu2 %v2725_v61 }
 0x4bd   : > { %2148 = vmatpush.msrb.mxu2 %v2724_v62 }
 0x4bf   : > { %2149 = vmatpush.msrb.mxu2 %v2723_v5  ;;  %v2111_v18 = vpop.f32.mrf.mxu1 }
 0x4c2   : > { %1430 = vadd.xlane.f32.xlu1 %v1426_v28  ;;  %1732 = vadd.xlane.f32.xlu0 %v1727_v32  ;;  %v2940_v32 = vld [vmem:[%s3334_s18 + $0x3] ss:$0 sm:$0xff]  ;;  %v1433_v50 = vpop.xlane.xlu2 %1432 }
 0x4c3   : > { %v1439_v38 = vadd.f32 %v3843_v3, %v1433_v50  ;;  %v992_v5 = vadd.f32 %v2940_v32, %v988_v55  ;;  %v1145_v55 = vadd.f32 %v3791_v40, %v3784_v1  ;;  %v2775_v1 = vld [vmem:[%s3320_s13 + $0xa70] sm:$0xff]  ;;  %v2774_v40 = vld [vmem:[%s3320_s13 + $0xa68] sm:$0xff]  ;;  %v2768_v50 = vld [vmem:[%s3320_s13 + $0xa38] sm:$0xff] }
 0x4ca   : > { %1436 = vadd.xlane.f32.xlu1 %v1429_v20 }
 0x4d2   : > { %1730 = vadd.xlane.f32.xlu1 %v1726_v56  ;;  %v2114_v56 = vpop.f32.mrf.mxu1 }
 0x4d6   : > { %995 = vperm.xlu0 %2910, %v989_v22  }
 0x4da   : > { %1736 = vadd.xlane.f32.xlu1 %v1729_v21 }
 0x50f   : > { %v4003_v25 = vpop.f32.mrf.mxu2 }
 0x517   : > { %v4005_v12 = vpop.f32.mrf.mxu2 }
 0x51d   : > { %v2068_v14 = vpop.xlane.xlu0 %2067 }
 0x51e   : > { %v2120_v52 = vmul.f32 %v2928_v30, %v2068_v14 }
 0x51f   : > { %v1936_v46 = vpop.f32.mrf.mxu2 }
 0x520   : > { %v4012_v33 = vadd.f32 %v4008_v43, %v1936_v46 }
 0x521   : > { %v2088_v41 = vpop.f32.mrf.mxu0 }
 0x522   : > { %v2112_v44 = vadd.f32 %v2111_v18, %v2088_v41 }
 0x524   : > { %v2122_v13 = vadd.f32 %v2120_v52, %v2112_v44 }
 0x525   : > { %v2070_v57 = vpop.xlane.xlu1 %2069  ;;  %v984_v16 = vpop.xlane.xlu0 %983 }
 0x526   : > { %v2127_v28 = vadd.f32 %v2929_v4, %v2122_v13  ;;  %v990_v20 = vadd.f32 %v2940_v32, %v984_v16  ;;  %v2121_v21 = vmul.f32 %v2928_v30, %v2070_v57  ;;  %v2941_v13 = vld [vmem:[#allocation2 + $0x10] sm:$0xff] }
 0x528   : > { %v2129_v24 = vmax.f32 %v2127_v28, 0.0  ;;  %1000 = vperm.xlu1 %2911, %v990_v20   ;;  %v2773_v28 = vld [vmem:[%s3320_s13 + $0xa60] sm:$0xff]  ;;  %v2772_v20 = vld [vmem:[%s3320_s13 + $0xa58] sm:$0xff] }
 0x529   : > { %v2091_v22 = vpop.f32.mrf.mxu0 }
 0x52a   : > { %v2115_v27 = vadd.f32 %v2114_v56, %v2091_v22  ;;  %2150 = vmatmul.f32.vlgmr.msrb.gmra.mxu2 %v2129_v24  ;;  %v2753_v56 = vld [vmem:[%s3320_s13 + $0x9f0] sm:$0xff]  ;;  %v2770_v24 = vld [vmem:[%s3320_s13 + $0xa48] sm:$0xff]  ;;  %v2751_v22 = vld [vmem:[%s3320_s13 + $0x9e0] sm:$0xff] }
 0x52c   : > { %v2123_v34 = vadd.f32 %v2121_v21, %v2115_v27  ;;  %v2769_v21 = vld [vmem:[%s3320_s13 + $0xa40] sm:$0xff]  ;;  %v2750_v27 = vld [vmem:[%s3320_s13 + $0x9d8] sm:$0xff] }
 0x52d   : > { %v986_v35 = vpop.xlane.xlu1 %985  ;;  %v1435_v53 = vpop.xlane.xlu0 %1434 }
 0x52e   : > { %v991_v48 = vadd.f32 %v2940_v32, %v986_v35  ;;  %v1440_v23 = vadd.f32 %v3843_v3, %v1435_v53  ;;  %v2128_v58 = vadd.f32 %v2929_v4, %v2123_v34  ;;  %v2754_v32 = vld [vmem:[%s3320_s13 + $0x9f8] sm:$0xff]  ;;  %v2749_v34 = vld [vmem:[%s3320_s13 + $0x9d0] sm:$0xff]  ;;  %v2748_v53 = vld [vmem:[%s3320_s13 + $0x9c8] sm:$0xff] }
 0x52f   : > { %2243 = vmatpush.msra.mxu0 %v2754_v32  ;;  %v2767_v35 = vld [vmem:[%s3320_s13 + $0xa30] sm:$0xff] }
 0x530   : > { %1005 = vperm.xlu2 %2909, %v991_v48   ;;  %1449 = vperm.xlu1 %2911, %v1439_v38   ;;  %v2130_v60 = vmax.f32 %v2128_v58, 0.0  ;;  %v2766_v38 = vld [vmem:[%s3320_s13 + $0xa28] sm:$0xff]  ;;  %v2747_v48 = vld [vmem:[%s3320_s13 + $0x9c0] sm:$0xff]  ;;  %v2746_v58 = vld [vmem:[%s3320_s13 + $0x9b8] sm:$0xff] }
 0x531   : > { %1454 = vperm.xlu0 %2910, %v1440_v23   ;;  %2244 = vmatpush.msra.mxu0 %v2753_v56  ;;  %v2765_v23 = vld [vmem:[%s3320_s13 + $0xa20] sm:$0xff] }
 0x532   : > { %2153 = vmatmul.f32.gmra.mxu2 %v2130_v60  ;;  %v2764_v60 = vld [vmem:[%s3320_s13 + $0xa18] sm:$0xff] }
 0x535   : > { %v1431_v61 = vpop.xlane.xlu1 %1430  ;;  %v1733_v62 = vpop.xlane.xlu0 %1732 }
 0x536   : > { %v1739_v14 = vadd.f32 %v3972_v51, %v1733_v62  ;;  %v1438_v30 = vadd.f32 %v3843_v3, %v1431_v61  ;;  %v2745_v61 = vld [vmem:[%s3320_s13 + $0x9b0] sm:$0xff] }
 0x537   : > { %v2763_v62 = vld [vmem:[%s3320_s13 + $0xa10] sm:$0xff] }
 0x538   : > { %1010 = vperm.xlu2 %2909, %v992_v5   ;;  %v2744_v5 = vld [vmem:[%s3320_s13 + $0x9a8] sm:$0xff] }
 0x539   : > { %1807 = vperm.xlu0 %2910, %v1739_v14   ;;  %v2762_v14 = vld [vmem:[%s3320_s13 + $0xa08] sm:$0xff] }
 0x53d   : > { %v1437_v18 = vpop.xlane.xlu1 %1436 }
 0x53e   : > { %v1441_v41 = vadd.f32 %v3843_v3, %v1437_v18  ;;  %v2776_v3 = vld [vmem:[%s3320_s13 + $0xa78] sm:$0xff]  ;;  %v2743_v18 = vld [vmem:[%s3320_s13 + $0x9a0] sm:$0xff] }
 0x53f   : > { %2220 = vmatpush.msrb.mxu3 %v2776_v3  ;;  %v2739_v3 = vld [vmem:[%s3320_s13 + $0x980] sm:$0xff] }
 0x540   : > { %1444 = vperm.xlu2 %2909, %v1438_v30  }
 0x541   : > { %2221 = vmatpush.msrb.mxu3 %v2775_v1  ;;  %v2943_v1 = vld [vmem:[#allocation2 + $0x8] sm:$0xff] }
 0x543   : > { %2222 = vmatpush.msrb.mxu3 %v2774_v40 }
 0x545   : > { %v1731_v46 = vpop.xlane.xlu1 %1730  ;;  %2223 = vmatpush.msrb.mxu3 %v2773_v28 }
 0x546   : > { %v1738_v52 = vadd.f32 %v3972_v51, %v1731_v46 }
 0x547   : > { %2224 = vmatpush.msrb.mxu3 %v2772_v20 }
 0x548   : > { %1459 = vperm.xlu2 %2909, %v1441_v41   ;;  %1802 = vperm.xlu1 %2911, %v1738_v52   ;;  %v996_v44 = vpop.permute.xlu0 %995  ;;  %v2761_v41 = vld [vmem:[%s3320_s13 + $0xa00] sm:$0xff]  ;;  %v2742_v52 = vld [vmem:[%s3320_s13 + $0x998] sm:$0xff] }
 0x549   : > { %v1013_v4 = vmul.f32 %v996_v44, %v3455_v31  ;;  %v1728_v31 = vmul.f32 %v3972_v51, %v1721_v47  ;;  %v2752_v47 = vld [vmem:[%s3320_s13 + $0x9e8] sm:$0xff]  ;;  %2225 = vmatpush.msrb.mxu3 %v2771_v42  ;;  %v4090_v42 = vpop.f32.mrf.mxu2 }
 0x54a   : > { %2245 = vmatpush.msra.mxu0 %v2752_v47  ;;  %v2942_v44 = vld [vmem:[#allocation2 + $0x18] sm:$0xff] }
 0x54b   : > { %v1156_v57 = vadd.f32 %v2941_v13, %v1013_v4  ;;  %2226 = vmatpush.msrb.mxu3 %v2770_v24  ;;  %v2930_v24 = vld [vmem:[%s3334_s18 + $0x12] ss:$0 sm:$0xff] }
 0x54c   : > { %2246 = vmatpush.msra.mxu0 %v2751_v22 }
 0x54d   : > { %v1161_v16 = vsel %vm3326_vm2, %v1156_v57, %v1145_v55  ;;  %2227 = vmatpush.msrb.mxu3 %v2769_v21  ;;  %v2741_v55 = vld [vmem:[%s3320_s13 + $0x990] sm:$0xff]  ;;  %v2740_v57 = vld [vmem:[%s3320_s13 + $0x988] sm:$0xff] }
 0x54e   : > { %2303 = vst [vmem:[#allocation2 + $0x10] sm:$0xff] %v1161_v16  ;;  %2247 = vmatpush.msra.mxu0 %v2750_v27 }
 0x54f   : > { %2307 = vst [vmem:[%s4239_s14] sm:$0xff] %v1161_v16  ;;  %2228 = vmatpush.msrb.mxu3 %v2768_v50 }
 0x550   : > { %2248 = vmatpush.msra.mxu0 %v2749_v34 }
 0x551   : > { %2229 = vmatpush.msrb.mxu3 %v2767_v35 }
 0x552   : > { %2249 = vmatpush.msra.mxu0 %v2748_v53 }
 0x553   : > { %2230 = vmatpush.msrb.mxu3 %v2766_v38  ;;  %v1934_v38 = vadd.f32 %v4008_v43, %v4005_v12 }
 0x554   : > { %2250 = vmatpush.msra.mxu0 %v2747_v48 }
 0x555   : > { %2231 = vmatpush.msrb.mxu3 %v2765_v23 }
 0x556   : > { %2251 = vmatpush.msra.mxu0 %v2746_v58 }
 0x557   : > { %2232 = vmatpush.msrb.mxu3 %v2764_v60 }
 0x558   : > { %2252 = vmatpush.msra.mxu0 %v2745_v61 }
 0x559   : > { %2233 = vmatpush.msrb.mxu3 %v2763_v62 }
 0x55a   : > { %2253 = vmatpush.msra.mxu0 %v2744_v5 }
 0x55b   : > { %2234 = vmatpush.msrb.mxu3 %v2762_v14 }
 0x55c   : > { %2254 = vmatpush.msra.mxu0 %v2743_v18 }
 0x55d   : > { %2235 = vmatpush.msrb.mxu3 %v2761_v41 }
 0x55e   : > { %2255 = vmatpush.msra.mxu0 %v2742_v52  ;;  %2236 = vmatmul.f32.vlgmr.msrb.gmra.mxu3 %v3941_v63  ;;  %v2791_v52 = vld [vmem:[%s3320_s13 + $0xaf0] sm:$0xff] }
 0x560   : > { %2256 = vmatpush.msra.mxu0 %v2741_v55  ;;  %v2786_v55 = vld [vmem:[%s3320_s13 + $0xac8] sm:$0xff] }
 0x562   : > { %2257 = vmatpush.msra.mxu0 %v2740_v57  ;;  %v2784_v57 = vld [vmem:[%s3320_s13 + $0xab8] sm:$0xff] }
 0x564   : > { %2258 = vmatpush.msra.mxu0 %v2739_v3 }
 0x566   : > { %2239 = vmatmul.f32.gmra.mxu3 %v3944_v26 }
 0x571   : > { %1734 = vadd.xlane.f32.xlu2 %v1728_v31 }
 0x58a   : > { %v1006_v30 = vpop.permute.xlu2 %1005 }
 0x58b   : > { %v1015_v46 = vmul.f32 %v1006_v30, %v3474_v49  ;;  %v1737_v49 = vpop.xlane.xlu1 %1736  ;;  %v1931_v30 = vadd.f32 %v4008_v43, %v4003_v25  ;;  %v2790_v25 = vld [vmem:[%s3320_s13 + $0xae8] sm:$0xff] }
 0x58d   : > { %v1158_v4 = vadd.f32 %v2942_v44, %v1015_v46  ;;  %v2788_v44 = vld [vmem:[%s3320_s13 + $0xad8] sm:$0xff] }
 0x58f   : > { %v1163_v13 = vsel %vm3326_vm2, %v1158_v4, %v3803_v9  ;;  %v2787_v4 = vld [vmem:[%s3320_s13 + $0xad0] sm:$0xff] }
 0x590   : > { %2305 = vst [vmem:[#allocation2 + $0x18] sm:$0xff] %v1163_v13 }
 0x591   : > { %2309 = vst [vmem:[%s4239_s14 + $0x10] sm:$0xff] %v1163_v13  ;;  %v2785_v13 = vld [vmem:[%s3320_s13 + $0xac0] sm:$0xff] }
 0x592   : > { %v1011_v16 = vpop.permute.xlu2 %1010 }
 0x593   : > { %v1016_v31 = vmul.f32 %v1011_v16, %v3480_v54  ;;  %v2944_v54 = vld [vmem:[#allocation2] sm:$0xff] }
 0x595   : > { %v1159_v40 = vadd.f32 %v2943_v1, %v1016_v31  ;;  %v2783_v31 = vld [vmem:[%s3320_s13 + $0xab0] sm:$0xff]  ;;  %v2782_v1 = vld [vmem:[%s3320_s13 + $0xaa8] sm:$0xff] }
 0x597   : > { %v1164_v9 = vsel %vm3326_vm2, %v1159_v40, %v3814_v36  ;;  %v2781_v40 = vld [vmem:[%s3320_s13 + $0xaa0] sm:$0xff] }
 0x598   : > { %2306 = vst [vmem:[#allocation2 + $0x8] sm:$0xff] %v1164_v9 }
 0x599   : > { %2310 = vst [vmem:[%s4239_s14 + $0x18] sm:$0xff] %v1164_v9  ;;  %v2780_v9 = vld [vmem:[%s3320_s13 + $0xa98] sm:$0xff] }
 0x59a   : > { %v1001_v28 = vpop.permute.xlu1 %1000  ;;  %v1445_v60 = vpop.permute.xlu2 %1444 }
 0x59b   : > { %v1014_v32 = vmul.f32 %v1001_v28, %v3465_v39  ;;  %v1462_v62 = vmul.f32 %v1445_v60, %v3651_v59  ;;  %v1741_v59 = vadd.f32 %v3972_v51, %v1737_v49  ;;  %v2779_v28 = vld [vmem:[%s3320_s13 + $0xa90] sm:$0xff] }
 0x59d   : > { %v1157_v20 = vadd.f32 %v2944_v54, %v1014_v32  ;;  %v2777_v32 = vld [vmem:[%s3320_s13 + $0xa80] sm:$0xff] }
 0x59f   : > { %v1162_v56 = vsel %vm3326_vm2, %v1157_v20, %v3795_v10  ;;  %v4096_v10 = vld [vmem:[%s3334_s18 + $0x13] ss:$0 sm:$0xff] }
 0x5a0   : > { %2304 = vst [vmem:[#allocation2] sm:$0xff] %v1162_v56 }
 0x5a1   : > { %2308 = vst [vmem:[%s4239_s14 + $0x8] sm:$0xff] %v1162_v56 }
 0x5a2   : > { %v1450_v47 = vpop.permute.xlu1 %1449  ;;  %v1460_v49 = vpop.permute.xlu2 %1459 }
 0x5a3   : > { %v4088_v36 = vpop.permute.xlu0 %1454  ;;  %v1463_v39 = vmul.f32 %v1450_v47, %v3660_v0  ;;  %v2932_v47 = vld [vmem:[%s3334_s18 + $0x14] ss:$0 sm:$0xff] }
 0x5ab   : > { %v1808_v22 = vpop.permute.xlu0 %1807 }
 0x5ac   : > { %v1821_v21 = vmul.f32 %v1808_v22, %v3691_v29 }
 0x5ad   : > { %v2151_v27 = vpop.f32.mrf.mxu2 }
 0x5ae   : > { %v1825_v50 = vadd.f32 %v1821_v21, %v1463_v39  ;;  %v2152_v34 = vadd.f32 %v2930_v24, %v2151_v27 }
 0x5b0   : > { %v1943_v35 = vmul.f32 0.5, %v1825_v50  ;;  %v2157_v53 = vmax.f32 %v2152_v34, 0.0 }
 0x5b2   : > { %v1947_v48 = vadd.f32 %v3839_v8, %v1943_v35  ;;  %2259 = vmatmul.f32.vlgmr.msra.gmra.mxu0 %v2157_v53  ;;  %v2162_v23 = vmul.f32 %v4096_v10, %v2157_v53 }
 0x5b4   : > { %v1951_v0 = vsel %vm3326_vm2, %v1947_v48, %v1934_v38  ;;  %2164 = vadd.xlane.f32.xlu0 %v2162_v23  ;;  %v1465_v23 = vmul.f32 %v1460_v49, %v3674_v11 }
 0x5b5   : > { %2312 = vst [vmem:[#allocation3 + $0x18] sm:$0xff] %v1951_v0  ;;  %v2154_v29 = vpop.f32.mrf.mxu2 }
 0x5b6   : > { %2316 = vst [vmem:[%s4240_s8 + $0x8] sm:$0xff] %v1951_v0  ;;  %v2155_v58 = vadd.f32 %v2930_v24, %v2154_v29 }
 0x5b8   : > { %v2158_v61 = vmax.f32 %v2155_v58, 0.0 }
 0x5ba   : > { %2262 = vmatmul.f32.gmra.mxu0 %v2158_v61  ;;  %v1803_v8 = vpop.permute.xlu1 %1802  ;;  %v2163_v12 = vmul.f32 %v4096_v10, %v2158_v61  ;;  %v2945_v61 = vld [vmem:[#allocation3 + $0x10] sm:$0xff] }
 0x5bb   : > { %v1820_v5 = vmul.f32 %v1803_v8, %v3681_v17  ;;  %v2792_v17 = vld [vmem:[%s3320_s13 + $0xaf8] sm:$0xff] }
 0x5bc   : > { %2166 = vadd.xlane.f32.xlu2 %v2163_v12  ;;  %2276 = vmatpush.msra.mxu1 %v2792_v17 }
 0x5bd   : > { %v1824_v14 = vadd.f32 %v1820_v5, %v1462_v62  ;;  %2813 = vmatpush.msra.mxu2 %v2792_v17  ;;  %v1464_v62 = vmul.f32 %v4088_v36, %v3667_v6  ;;  %v2933_v36 = vld [vmem:[%s3334_s18 + $0x15] ss:$0 sm:$0xff] }
 0x5be   : > { %2277 = vmatpush.msra.mxu1 %v2791_v52 }
 0x5bf   : > { %v1942_v18 = vmul.f32 0.5, %v1824_v14  ;;  %2814 = vmatpush.msra.mxu2 %v2791_v52 }
 0x5c0   : > { %2278 = vmatpush.msra.mxu1 %v2790_v25 }
 0x5c1   : > { %v1946_v46 = vadd.f32 %v3846_v15, %v1942_v18  ;;  %v2789_v15 = vld [vmem:[%s3320_s13 + $0xae0] sm:$0xff]  ;;  %2815 = vmatpush.msra.mxu2 %v2790_v25 }
 0x5c2   : > { %2279 = vmatpush.msra.mxu1 %v2789_v15 }
 0x5c3   : > { %v1950_v41 = vsel %vm3326_vm2, %v1946_v46, %v1931_v30  ;;  %2816 = vmatpush.msra.mxu2 %v2789_v15 }
 0x5c4   : > { %2311 = vst [vmem:[#allocation3] sm:$0xff] %v1950_v41  ;;  %2280 = vmatpush.msra.mxu1 %v2788_v44 }
 0x5c5   : > { %2315 = vst [vmem:[%s4240_s8] sm:$0xff] %v1950_v41  ;;  %2817 = vmatpush.msra.mxu2 %v2788_v44 }
 0x5c6   : > { %2281 = vmatpush.msra.mxu1 %v2787_v4 }
 0x5c7   : > { %2818 = vmatpush.msra.mxu2 %v2787_v4 }
 0x5c8   : > { %1817 = vperm.xlu0 %2910, %v1741_v59   ;;  %2282 = vmatpush.msra.mxu1 %v2786_v55 }
 0x5c9   : > { %2819 = vmatpush.msra.mxu2 %v2786_v55 }
 0x5ca   : > { %2283 = vmatpush.msra.mxu1 %v2785_v13 }
 0x5cb   : > { %2820 = vmatpush.msra.mxu2 %v2785_v13 }
 0x5cc   : > { %2284 = vmatpush.msra.mxu1 %v2784_v57 }
 0x5cd   : > { %2821 = vmatpush.msra.mxu2 %v2784_v57 }
 0x5ce   : > { %2285 = vmatpush.msra.mxu1 %v2783_v31 }
 0x5cf   : > { %2822 = vmatpush.msra.mxu2 %v2783_v31 }
 0x5d0   : > { %2286 = vmatpush.msra.mxu1 %v2782_v1 }
 0x5d1   : > { %2823 = vmatpush.msra.mxu2 %v2782_v1 }
 0x5d2   : > { %2287 = vmatpush.msra.mxu1 %v2781_v40 }
 0x5d3   : > { %2824 = vmatpush.msra.mxu2 %v2781_v40 }
 0x5d4   : > { %2288 = vmatpush.msra.mxu1 %v2780_v9 }
 0x5d5   : > { %2825 = vmatpush.msra.mxu2 %v2780_v9 }
 0x5d6   : > { %2289 = vmatpush.msra.mxu1 %v2779_v28 }
 0x5d7   : > { %2826 = vmatpush.msra.mxu2 %v2779_v28 }
 0x5e1   : > { %v2237_v56 = vpop.f32.mrf.mxu3 }
 0x5e4   : > { %v1735_v16 = vpop.xlane.xlu2 %1734 }
 0x5e5   : > { %v1740_v3 = vadd.f32 %v3972_v51, %v1735_v16  ;;  %v2778_v51 = vld [vmem:[%s3320_s13 + $0xa88] sm:$0xff] }
 0x5e6   : > { %2290 = vmatpush.msra.mxu1 %v2778_v51  ;;  %2827 = vmatpush.msra.mxu2 %v2778_v51 }
 0x5e7   : > { %1812 = vperm.xlu2 %2909, %v1740_v3  }
 0x5e8   : > { %2291 = vmatpush.msra.mxu1 %v2777_v32  ;;  %2828 = vmatpush.msra.mxu2 %v2777_v32 }
 0x5e9   : > { %v2240_v34 = vpop.f32.mrf.mxu3 }
 0x627   : > { %v2165_v54 = vpop.xlane.xlu0 %2164 }
 0x628   : > { %v2168_v20 = vadd.f32 %v4096_v10, %v2165_v54 }
 0x62a   : > { %2172 = vperm.xlu1 %2911, %v2168_v20  }
 0x62f   : > { %v2260_v24 = vpop.f32.mrf.mxu0  ;;  %v2167_v22 = vpop.xlane.xlu2 %2166 }
 0x630   : > { %v2261_v39 = vadd.f32 %v2260_v24, %v2237_v56  ;;  %v2169_v21 = vadd.f32 %v4096_v10, %v2167_v22  ;;  %v1940_v10 = vadd.f32 %v4008_v43, %v4090_v42  ;;  %v2946_v43 = vld [vmem:[#allocation3 + $0x8] sm:$0xff] }
 0x632   : > { %v2269_v27 = vadd.f32 %v2932_v47, %v2261_v39  ;;  %2177 = vperm.xlu2 %2909, %v2169_v21  }
 0x634   : > { %v2271_v50 = vmax.f32 %v2269_v27, 0.0 }
 0x636   : > { %2292 = vmatmul.f32.vlgmr.msra.gmra.mxu1 %v2271_v50 }
 0x637   : > { %v2263_v35 = vpop.f32.mrf.mxu0 }
 0x638   : > { %v2264_v53 = vadd.f32 %v2263_v35, %v2240_v34 }
 0x63a   : > { %v2270_v38 = vadd.f32 %v2932_v47, %v2264_v53  ;;  %v1818_v48 = vpop.permute.xlu0 %1817 }
 0x63b   : > { %v1823_v0 = vmul.f32 %v1818_v48, %v3712_v45 }
 0x63c   : > { %v2272_v29 = vmax.f32 %v2270_v38, 0.0 }
 0x63d   : > { %v1827_v58 = vadd.f32 %v1823_v0, %v1465_v23 }
 0x63e   : > { %2295 = vmatmul.f32.vlgmr.msra.gmra.mxu2 %v2272_v29 }
 0x63f   : > { %v1945_v60 = vmul.f32 0.5, %v1827_v58 }
 0x641   : > { %v1949_v8 = vadd.f32 %v2945_v61, %v1945_v60  ;;  %v1813_v12 = vpop.permute.xlu2 %1812 }
 0x642   : > { %v1822_v5 = vmul.f32 %v1813_v12, %v3701_v37 }
 0x643   : > { %v1953_v11 = vsel %vm3326_vm2, %v1949_v8, %v1940_v10 }
 0x644   : > { %2314 = vst [vmem:[#allocation3 + $0x10] sm:$0xff] %v1953_v11  ;;  %v1826_v45 = vadd.f32 %v1822_v5, %v1464_v62 }
 0x645   : > { %2318 = vst [vmem:[%s4240_s8 + $0x18] sm:$0xff] %v1953_v11 }
 0x646   : > { %v1944_v14 = vmul.f32 0.5, %v1826_v45 }
 0x648   : > { %v1948_v42 = vadd.f32 %v2946_v43, %v1944_v14 }
 0x64a   : > { %v1952_v18 = vsel %vm3326_vm2, %v1948_v42, %v4012_v33 }
 0x64b   : > { %2313 = vst [vmem:[#allocation3 + $0x8] sm:$0xff] %v1952_v18 }
 0x64c   : > { %2317 = vst [vmem:[%s4240_s8 + $0x10] sm:$0xff] %v1952_v18 }
 0x68c   : > { %v2178_v33 = vpop.permute.xlu2 %2177 }
 0x68d   : > { %v2181_v17 = vmul.f32 %v2178_v33, %v3955_v7 }
 0x68f   : > { %v2300_v25 = vadd.f32 %v3944_v26, %v2181_v17 }
 0x69c   : > { %v2173_v6 = vpop.permute.xlu1 %2172 }
 0x69d   : > { %v2180_v37 = vmul.f32 %v2173_v6, %v3949_v19 }
 0x69f   : > { %v2299_v46 = vadd.f32 %v3941_v63, %v2180_v37 }
 0x6b3   : > { %v2293_v30 = vpop.f32.mrf.mxu1 }
 0x6b4   : > { %v2294_v41 = vadd.f32 %v2933_v36, %v2293_v30 }
 0x6b6   : > { %v2301_v59 = vsel %vm3326_vm2, %v2299_v46, %v2294_v41 }
 0x6b7   : > { %2319 = vst [vmem:[#allocation4] sm:$0xff] %v2301_v59 }
 0x6b8   : > { %2321 = vst [vmem:[%s4241_s22] sm:$0xff] %v2301_v59 }
 0x6c1   : > { %v2296_v52 = vpop.f32.mrf.mxu2 }
 0x6c2   : > { %v2297_v19 = vadd.f32 %v2933_v36, %v2296_v52 }
 0x6c4   : > { %v2302_v15 = vsel %vm3326_vm2, %v2300_v25, %v2297_v19 }
 0x6c5   : > { %2320 = vst [vmem:[#allocation4 + $0x8] sm:$0xff] %v2302_v15 }
 0x6c6   : > { %2322 = vst [vmem:[%s4241_s22 + $0x8] sm:$0xff] %v2302_v15 }
 0x6c7 PF: > { %s4242_s28 = sld [smem:[#allocation14_spill]]  ;;  %s4244_s25 = smov %s3101_s26 }
 0x6c8   : > { %s4243_s11 = sld [smem:[#allocation15_spill]]  ;;  %s4245_s26 = smov %s3105_s27 }
 0x6cd   : > { %p23_p1 = scmp.ge.s32.totalorder %s4242_s28, 4  }
 0x6ce   : > { %s4246_s27 = smov %s4243_s11 }
 0x6cf   :  { %25 = sbr.rel (!%p23_p1) target bundleno = 14 (0xe), region = 184 }
 0x6d4   :  { %2346 = vsyncpa [#allocation6], 1 }
 0x6d5   :  { %2348 = vsyncpa [#allocation6 + $0x1], 1 }
 0x6d6   :  { %2349 = vsyncpa [#allocation8], 1 }

</bundles_post_ra>
